<compile_context>
chip_gen: v5e
topology: v5e:2x2
jax: 0.10.0
libtpu: 0.0.40
codegen_flags: <defaults>
</compile_context>

<pallas_src>
import jax
import jax.numpy as jnp
from jax.experimental import pallas as pl
from jax.experimental.pallas import tpu as pltpu

# Module-level constants implied by the PyTorch module (small-shape variant:
# hidden/output = 32; the reference defaults of 64 only change N*H to 512).
NUM_AREA = 8        # number of graph nodes per sample
NUM_FEATURES = 4    # input features per node
HIDDEN_DIM = 32
OUTPUT_DIM = 32
LN_EPS = 1e-5
LEAKY_SLOPE = 0.01  # F.leaky_relu default

assert HIDDEN_DIM == OUTPUT_DIM, "weight stacking below assumes H == O"


def _round_up(x, m):
    return (x + m - 1) // m * m


def _gnn_encoder_kernel(x_ref, k1_ref, kstack_ref, vec_ref, out_ref):
    """One batch tile: x (TB, N*F) -> out (TB, N*O), everything lane-dense."""
    x = x_ref[...]                      # (TB, N*F)   f32
    k1 = k1_ref[...]                    # (N*F, N*H)  kron(A^T, W1)
    k2 = kstack_ref[0]                  # (N*H, N*H)  kron(A^T, W2)
    k3 = kstack_ref[1]                  # (N*H, N*H)  kron(A^T, W3)
    kfc = kstack_ref[2]                 # (N*H, N*O)  kron(I_N, Wfc)
    mavg = kstack_ref[3]                # (N*H, N*H)  kron(I_N, 11^T / H)

    v = vec_ref[...]                    # (8, N*H): per-node-tiled vectors
    b1, g1, be1 = v[0:1], v[1:2], v[2:3]
    b2 = v[3:4]
    b3, g3, be3 = v[4:5], v[5:6], v[6:7]
    bfc = v[7:8]

    def layernorm(h, g, be):
        # Per-node LayerNorm over H features, done as block-diagonal matmuls so
        # the (TB, 256) lane layout never changes (no in-kernel reshape).
        mu = jnp.dot(h, mavg, preferred_element_type=jnp.float32)
        d = h - mu
        var = jnp.dot(d * d, mavg, preferred_element_type=jnp.float32)
        return d * jax.lax.rsqrt(var + LN_EPS) * g + be

    def leaky_relu(h):
        return jnp.where(h > 0, h, LEAKY_SLOPE * h)

    # Each GCN layer == one MXU matmul:  h_flat @ kron(A_hat^T, W) + bias.
    h1 = leaky_relu(layernorm(
        jnp.dot(x, k1, preferred_element_type=jnp.float32) + b1, g1, be1))
    h2 = leaky_relu(
        jnp.dot(h1, k2, preferred_element_type=jnp.float32) + b2) + h1
    h3 = leaky_relu(layernorm(
        jnp.dot(h2, k3, preferred_element_type=jnp.float32) + b3, g3, be3)) + h1

    out = jnp.dot(h3, kfc, preferred_element_type=jnp.float32) + bfc
    out_ref[...] = jnp.tanh(out).astype(out_ref.dtype)   # (TB, N*O) full-lane store


def build_normalized_adjacency(edge_index, num_nodes):
    """A_hat = D^{-1/2} (A + I) D^{-1/2}  (GCNConv default, add_self_loops=True).

    Degrees are row sums of (A + I); identical to PyG's gcn_norm for symmetric
    graphs (such as the undirected ring used in the test).
    """
    src, dst = edge_index[0], edge_index[1]
    adj = jnp.zeros((num_nodes, num_nodes), jnp.float32)
    adj = adj.at[dst, src].add(1.0)                    # message src -> dst
    adj = adj + jnp.eye(num_nodes, dtype=jnp.float32)  # self loops
    deg = jnp.sum(adj, axis=1)
    dinv = jnp.where(deg > 0, 1.0 / jnp.sqrt(deg), 0.0)
    return adj * dinv[:, None] * dinv[None, :]


def init_params(key, num_features=NUM_FEATURES, hidden_dim=HIDDEN_DIM,
                output_dim=OUTPUT_DIM):
    ks = jax.random.split(key, 4)
    scale = 0.1
    return {
        "w1": jax.random.normal(ks[0], (num_features, hidden_dim), jnp.float32) * scale,
        "b1": jnp.zeros((1, hidden_dim), jnp.float32),
        "ln1_g": jnp.ones((1, hidden_dim), jnp.float32),
        "ln1_b": jnp.zeros((1, hidden_dim), jnp.float32),
        "w2": jax.random.normal(ks[1], (hidden_dim, hidden_dim), jnp.float32) * scale,
        "b2": jnp.zeros((1, hidden_dim), jnp.float32),
        "w3": jax.random.normal(ks[2], (hidden_dim, hidden_dim), jnp.float32) * scale,
        "b3": jnp.zeros((1, hidden_dim), jnp.float32),
        "ln3_g": jnp.ones((1, hidden_dim), jnp.float32),
        "ln3_b": jnp.zeros((1, hidden_dim), jnp.float32),
        "wfc": jax.random.normal(ks[3], (hidden_dim, output_dim), jnp.float32) * scale,
        "bfc": jnp.zeros((1, output_dim), jnp.float32),
    }


def _build_flat_params(a_hat, params):
    """Precompute the kron-expanded operands used by the flat-layout kernel."""
    N, H = NUM_AREA, HIDDEN_DIM
    at = a_hat.T
    eye_n = jnp.eye(N, dtype=jnp.float32)

    k1 = jnp.kron(at, params["w1"])                                  # (N*F, N*H)
    k2 = jnp.kron(at, params["w2"])                                  # (N*H, N*H)
    k3 = jnp.kron(at, params["w3"])                                  # (N*H, N*H)
    kfc = jnp.kron(eye_n, params["wfc"])                             # (N*H, N*O)
    mavg = jnp.kron(eye_n, jnp.full((H, H), 1.0 / H, jnp.float32))   # (N*H, N*H)
    kstack = jnp.stack([k2, k3, kfc, mavg])                          # (4, N*H, N*H)

    def tile_vec(p):
        return jnp.tile(p.reshape(-1), N)                            # (N*H,)

    vecs = jnp.stack([
        tile_vec(params["b1"]), tile_vec(params["ln1_g"]), tile_vec(params["ln1_b"]),
        tile_vec(params["b2"]),
        tile_vec(params["b3"]), tile_vec(params["ln3_g"]), tile_vec(params["ln3_b"]),
        tile_vec(params["bfc"]),
    ])                                                               # (8, N*H)
    return k1, kstack, vecs


def gnn_encoder_forward(state, edge_index, batch_size, rej_rate, theta_value,
                        params, *, tb=128):
    """Pallas implementation of GNN_Encoder.forward.

    `rej_rate` / `theta_value` are accepted for signature parity (unused in the
    reference forward as well).
    """
    del rej_rate, theta_value
    N, F, H, O = NUM_AREA, NUM_FEATURES, HIDDEN_DIM, OUTPUT_DIM
    NF, NH, NO = N * F, N * H, N * O

    # state.view(B, N, F) flattened node-major == the original flat layout.
    x = state.reshape(batch_size, NF).astype(jnp.float32)
    a_hat = build_normalized_adjacency(edge_index, N)
    k1, kstack, vecs = _build_flat_params(a_hat, params)

    # Batch tile: multiple of 8 (sublane), capped by batch; pad batch to a
    # multiple of the tile so the grid divides evenly.  Padded rows are zeros
    # (harmless through the network) and are sliced off afterwards.
    tb = max(8, min(_round_up(tb, 8), _round_up(batch_size, 8)))
    b_pad = _round_up(batch_size, tb)
    if b_pad != batch_size:
        x = jnp.pad(x, ((0, b_pad - batch_size), (0, 0)))
    grid = (b_pad // tb,)

    out = pl.pallas_call(
        _gnn_encoder_kernel,
        out_shape=jax.ShapeDtypeStruct((b_pad, NO), jnp.float32),
        grid_spec=pltpu.PrefetchScalarGridSpec(
            num_scalar_prefetch=0,
            grid=grid,
            in_specs=[
                pl.BlockSpec((tb, NF), lambda b: (b, 0)),        # x tile
                pl.BlockSpec((NF, NH), lambda b: (0, 0)),        # kron(A^T, W1)
                pl.BlockSpec((4, NH, NH), lambda b: (0, 0, 0)),  # K2/K3/Kfc/Mavg
                pl.BlockSpec((8, NH), lambda b: (0, 0)),         # bias/gamma/beta slab
            ],
            out_specs=pl.BlockSpec((tb, NO), lambda b: (b, 0)),  # lane-dense (TB, 256)
        ),
        compiler_params=pltpu.CompilerParams(
            dimension_semantics=("parallel",)),
    )(x, k1, kstack, vecs)

    return out[:batch_size]   # already (B, N*O); no post-kernel reshape needed


def _reference_forward(state, edge_index, batch_size, params):
    """Pure-JAX reference for a correctness check."""
    N, F = NUM_AREA, NUM_FEATURES
    x = state.reshape(batch_size, N, F).astype(jnp.float32)
    a = build_normalized_adjacency(edge_index, N)

    def gcn(h, w, b):
        return jnp.einsum("ij,bjh->bih", a, h @ w) + b

    def ln(h, g, be):
        mu = jnp.mean(h, -1, keepdims=True)
        var = jnp.mean((h - mu) ** 2, -1, keepdims=True)
        return (h - mu) / jnp.sqrt(var + LN_EPS) * g + be

    lrelu = lambda h: jnp.where(h > 0, h, LEAKY_SLOPE * h)
    h1 = lrelu(ln(gcn(x, params["w1"], params["b1"]), params["ln1_g"], params["ln1_b"]))
    h2 = lrelu(gcn(h1, params["w2"], params["b2"])) + h1
    h3 = lrelu(ln(gcn(h2, params["w3"], params["b3"]), params["ln3_g"], params["ln3_b"])) + h1
    out = jnp.tanh(h3 @ params["wfc"] + params["bfc"])
    return out.reshape(batch_size, -1)


if __name__ == "__main__":
    key = jax.random.PRNGKey(0)
    k_param, k_state = jax.random.split(key)

    batch_size = 128
    params = init_params(k_param)

    # Deterministic inputs: flat state vector and a ring-graph edge_index.
    state = jax.random.normal(
        k_state, (batch_size, NUM_AREA * NUM_FEATURES), jnp.float32)
    src = jnp.arange(NUM_AREA, dtype=jnp.int32)
    dst = (src + 1) % NUM_AREA
    edge_index = jnp.stack(
        [jnp.concatenate([src, dst]), jnp.concatenate([dst, src])], axis=0)

    # tb=64 -> grid=(2,): both v7x TensorCores get a tile; no-op on v5e/v6e.
    out = gnn_encoder_forward(state, edge_index, batch_size,
                              rej_rate=0.0, theta_value=0.0, params=params, tb=64)
    out = jax.block_until_ready(out)

    ref = _reference_forward(state, edge_index, batch_size, params)
    assert out.shape == (batch_size, NUM_AREA * OUTPUT_DIM)
    assert jnp.allclose(out, ref, atol=1e-4, rtol=1e-4), float(
        jnp.max(jnp.abs(out - ref)))

    print("KERNEL_OK")
</pallas_src>

<mosaic_0001>
module attributes {stable_mosaic.version = 11 : i64} {
  func.func @_gnn_encoder_kernel(%arg0: i32, %arg1: memref<64x32xf32, #tpu.memory_space<vmem>>, %arg2: memref<32x256xf32, #tpu.memory_space<vmem>>, %arg3: memref<4x256x256xf32, #tpu.memory_space<vmem>>, %arg4: memref<8x256xf32, #tpu.memory_space<vmem>>, %arg5: memref<64x256xf32, #tpu.memory_space<vmem>>) attributes {dimension_semantics = [#tpu.dimension_semantics<parallel>], iteration_bounds = array<i64: 2>, scalar_prefetch = 0 : i64, scratch_operands = 0 : i64, tpu.core_type = #tpu.core_type<tc>, window_params = [{transform_indices = @transform_0, window_bounds = array<i64: 64, 32>}, {pipeline_mode = #tpu.pipeline_mode<synchronous>, transform_indices = @transform_1, window_bounds = array<i64: 32, 256>}, {pipeline_mode = #tpu.pipeline_mode<synchronous>, transform_indices = @transform_2, window_bounds = array<i64: 4, 256, 256>}, {pipeline_mode = #tpu.pipeline_mode<synchronous>, transform_indices = @transform_3, window_bounds = array<i64: 8, 256>}, {transform_indices = @transform_4, window_bounds = array<i64: 64, 256>}]} {
    %c0 = arith.constant 0 : index
    %c0_0 = arith.constant 0 : index
    %0 = vector.load %arg1[%c0, %c0_0] : memref<64x32xf32, #tpu.memory_space<vmem>>, vector<64x32xf32>
    %c0_1 = arith.constant 0 : index
    %c0_2 = arith.constant 0 : index
    %1 = vector.load %arg2[%c0_1, %c0_2] : memref<32x256xf32, #tpu.memory_space<vmem>>, vector<32x256xf32>
    %c0_3 = arith.constant 0 : index
    %c0_4 = arith.constant 0 : index
    %c0_5 = arith.constant 0 : index
    %2 = vector.load %arg3[%c0_3, %c0_4, %c0_5] : memref<4x256x256xf32, #tpu.memory_space<vmem>>, vector<1x256x256xf32>
    %3 = vector.shape_cast %2 : vector<1x256x256xf32> to vector<256x256xf32>
    %c1 = arith.constant 1 : index
    %c0_6 = arith.constant 0 : index
    %c0_7 = arith.constant 0 : index
    %4 = vector.load %arg3[%c1, %c0_6, %c0_7] : memref<4x256x256xf32, #tpu.memory_space<vmem>>, vector<1x256x256xf32>
    %5 = vector.shape_cast %4 : vector<1x256x256xf32> to vector<256x256xf32>
    %c2 = arith.constant 2 : index
    %c0_8 = arith.constant 0 : index
    %c0_9 = arith.constant 0 : index
    %6 = vector.load %arg3[%c2, %c0_8, %c0_9] : memref<4x256x256xf32, #tpu.memory_space<vmem>>, vector<1x256x256xf32>
    %7 = vector.shape_cast %6 : vector<1x256x256xf32> to vector<256x256xf32>
    %c3 = arith.constant 3 : index
    %c0_10 = arith.constant 0 : index
    %c0_11 = arith.constant 0 : index
    %8 = vector.load %arg3[%c3, %c0_10, %c0_11] : memref<4x256x256xf32, #tpu.memory_space<vmem>>, vector<1x256x256xf32>
    %9 = vector.shape_cast %8 : vector<1x256x256xf32> to vector<256x256xf32>
    %c0_12 = arith.constant 0 : index
    %c0_13 = arith.constant 0 : index
    %10 = vector.load %arg4[%c0_12, %c0_13] : memref<8x256xf32, #tpu.memory_space<vmem>>, vector<8x256xf32>
    %11 = vector.extract_strided_slice %10 {offsets = [0, 0], sizes = [1, 256], strides = [1, 1]} : vector<8x256xf32> to vector<1x256xf32>
    %12 = vector.extract_strided_slice %10 {offsets = [1, 0], sizes = [1, 256], strides = [1, 1]} : vector<8x256xf32> to vector<1x256xf32>
    %13 = vector.extract_strided_slice %10 {offsets = [2, 0], sizes = [1, 256], strides = [1, 1]} : vector<8x256xf32> to vector<1x256xf32>
    %14 = vector.extract_strided_slice %10 {offsets = [3, 0], sizes = [1, 256], strides = [1, 1]} : vector<8x256xf32> to vector<1x256xf32>
    %15 = vector.extract_strided_slice %10 {offsets = [4, 0], sizes = [1, 256], strides = [1, 1]} : vector<8x256xf32> to vector<1x256xf32>
    %16 = vector.extract_strided_slice %10 {offsets = [5, 0], sizes = [1, 256], strides = [1, 1]} : vector<8x256xf32> to vector<1x256xf32>
    %17 = vector.extract_strided_slice %10 {offsets = [6, 0], sizes = [1, 256], strides = [1, 1]} : vector<8x256xf32> to vector<1x256xf32>
    %18 = vector.extract_strided_slice %10 {offsets = [7, 0], sizes = [1, 256], strides = [1, 1]} : vector<8x256xf32> to vector<1x256xf32>
    %cst = arith.constant dense<0.000000e+00> : vector<64x256xf32>
    %19 = tpu.matmul %0, %1, %cst {dimension_numbers = #tpu.dot_dimension_numbers<[1], [0], [0], [1], [0, 0, 1, 1], [], []>} : vector<64x32xf32>, vector<32x256xf32>, vector<64x256xf32> -> vector<64x256xf32>
    %20 = vector.broadcast %11 : vector<1x256xf32> to vector<64x256xf32>
    %21 = arith.addf %19, %20 : vector<64x256xf32>
    %cst_14 = arith.constant dense<0.000000e+00> : vector<64x256xf32>
    %22 = tpu.matmul %21, %9, %cst_14 {dimension_numbers = #tpu.dot_dimension_numbers<[1], [0], [0], [1], [0, 0, 1, 1], [], []>} : vector<64x256xf32>, vector<256x256xf32>, vector<64x256xf32> -> vector<64x256xf32>
    %23 = arith.subf %21, %22 : vector<64x256xf32>
    %24 = arith.mulf %23, %23 : vector<64x256xf32>
    %cst_15 = arith.constant dense<0.000000e+00> : vector<64x256xf32>
    %25 = tpu.matmul %24, %9, %cst_15 {dimension_numbers = #tpu.dot_dimension_numbers<[1], [0], [0], [1], [0, 0, 1, 1], [], []>} : vector<64x256xf32>, vector<256x256xf32>, vector<64x256xf32> -> vector<64x256xf32>
    %cst_16 = arith.constant 9.99999974E-6 : f32
    %26 = vector.broadcast %cst_16 : f32 to vector<64x256xf32>
    %27 = arith.addf %25, %26 : vector<64x256xf32>
    %28 = math.rsqrt %27 : vector<64x256xf32>
    %29 = arith.mulf %23, %28 : vector<64x256xf32>
    %30 = vector.broadcast %12 : vector<1x256xf32> to vector<64x256xf32>
    %31 = arith.mulf %29, %30 : vector<64x256xf32>
    %32 = vector.broadcast %13 : vector<1x256xf32> to vector<64x256xf32>
    %33 = arith.addf %31, %32 : vector<64x256xf32>
    %cst_17 = arith.constant 0.000000e+00 : f32
    %34 = vector.broadcast %cst_17 : f32 to vector<64x256xf32>
    %35 = arith.cmpf ogt, %33, %34 : vector<64x256xf32>
    %cst_18 = arith.constant 0.00999999977 : f32
    %36 = vector.broadcast %cst_18 : f32 to vector<64x256xf32>
    %37 = arith.mulf %36, %33 : vector<64x256xf32>
    %38 = arith.select %35, %33, %37 : vector<64x256xi1>, vector<64x256xf32>
    %cst_19 = arith.constant dense<0.000000e+00> : vector<64x256xf32>
    %39 = tpu.matmul %38, %3, %cst_19 {dimension_numbers = #tpu.dot_dimension_numbers<[1], [0], [0], [1], [0, 0, 1, 1], [], []>} : vector<64x256xf32>, vector<256x256xf32>, vector<64x256xf32> -> vector<64x256xf32>
    %40 = vector.broadcast %14 : vector<1x256xf32> to vector<64x256xf32>
    %41 = arith.addf %39, %40 : vector<64x256xf32>
    %cst_20 = arith.constant 0.000000e+00 : f32
    %42 = vector.broadcast %cst_20 : f32 to vector<64x256xf32>
    %43 = arith.cmpf ogt, %41, %42 : vector<64x256xf32>
    %cst_21 = arith.constant 0.00999999977 : f32
    %44 = vector.broadcast %cst_21 : f32 to vector<64x256xf32>
    %45 = arith.mulf %44, %41 : vector<64x256xf32>
    %46 = arith.select %43, %41, %45 : vector<64x256xi1>, vector<64x256xf32>
    %47 = arith.addf %46, %38 : vector<64x256xf32>
    %cst_22 = arith.constant dense<0.000000e+00> : vector<64x256xf32>
    %48 = tpu.matmul %47, %5, %cst_22 {dimension_numbers = #tpu.dot_dimension_numbers<[1], [0], [0], [1], [0, 0, 1, 1], [], []>} : vector<64x256xf32>, vector<256x256xf32>, vector<64x256xf32> -> vector<64x256xf32>
    %49 = vector.broadcast %15 : vector<1x256xf32> to vector<64x256xf32>
    %50 = arith.addf %48, %49 : vector<64x256xf32>
    %cst_23 = arith.constant dense<0.000000e+00> : vector<64x256xf32>
    %51 = tpu.matmul %50, %9, %cst_23 {dimension_numbers = #tpu.dot_dimension_numbers<[1], [0], [0], [1], [0, 0, 1, 1], [], []>} : vector<64x256xf32>, vector<256x256xf32>, vector<64x256xf32> -> vector<64x256xf32>
    %52 = arith.subf %50, %51 : vector<64x256xf32>
    %53 = arith.mulf %52, %52 : vector<64x256xf32>
    %cst_24 = arith.constant dense<0.000000e+00> : vector<64x256xf32>
    %54 = tpu.matmul %53, %9, %cst_24 {dimension_numbers = #tpu.dot_dimension_numbers<[1], [0], [0], [1], [0, 0, 1, 1], [], []>} : vector<64x256xf32>, vector<256x256xf32>, vector<64x256xf32> -> vector<64x256xf32>
    %cst_25 = arith.constant 9.99999974E-6 : f32
    %55 = vector.broadcast %cst_25 : f32 to vector<64x256xf32>
    %56 = arith.addf %54, %55 : vector<64x256xf32>
    %57 = math.rsqrt %56 : vector<64x256xf32>
    %58 = arith.mulf %52, %57 : vector<64x256xf32>
    %59 = vector.broadcast %16 : vector<1x256xf32> to vector<64x256xf32>
    %60 = arith.mulf %58, %59 : vector<64x256xf32>
    %61 = vector.broadcast %17 : vector<1x256xf32> to vector<64x256xf32>
    %62 = arith.addf %60, %61 : vector<64x256xf32>
    %cst_26 = arith.constant 0.000000e+00 : f32
    %63 = vector.broadcast %cst_26 : f32 to vector<64x256xf32>
    %64 = arith.cmpf ogt, %62, %63 : vector<64x256xf32>
    %cst_27 = arith.constant 0.00999999977 : f32
    %65 = vector.broadcast %cst_27 : f32 to vector<64x256xf32>
    %66 = arith.mulf %65, %62 : vector<64x256xf32>
    %67 = arith.select %64, %62, %66 : vector<64x256xi1>, vector<64x256xf32>
    %68 = arith.addf %67, %38 : vector<64x256xf32>
    %cst_28 = arith.constant dense<0.000000e+00> : vector<64x256xf32>
    %69 = tpu.matmul %68, %7, %cst_28 {dimension_numbers = #tpu.dot_dimension_numbers<[1], [0], [0], [1], [0, 0, 1, 1], [], []>} : vector<64x256xf32>, vector<256x256xf32>, vector<64x256xf32> -> vector<64x256xf32>
    %70 = vector.broadcast %18 : vector<1x256xf32> to vector<64x256xf32>
    %71 = arith.addf %69, %70 : vector<64x256xf32>
    %72 = math.tanh %71 : vector<64x256xf32>
    %c0_29 = arith.constant 0 : index
    %c0_30 = arith.constant 0 : index
    %73 = vector.load %arg5[%c0_29, %c0_30] : memref<64x256xf32, #tpu.memory_space<vmem>>, vector<64x256xf32>
    tpu.vector_store %arg5[%c0_29, %c0_30], %72 {strides = array<i32>} : memref<64x256xf32, #tpu.memory_space<vmem>>, vector<64x256xf32>,
    return
  }
  func.func @transform_0(%arg0: i32) -> (i32, i32) {
    %c0_i32 = arith.constant 0 : i32
    %c0_i32_0 = arith.constant 0 : i32
    return %arg0, %c0_i32 : i32, i32
  }
  func.func @transform_1(%arg0: i32) -> (i32, i32) {
    %c0_i32 = arith.constant 0 : i32
    %c0_i32_0 = arith.constant 0 : i32
    %c0_i32_1 = arith.constant 0 : i32
    return %c0_i32, %c0_i32_0 : i32, i32
  }
  func.func @transform_2(%arg0: i32) -> (i32, i32, i32) {
    %c0_i32 = arith.constant 0 : i32
    %c0_i32_0 = arith.constant 0 : i32
    %c0_i32_1 = arith.constant 0 : i32
    %c0_i32_2 = arith.constant 0 : i32
    return %c0_i32, %c0_i32_0, %c0_i32_1 : i32, i32, i32
  }
  func.func @transform_3(%arg0: i32) -> (i32, i32) {
    %c0_i32 = arith.constant 0 : i32
    %c0_i32_0 = arith.constant 0 : i32
    %c0_i32_1 = arith.constant 0 : i32
    return %c0_i32, %c0_i32_0 : i32, i32
  }
  func.func @transform_4(%arg0: i32) -> (i32, i32) {
    %c0_i32 = arith.constant 0 : i32
    %c0_i32_0 = arith.constant 0 : i32
    return %arg0, %c0_i32 : i32, i32
  }
}

</mosaic_0001>

<bundles_post_ra>
// kernel: tpu_custom_call.1
= control target key start
LH: loop header
LB: loop body
LE: loop exit
PB: predicated region body
PF: predicated region fallthrough
CT: control target
= control target key end

     0   :  { %9 = vsyncpa [#allocation3], 0  ;;  %s4702_s0 = inlined_call_operand.vmem [shape: f32[128,32], index: 0, kind: input, shape index: {}]   ;;  %s4703_s1 = inlined_call_operand.vmem [shape: f32[32,256], index: 1, kind: input, shape index: {}]   ;;  %s4704_s2 = inlined_call_operand.hbm [shape: f32[4,256,256], index: 2, kind: input, shape index: {}]   ;;  %s4705_s3 = inlined_call_operand.vmem [shape: f32[8,256], index: 3, kind: input, shape index: {}]   ;;  %s4706_s4 = inlined_call_operand.hbm [shape: f32[128,256], index: 4, kind: output, shape index: {}]  }
   0x1   :  { %10 = vsyncpa [#allocation4], 0 }
   0x2   :  { %12 = vsyncpa [#allocation4 + $0x1], 0  ;;  %s2930_s15 = smov 0   ;;  %s2932_s16 = smov 0  }
   0x3   :  { %s2934_s17 = smov 0   ;;  %s2936_s18 = smov 0  }
   0x4 LB: > { %s2951_s19 = sadd.s32 4294967295, %s2898_s18   ;;  %s2543_s20 = sadd.s32 4294967294, %s2898_s18   ;;  %s2898_s18 = sphi %s2936_s18, %s4837_s18   ;;  %s2894_s17 = sphi %s2934_s17, %s4836_s17   ;;  %s2890_s16 = sphi %s2932_s16, %s4835_s16   ;;  %s2886_s15 = sphi %s2930_s15, %s4834_s15  }
   0x5   : > { %s2955_s21 = sadd.s32 1, %s2898_s18   ;;  %s114_s22 = sadd.s32 1, %s2894_s17 }
   0x6   : > { %s111_s23 = ssub.s32 %s2898_s18, %s2955_s21  ;;  %p124_p0 = scmp.ne.s32.totalorder %s2894_s17, %s2890_s16 }
   0x7   : > { %p112_p1 = scmp.eq.s32.totalorder %s111_s23, 0  ;;  %p125_p2 = scmp.eq.s32.totalorder %s2951_s19, 1 }
   0x8   : > { %p130_p3 = scmp.ne.s32.totalorder %s2890_s16, %s2886_s15  ;;  %p131_p4 = scmp.eq.s32.totalorder %s2543_s20, 1 }
   0x9   : > { %s2966_s24 = scalar_select %p112_p1, %s2894_s17, %s114_s22  }
   0xa   : > { %p2968_p5 = por %p125_p2, %p124_p0  ;;  %p2972_p6 = por %p131_p4, %p130_p3 }
   0xb   : > { %p2544_p7 = scmp.ge.s32.totalorder %s2898_s18, 1  ;;  %p138_p8 = scmp.lt.s32.totalorder %s2898_s18, 3 }
   0xc   : > { %p2598_p9 = scmp.eq.s32.totalorder %s2951_s19, 0  ;;  %s152_s29 = sshll.u32 %s4704_s2, 4  ;;  %s153_s29 = int_to_ptr.hbm [resolvable:$true] %s152_s29 }
   0xd   : > { %p139_p10 = pnand %p2544_p7, %p138_p8  ;;  %s2900_s30 = smov [#allocation2]  }
   0xe   : > { %s154_s5 = sshll.u32 %s2900_s30, 4  ;;  %s2901_s6 = smov 256   ;;  %s155_s5 = int_to_ptr.vmem [resolvable:$true] %s154_s5 }
   0xf   : > { %p2590_p11 = pneg %p139_p10  ;;  %s2902_s7 = smov 16  }
  0x10   : > { %182 = sbr.rel (%p139_p10) target bundleno = 1256 (0x4e8), region = 36 }
  0x11   : > { %p2591_p12 = pnand %p2598_p9, %p2590_p11 }
  0x13   : > { %2593 = dma.hbm_to_vmem [thread:$0]  (!%p2591_p12), %s153_s29, 32768, %s155_s5, [#allocation3], %s2901_s6, %s2901_s6, %s2902_s7  }
  0x15   : > { %2877 = dma.done.wait (%p2598_p9), [#allocation3], 32768  }
  0x16   : > { %2879 = vsyncadd (%p2598_p9), [#allocation3], 4294934528  ;;  %s2550_s8 = sshll.u32 %s2951_s19, 3  ;;  %v230_v0 = vld [vmem:[%s4703_s1 + $0x30] sm:$0xff]  ;;  %v231_v1 = vld [vmem:[%s4703_s1 + $0x38] sm:$0xff]  ;;  %vm495_vm0 = vcmask 261120  }
  0x17   : > { %p210_p13 = scmp.lt.s32.totalorder %s2550_s8, 15  ;;  %v228_v2 = vld [vmem:[%s4703_s1 + $0x20] sm:$0xff]  ;;  %532 = vmatpush.msra.mxu0 %v230_v0  ;;  %573 = vmatpush.msra.mxu1 %v231_v1  ;;  %v229_v3 = vld [vmem:[%s4703_s1 + $0x28] sm:$0xff]  ;;  %v226_v4 = vld [vmem:[%s4703_s1 + $0x10] sm:$0xff]  ;;  %s2575_s11 = sshll.u32 %s2951_s19, 7 }
  0x18   : > { %v227_v5 = vld [vmem:[%s4703_s1 + $0x18] sm:$0xff]  ;;  %2576 = vmatpush.msra.mxu2 %v230_v0  ;;  %2580 = vmatpush.msra.mxu3 %v231_v1  ;;  %v224_v6 = vld [vmem:[%s4703_s1] sm:$0xff]  ;;  %v225_v7 = vld [vmem:[%s4703_s1 + $0x8] sm:$0xff]  ;;  %s2465_s13 = scalar_lea.hbm %s4706_s4, %s2575_s11  ;;  %s2852_s29 = scalar_lea.hbm %s4706_s4, 256 }
  0x19   : > { %s4839_s8 = smov (!%p210_p13, %s2550_s8), 15  ;;  %533 = vmatpush.msra.mxu0 %v228_v2  ;;  %574 = vmatpush.msra.mxu1 %v229_v3  ;;  %v3022_v10 = vld [vmem:[#allocation2 + $0x6f0] sm:$0xff]  ;;  %v3026_v12 = vld [vmem:[#allocation2 + $0x6f8] sm:$0xff]  ;;  %v3032_v14 = vld [vmem:[#allocation2 + $0x6e0] sm:$0xff]  ;;  %s2468_s20 = sshll.u32 %s2465_s13, 4  ;;  %s2469_s20 = int_to_ptr.hbm [resolvable:$true] %s2468_s20 }
  0x1a   : > { %s2551_s9 = sshll.u32 %s4839_s8, 3  ;;  %2577 = vmatpush.msra.mxu2 %v228_v2  ;;  %2581 = vmatpush.msra.mxu3 %v229_v3  ;;  %v3024_v11 = vld [vmem:[#allocation2 + $0x7f0] sm:$0xff]  ;;  %v3028_v13 = vld [vmem:[#allocation2 + $0x7f8] sm:$0xff]  ;;  %v3034_v15 = vld [vmem:[#allocation2 + $0x7e0] sm:$0xff]  ;;  %s2846_s22 = sshra.s32 %s2469_s20, 4  ;;  %s2847_s22 = int_to_ptr.hbm [resolvable:$true] %s2846_s22 }
  0x1b   : > { %s3010_s7 = scalar_lea.vmem %s4702_s0, %s2551_s9  ;;  %534 = vmatpush.msra.mxu0 %v226_v4  ;;  %575 = vmatpush.msra.mxu1 %v227_v5  ;;  %v3038_v16 = vld [vmem:[#allocation2 + $0x6e8] sm:$0xff]  ;;  %v3044_v18 = vld [vmem:[#allocation2 + $0x6d0] sm:$0xff]  ;;  %v3053_v21 = vld [vmem:[#allocation2 + $0x6d8] sm:$0xff]  ;;  %s2848_s23 = scalar_lea.hbm %s2847_s22, 128 }
  0x1c   : > { %v216_v8 = vld [vmem:[%s3010_s7] sm:$0xff]  ;;  %2578 = vmatpush.msra.mxu2 %v226_v4  ;;  %2582 = vmatpush.msra.mxu3 %v227_v5  ;;  %v3040_v17 = vld [vmem:[#allocation2 + $0x7e8] sm:$0xff]  ;;  %v3046_v19 = vld [vmem:[#allocation2 + $0x7d0] sm:$0xff]  ;;  %p2849_p0 = scmp.ne.s32.totalorder %s2847_s22, %s2848_s23  ;;  %p2853_p3 = scmp.lt.s32.totalorder %s2847_s22, %s4706_s4 }
  0x1d   : > { %535 = vmatpush.msra.mxu0 %v224_v6  ;;  %576 = vmatpush.msra.mxu1 %v225_v7  ;;  %v220_v9 = vld [vmem:[%s3010_s7 + $0x20] sm:$0xff]  ;;  %v217_v20 = vld [vmem:[%s3010_s7 + $0x8] sm:$0xff]  ;;  %v3055_v22 = vld [vmem:[#allocation2 + $0x7d8] sm:$0xff]  ;;  %p2854_p4 = scmp.lt.s32.totalorder %s2852_s29, %s2848_s23 }
  0x1e   : > { %2552 = vmatmul.msk.f32.vlgmr.msra.gmra.mxu0 %vm495_vm0, %v216_v8  ;;  %2560 = vmatmul.msk.f32.vlgmr.msra.gmra.mxu1 %vm495_vm0, %v216_v8  ;;  %v221_v23 = vld [vmem:[%s3010_s7 + $0x28] sm:$0xff]  ;;  %v3062_v24 = vld [vmem:[#allocation2 + $0x6c0] sm:$0xff]  ;;  %v3074_v28 = vld [vmem:[#allocation2 + $0x6b0] sm:$0xff]  ;;  %p2850_p1 = pnand %p2849_p0, %p2968_p5 }
  0x1f   : > { %2579 = vmatpush.msra.mxu2 %v224_v6  ;;  %2583 = vmatpush.msra.mxu3 %v225_v7  ;;  %v3064_v25 = vld [vmem:[#allocation2 + $0x7c0] sm:$0xff]  ;;  %v3068_v26 = vld [vmem:[#allocation2 + $0x6c8] sm:$0xff]  ;;  %v3076_v29 = vld [vmem:[#allocation2 + $0x7b0] sm:$0xff]  ;;  %p2855_p7 = por %p2854_p4, %p2853_p3 }
  0x20   : > { %2556 = vmatmul.msk.f32.vlgmr.msra.gmra.mxu2 %vm495_vm0, %v220_v9  ;;  %2564 = vmatmul.msk.f32.vlgmr.msra.gmra.mxu3 %vm495_vm0, %v220_v9  ;;  %v3070_v27 = vld [vmem:[#allocation2 + $0x7c8] sm:$0xff]  ;;  %v3080_v30 = vld [vmem:[#allocation2 + $0x6b8] sm:$0xff]  ;;  %v3086_v32 = vld [vmem:[#allocation2 + $0x6a0] sm:$0xff]  ;;  %p2851_p2 = pneg %p2850_p1 }
  0x21   : > { %602 = vmatpush.msrb.mxu2 %v3022_v10  ;;  %643 = vmatpush.msrb.mxu3 %v3024_v11  ;;  %v3082_v31 = vld [vmem:[#allocation2 + $0x7b8] sm:$0xff]  ;;  %v3088_v33 = vld [vmem:[#allocation2 + $0x7a0] sm:$0xff]  ;;  %v218_v34 = vld [vmem:[%s3010_s7 + $0x10] sm:$0xff] }
  0x22   : > { %684 = vmatpush.msrb.mxu0 %v3026_v12  ;;  %725 = vmatpush.msrb.mxu1 %v3028_v13  ;;  %v3095_v35 = vld [vmem:[#allocation2 + $0x6a8] sm:$0xff]  ;;  %v222_v37 = vld [vmem:[%s3010_s7 + $0x30] sm:$0xff]  ;;  %v3110_v40 = vld [vmem:[#allocation2 + $0x698] sm:$0xff]  ;;  %p2856_p8 = pnand %p2855_p7, %p2851_p2 }
  0x23   : > { %603 = vmatpush.msrb.mxu2 %v3032_v14  ;;  %644 = vmatpush.msrb.mxu3 %v3034_v15  ;;  %v3097_v36 = vld [vmem:[#allocation2 + $0x7a8] sm:$0xff]  ;;  %v3104_v38 = vld [vmem:[#allocation2 + $0x690] sm:$0xff]  ;;  %v3112_v41 = vld [vmem:[#allocation2 + $0x798] sm:$0xff] }
  0x24   : > { %685 = vmatpush.msrb.mxu0 %v3038_v16  ;;  %726 = vmatpush.msrb.mxu1 %v3040_v17  ;;  %v3106_v39 = vld [vmem:[#allocation2 + $0x790] sm:$0xff]  ;;  %v3116_v42 = vld [vmem:[#allocation2 + $0x680] sm:$0xff]  ;;  %v3122_v44 = vld [vmem:[#allocation2 + $0x688] sm:$0xff] }
  0x25   : > { %604 = vmatpush.msrb.mxu2 %v3044_v18  ;;  %645 = vmatpush.msrb.mxu3 %v3046_v19  ;;  %v3118_v43 = vld [vmem:[#allocation2 + $0x780] sm:$0xff]  ;;  %v3124_v45 = vld [vmem:[#allocation2 + $0x788] sm:$0xff]  ;;  %v3128_v46 = vld [vmem:[#allocation2 + $0x670] sm:$0xff] }
  0x26   : > { %2553 = vmatmul.msk.f32.gmra.mxu0 %vm495_vm0, %v217_v20  ;;  %2561 = vmatmul.msk.f32.gmra.mxu1 %vm495_vm0, %v217_v20  ;;  %v3130_v47 = vld [vmem:[#allocation2 + $0x770] sm:$0xff]  ;;  %v219_v48 = vld [vmem:[%s3010_s7 + $0x18] sm:$0xff]  ;;  %v3146_v52 = vld [vmem:[#allocation2 + $0x660] sm:$0xff] }
  0x27   : > { %686 = vmatpush.msrb.mxu0 %v3053_v21  ;;  %727 = vmatpush.msrb.mxu1 %v3055_v22  ;;  %v3137_v49 = vld [vmem:[#allocation2 + $0x678] sm:$0xff]  ;;  %v3148_v53 = vld [vmem:[#allocation2 + $0x760] sm:$0xff]  ;;  %v3152_v54 = vld [vmem:[#allocation2 + $0x668] sm:$0xff] }
  0x28   : > { %2557 = vmatmul.msk.f32.gmra.mxu2 %vm495_vm0, %v221_v23  ;;  %2565 = vmatmul.msk.f32.gmra.mxu3 %vm495_vm0, %v221_v23  ;;  %v3139_v50 = vld [vmem:[#allocation2 + $0x778] sm:$0xff]  ;;  %v3154_v55 = vld [vmem:[#allocation2 + $0x768] sm:$0xff]  ;;  %v3158_v56 = vld [vmem:[#allocation2 + $0x650] sm:$0xff] }
  0x29   : > { %605 = vmatpush.msrb.mxu2 %v3062_v24  ;;  %646 = vmatpush.msrb.mxu3 %v3064_v25  ;;  %v223_v51 = vld [vmem:[%s3010_s7 + $0x38] sm:$0xff]  ;;  %v3160_v57 = vld [vmem:[#allocation2 + $0x750] sm:$0xff]  ;;  %v3170_v60 = vld [vmem:[#allocation2 + $0x640] sm:$0xff]  ;;  %s206_s7 = sand.u32 1, %s2890_s16  }
  0x2a   : > { %687 = vmatpush.msrb.mxu0 %v3068_v26  ;;  %728 = vmatpush.msrb.mxu1 %v3070_v27  ;;  %v3164_v58 = vld [vmem:[#allocation2 + $0x658] sm:$0xff]  ;;  %v3172_v61 = vld [vmem:[#allocation2 + $0x740] sm:$0xff]  ;;  %v3176_v62 = vld [vmem:[#allocation2 + $0x648] sm:$0xff]  ;;  %s2549_s8 = sshll.u32 %s206_s7, 7  ;;  %s2453_s19 = scalar_lea.sflag [#allocation4], %s206_s7 }
  0x2b   : > { %606 = vmatpush.msrb.mxu2 %v3074_v28  ;;  %647 = vmatpush.msrb.mxu3 %v3076_v29  ;;  %v3166_v59 = vld [vmem:[#allocation2 + $0x758] sm:$0xff]  ;;  %v3178_v63 = vld [vmem:[#allocation2 + $0x748] sm:$0xff]  ;;  %v3182_v0 = vld [vmem:[#allocation2 + $0x630] sm:$0xff]  ;;  %s4636_s10 = scalar_lea.vmem [#allocation5], %s2549_s8 }
  0x2c   : > { %688 = vmatpush.msrb.mxu0 %v3080_v30  ;;  %729 = vmatpush.msrb.mxu1 %v3082_v31  ;;  %v3184_v1 = vld [vmem:[#allocation2 + $0x730] sm:$0xff]  ;;  %v3188_v2 = vld [vmem:[#allocation2 + $0x638] sm:$0xff]  ;;  %v3194_v4 = vld [vmem:[#allocation2 + $0x620] sm:$0xff]  ;;  %s2466_s14 = sshll.u32 %s4636_s10, 4  ;;  %s2467_s14 = int_to_ptr.vmem [resolvable:$true] %s2466_s14 }
  0x2d   : > { %607 = vmatpush.msrb.mxu2 %v3086_v32  ;;  %648 = vmatpush.msrb.mxu3 %v3088_v33  ;;  %v3190_v3 = vld [vmem:[#allocation2 + $0x738] sm:$0xff]  ;;  %v3196_v5 = vld [vmem:[#allocation2 + $0x720] sm:$0xff]  ;;  %v3200_v6 = vld [vmem:[#allocation2 + $0x628] sm:$0xff] }
  0x2e   : > { %2554 = vmatmul.msk.f32.gmra.mxu0 %vm495_vm0, %v218_v34  ;;  %2562 = vmatmul.msk.f32.gmra.mxu1 %vm495_vm0, %v218_v34  ;;  %v3202_v7 = vld [vmem:[#allocation2 + $0x728] sm:$0xff]  ;;  %v3206_v8 = vld [vmem:[#allocation2 + $0x610] sm:$0xff]  ;;  %v3216_v20 = vld [vmem:[#allocation2 + $0x618] sm:$0xff] }
  0x2f   : > { %689 = vmatpush.msrb.mxu0 %v3095_v35  ;;  %730 = vmatpush.msrb.mxu1 %v3097_v36  ;;  %v3208_v9 = vld [vmem:[#allocation2 + $0x710] sm:$0xff]  ;;  %v3218_v23 = vld [vmem:[#allocation2 + $0x718] sm:$0xff]  ;;  %v3222_v34 = vld [vmem:[#allocation2 + $0x600] sm:$0xff] }
  0x30   : > { %2558 = vmatmul.msk.f32.gmra.mxu2 %vm495_vm0, %v222_v37  ;;  %2566 = vmatmul.msk.f32.gmra.mxu3 %vm495_vm0, %v222_v37  ;;  %v3224_v37 = vld [vmem:[#allocation2 + $0x700] sm:$0xff] }
  0x31   : > { %608 = vmatpush.msrb.mxu2 %v3104_v38  ;;  %649 = vmatpush.msrb.mxu3 %v3106_v39 }
  0x32   : > { %690 = vmatpush.msrb.mxu0 %v3110_v40  ;;  %731 = vmatpush.msrb.mxu1 %v3112_v41 }
  0x33   : > { %609 = vmatpush.msrb.mxu2 %v3116_v42  ;;  %650 = vmatpush.msrb.mxu3 %v3118_v43 }
  0x34   : > { %691 = vmatpush.msrb.mxu0 %v3122_v44  ;;  %732 = vmatpush.msrb.mxu1 %v3124_v45 }
  0x35   : > { %610 = vmatpush.msrb.mxu2 %v3128_v46  ;;  %651 = vmatpush.msrb.mxu3 %v3130_v47 }
  0x36   : > { %2555 = vmatmul.msk.f32.gmra.mxu0 %vm495_vm0, %v219_v48  ;;  %2563 = vmatmul.msk.f32.gmra.mxu1 %vm495_vm0, %v219_v48  ;;  %v3226_v48 = vld [vmem:[#allocation2 + $0x608] sm:$0xff] }
  0x37   : > { %692 = vmatpush.msrb.mxu0 %v3137_v49  ;;  %733 = vmatpush.msrb.mxu1 %v3139_v50 }
  0x38   : > { %2559 = vmatmul.msk.f32.gmra.mxu2 %vm495_vm0, %v223_v51  ;;  %2567 = vmatmul.msk.f32.gmra.mxu3 %vm495_vm0, %v223_v51  ;;  %v3230_v51 = vld [vmem:[#allocation2 + $0x708] sm:$0xff] }
  0x39   : > { %611 = vmatpush.msrb.mxu2 %v3146_v52  ;;  %652 = vmatpush.msrb.mxu3 %v3148_v53 }
  0x3a   : > { %693 = vmatpush.msrb.mxu0 %v3152_v54  ;;  %734 = vmatpush.msrb.mxu1 %v3154_v55 }
  0x3b   : > { %612 = vmatpush.msrb.mxu2 %v3158_v56  ;;  %653 = vmatpush.msrb.mxu3 %v3160_v57 }
  0x3c   : > { %694 = vmatpush.msrb.mxu0 %v3164_v58  ;;  %735 = vmatpush.msrb.mxu1 %v3166_v59 }
  0x3d   : > { %613 = vmatpush.msrb.mxu2 %v3170_v60  ;;  %654 = vmatpush.msrb.mxu3 %v3172_v61 }
  0x3e   : > { %695 = vmatpush.msrb.mxu0 %v3176_v62  ;;  %736 = vmatpush.msrb.mxu1 %v3178_v63 }
  0x3f   : > { %614 = vmatpush.msrb.mxu2 %v3182_v0  ;;  %655 = vmatpush.msrb.mxu3 %v3184_v1 }
  0x40   : > { %696 = vmatpush.msrb.mxu0 %v3188_v2  ;;  %737 = vmatpush.msrb.mxu1 %v3190_v3 }
  0x41   : > { %615 = vmatpush.msrb.mxu2 %v3194_v4  ;;  %656 = vmatpush.msrb.mxu3 %v3196_v5 }
  0x42   : > { %697 = vmatpush.msrb.mxu0 %v3200_v6  ;;  %738 = vmatpush.msrb.mxu1 %v3202_v7 }
  0x43   : > { %616 = vmatpush.msrb.mxu2 %v3206_v8  ;;  %657 = vmatpush.msrb.mxu3 %v3208_v9 }
  0x44   : > { %698 = vmatpush.msrb.mxu0 %v3216_v20  ;;  %739 = vmatpush.msrb.mxu1 %v3218_v23 }
  0x45   : > { %617 = vmatpush.msrb.mxu2 %v3222_v34  ;;  %658 = vmatpush.msrb.mxu3 %v3224_v37 }
  0x46   : > { %699 = vmatpush.msrb.mxu0 %v3226_v48  ;;  %740 = vmatpush.msrb.mxu1 %v3230_v51 }
  0x47   : > { %798 = vmatpush.msra.mxu2 %v3022_v10  ;;  %839 = vmatpush.msra.mxu3 %v3024_v11  ;;  %v3281_v10 = vld [vmem:[%s4705_s3] sm:$0xff]  ;;  %v3286_v11 = vld [vmem:[%s4705_s3 + $0x8] sm:$0xff] }
  0x48   : > { %880 = vmatpush.msra.mxu0 %v3026_v12  ;;  %921 = vmatpush.msra.mxu1 %v3028_v13  ;;  %v3295_v12 = vperm.slane %v3281_v10, 0  ;;  %v3298_v13 = vperm.slane %v3286_v11, 0 }
  0x49   : > { %799 = vmatpush.msra.mxu2 %v3032_v14  ;;  %840 = vmatpush.msra.mxu3 %v3034_v15 }
  0x4a   : > { %881 = vmatpush.msra.mxu0 %v3038_v16  ;;  %922 = vmatpush.msra.mxu1 %v3040_v17 }
  0x4b   : > { %800 = vmatpush.msra.mxu2 %v3044_v18  ;;  %841 = vmatpush.msra.mxu3 %v3046_v19 }
  0x4c   : > { %882 = vmatpush.msra.mxu0 %v3053_v21  ;;  %923 = vmatpush.msra.mxu1 %v3055_v22 }
  0x4d   : > { %801 = vmatpush.msra.mxu2 %v3062_v24  ;;  %842 = vmatpush.msra.mxu3 %v3064_v25 }
  0x4e   : > { %883 = vmatpush.msra.mxu0 %v3068_v26  ;;  %924 = vmatpush.msra.mxu1 %v3070_v27 }
  0x4f   : > { %802 = vmatpush.msra.mxu2 %v3074_v28  ;;  %843 = vmatpush.msra.mxu3 %v3076_v29 }
  0x50   : > { %884 = vmatpush.msra.mxu0 %v3080_v30  ;;  %925 = vmatpush.msra.mxu1 %v3082_v31 }
  0x51   : > { %803 = vmatpush.msra.mxu2 %v3086_v32  ;;  %844 = vmatpush.msra.mxu3 %v3088_v33 }
  0x52   : > { %885 = vmatpush.msra.mxu0 %v3095_v35  ;;  %926 = vmatpush.msra.mxu1 %v3097_v36 }
  0x53   : > { %804 = vmatpush.msra.mxu2 %v3104_v38  ;;  %845 = vmatpush.msra.mxu3 %v3106_v39 }
  0x54   : > { %886 = vmatpush.msra.mxu0 %v3110_v40  ;;  %927 = vmatpush.msra.mxu1 %v3112_v41 }
  0x55   : > { %805 = vmatpush.msra.mxu2 %v3116_v42  ;;  %846 = vmatpush.msra.mxu3 %v3118_v43 }
  0x56   : > { %887 = vmatpush.msra.mxu0 %v3122_v44  ;;  %928 = vmatpush.msra.mxu1 %v3124_v45 }
  0x57   : > { %806 = vmatpush.msra.mxu2 %v3128_v46  ;;  %847 = vmatpush.msra.mxu3 %v3130_v47 }
  0x58   : > { %888 = vmatpush.msra.mxu0 %v3137_v49  ;;  %929 = vmatpush.msra.mxu1 %v3139_v50 }
  0x59   : > { %807 = vmatpush.msra.mxu2 %v3146_v52  ;;  %848 = vmatpush.msra.mxu3 %v3148_v53 }
  0x5a   : > { %889 = vmatpush.msra.mxu0 %v3152_v54  ;;  %930 = vmatpush.msra.mxu1 %v3154_v55 }
  0x5b   : > { %808 = vmatpush.msra.mxu2 %v3158_v56  ;;  %849 = vmatpush.msra.mxu3 %v3160_v57 }
  0x5c   : > { %931 = vmatpush.msra.mxu1 %v3166_v59  ;;  %890 = vmatpush.msra.mxu0 %v3164_v58 }
  0x5d   : > { %809 = vmatpush.msra.mxu2 %v3170_v60  ;;  %850 = vmatpush.msra.mxu3 %v3172_v61 }
  0x5e   : > { %932 = vmatpush.msra.mxu1 %v3178_v63  ;;  %891 = vmatpush.msra.mxu0 %v3176_v62 }
  0x5f   : > { %810 = vmatpush.msra.mxu2 %v3182_v0  ;;  %851 = vmatpush.msra.mxu3 %v3184_v1 }
  0x60   : > { %933 = vmatpush.msra.mxu1 %v3190_v3  ;;  %892 = vmatpush.msra.mxu0 %v3188_v2 }
  0x61   : > { %811 = vmatpush.msra.mxu2 %v3194_v4  ;;  %852 = vmatpush.msra.mxu3 %v3196_v5 }
  0x62   : > { %934 = vmatpush.msra.mxu1 %v3202_v7  ;;  %893 = vmatpush.msra.mxu0 %v3200_v6 }
  0x63   : > { %853 = vmatpush.msra.mxu3 %v3208_v9  ;;  %812 = vmatpush.msra.mxu2 %v3206_v8 }
  0x64   : > { %935 = vmatpush.msra.mxu1 %v3218_v23  ;;  %894 = vmatpush.msra.mxu0 %v3216_v20 }
  0x65   : > { %854 = vmatpush.msra.mxu3 %v3224_v37  ;;  %813 = vmatpush.msra.mxu2 %v3222_v34 }
  0x66   : > { %936 = vmatpush.msra.mxu1 %v3230_v51  ;;  %895 = vmatpush.msra.mxu0 %v3226_v48 }
  0x9b   : > { %v537_v14 = vpop.f32.mrf.mxu0  ;;  %v578_v15 = vpop.f32.mrf.mxu1 }
  0x9c   : > { %v3309_v16 = vadd.f32 %v537_v14, %v3295_v12  ;;  %v3312_v17 = vadd.f32 %v578_v15, %v3298_v13 }
  0x9e   : > { %618 = vmatmul.f32.vlgmr.msrb.gmra.mxu2 %v3309_v16  ;;  %659 = vmatmul.f32.vlgmr.msrb.gmra.mxu3 %v3312_v17 }
  0x9f   : > { %700 = vmatmul.f32.vlgmr.msrb.gmra.mxu0 %v3309_v16  ;;  %741 = vmatmul.f32.vlgmr.msrb.gmra.mxu1 %v3312_v17 }
  0xa3   : > { %v540_v18 = vpop.f32.mrf.mxu0  ;;  %v581_v19 = vpop.f32.mrf.mxu1 }
  0xa4   : > { %v3325_v21 = vadd.f32 %v540_v18, %v3295_v12  ;;  %v3328_v22 = vadd.f32 %v581_v19, %v3298_v13  ;;  %v549_v28 = vpop.f32.mrf.mxu2  ;;  %v590_v29 = vpop.f32.mrf.mxu3 }
  0xa5   : > { %v3355_v35 = vadd.f32 %v549_v28, %v3295_v12  ;;  %v3358_v36 = vadd.f32 %v590_v29, %v3298_v13 }
  0xa6   : > { %621 = vmatmul.f32.gmra.mxu2 %v3325_v21  ;;  %662 = vmatmul.f32.gmra.mxu3 %v3328_v22 }
  0xa7   : > { %703 = vmatmul.f32.gmra.mxu0 %v3325_v21  ;;  %744 = vmatmul.f32.gmra.mxu1 %v3328_v22 }
  0xab   : > { %v543_v24 = vpop.f32.mrf.mxu0  ;;  %v584_v25 = vpop.f32.mrf.mxu1 }
  0xac   : > { %v3335_v26 = vadd.f32 %v543_v24, %v3295_v12  ;;  %v3338_v27 = vadd.f32 %v584_v25, %v3298_v13  ;;  %v552_v38 = vpop.f32.mrf.mxu2  ;;  %v593_v39 = vpop.f32.mrf.mxu3 }
  0xad   : > { %v3365_v40 = vadd.f32 %v552_v38, %v3295_v12  ;;  %v3368_v41 = vadd.f32 %v593_v39, %v3298_v13 }
  0xae   : > { %624 = vmatmul.f32.gmra.mxu2 %v3335_v26  ;;  %665 = vmatmul.f32.gmra.mxu3 %v3338_v27 }
  0xaf   : > { %706 = vmatmul.f32.gmra.mxu0 %v3335_v26  ;;  %747 = vmatmul.f32.gmra.mxu1 %v3338_v27 }
  0xb3   : > { %v546_v30 = vpop.f32.mrf.mxu0  ;;  %v587_v31 = vpop.f32.mrf.mxu1 }
  0xb4   : > { %v3345_v32 = vadd.f32 %v546_v30, %v3295_v12  ;;  %v3348_v33 = vadd.f32 %v587_v31, %v3298_v13  ;;  %v555_v42 = vpop.f32.mrf.mxu2  ;;  %v596_v43 = vpop.f32.mrf.mxu3  ;;  %v262_v30 = vld [vmem:[#allocation2 + $0xf0] sm:$0xff] }
  0xb5   : > { %v3375_v44 = vadd.f32 %v555_v42, %v3295_v12  ;;  %v3378_v45 = vadd.f32 %v596_v43, %v3298_v13  ;;  %v294_v31 = vld [vmem:[#allocation2 + $0x1f0] sm:$0xff]  ;;  %1224 = vmatpush.msrb.mxu2 %v262_v30  ;;  %v292_v42 = vld [vmem:[#allocation2 + $0x1e0] sm:$0xff]  ;;  %v263_v43 = vld [vmem:[#allocation2 + $0xf8] sm:$0xff] }
  0xb6   : > { %627 = vmatmul.f32.gmra.mxu2 %v3345_v32  ;;  %668 = vmatmul.f32.gmra.mxu3 %v3348_v33 }
  0xb7   : > { %709 = vmatmul.f32.gmra.mxu0 %v3345_v32  ;;  %750 = vmatmul.f32.gmra.mxu1 %v3348_v33 }
  0xb8   : > { %1265 = vmatpush.msrb.mxu3 %v294_v31  ;;  %1306 = vmatpush.msrb.mxu0 %v263_v43  ;;  %v257_v31 = vld [vmem:[#allocation2 + $0xc8] sm:$0xff]  ;;  %v282_v43 = vld [vmem:[#allocation2 + $0x190] sm:$0xff] }
  0xba   : > { %1266 = vmatpush.msrb.mxu3 %v292_v42  ;;  %v287_v42 = vld [vmem:[#allocation2 + $0x1b8] sm:$0xff] }
  0xbc   : > { %v558_v46 = vpop.f32.mrf.mxu2  ;;  %v599_v47 = vpop.f32.mrf.mxu3 }
  0xbd   : > { %v3385_v49 = vadd.f32 %v558_v46, %v3295_v12  ;;  %v3388_v50 = vadd.f32 %v599_v47, %v3298_v13  ;;  %v295_v47 = vld [vmem:[#allocation2 + $0x1f8] sm:$0xff] }
  0xbe   : > { %630 = vmatmul.f32.gmra.mxu2 %v3355_v35  ;;  %671 = vmatmul.f32.gmra.mxu3 %v3358_v36 }
  0xbf   : > { %712 = vmatmul.f32.gmra.mxu0 %v3355_v35  ;;  %753 = vmatmul.f32.gmra.mxu1 %v3358_v36 }
  0xc0   : > { %1347 = vmatpush.msrb.mxu1 %v295_v47  ;;  %v280_v47 = vld [vmem:[#allocation2 + $0x180] sm:$0xff] }
  0xc6   : > { %633 = vmatmul.f32.gmra.mxu2 %v3365_v40  ;;  %674 = vmatmul.f32.gmra.mxu3 %v3368_v41 }
  0xc7   : > { %715 = vmatmul.f32.gmra.mxu0 %v3365_v40  ;;  %756 = vmatmul.f32.gmra.mxu1 %v3368_v41 }
  0xce   : > { %636 = vmatmul.f32.gmra.mxu2 %v3375_v44  ;;  %677 = vmatmul.f32.gmra.mxu3 %v3378_v45 }
  0xcf   : > { %718 = vmatmul.f32.gmra.mxu0 %v3375_v44  ;;  %759 = vmatmul.f32.gmra.mxu1 %v3378_v45 }
  0xd6   : > { %639 = vmatmul.f32.gmra.mxu2 %v3385_v49  ;;  %680 = vmatmul.f32.gmra.mxu3 %v3388_v50 }
  0xd7   : > { %721 = vmatmul.f32.gmra.mxu0 %v3385_v49  ;;  %762 = vmatmul.f32.gmra.mxu1 %v3388_v50 }
 0x11c   : > { %v701_v52 = vpop.f32.mrf.mxu0  ;;  %v742_v53 = vpop.f32.mrf.mxu1 }
 0x11d   : > { %v743_v54 = vadd.f32 %v742_v53, %v701_v52  ;;  %v290_v52 = vld [vmem:[#allocation2 + $0x1d0] sm:$0xff]  ;;  %v261_v53 = vld [vmem:[#allocation2 + $0xe8] sm:$0xff] }
 0x11e   : > { %1307 = vmatpush.msrb.mxu0 %v261_v53  ;;  %1267 = vmatpush.msrb.mxu3 %v290_v52  ;;  %v253_v52 = vld [vmem:[#allocation2 + $0xa8] sm:$0xff]  ;;  %v278_v53 = vld [vmem:[#allocation2 + $0x170] sm:$0xff] }
 0x11f   : > { %v3395_v55 = vsub.f32 %v3312_v17, %v743_v54 }
 0x121   : > { %v783_v56 = vmul.f32 %v3395_v55, %v3395_v55  ;;  %v619_v57 = vpop.f32.mrf.mxu2  ;;  %v660_v58 = vpop.f32.mrf.mxu3 }
 0x122   : > { %v661_v59 = vadd.f32 %v660_v58, %v619_v57  ;;  %v293_v58 = vld [vmem:[#allocation2 + $0x1e8] sm:$0xff] }
 0x123   : > { %855 = vmatmul.f32.vlgmr.msra.gmra.mxu3 %v783_v56  ;;  %937 = vmatmul.f32.vlgmr.msra.gmra.mxu1 %v783_v56 }
 0x124   : > { %v3400_v60 = vsub.f32 %v3309_v16, %v661_v59  ;;  %v704_v61 = vpop.f32.mrf.mxu0  ;;  %v745_v62 = vpop.f32.mrf.mxu1  ;;  %v259_v59 = vld [vmem:[#allocation2 + $0xd8] sm:$0xff]  ;;  %1348 = vmatpush.msrb.mxu1 %v293_v58  ;;  %v276_v58 = vld [vmem:[#allocation2 + $0x160] sm:$0xff] }
 0x125   : > { %v746_v63 = vadd.f32 %v745_v62, %v704_v61  ;;  %1308 = vmatpush.msrb.mxu0 %v259_v59  ;;  %v277_v59 = vld [vmem:[#allocation2 + $0x168] sm:$0xff] }
 0x126   : > { %v782_v0 = vmul.f32 %v3400_v60, %v3400_v60 }
 0x127   : > { %v3405_v1 = vsub.f32 %v3328_v22, %v746_v63  ;;  %v256_v63 = vld [vmem:[#allocation2 + $0xc0] sm:$0xff]  ;;  %1309 = vmatpush.msrb.mxu0 %v257_v31  ;;  %v237_v31 = vld [vmem:[#allocation2 + $0x28] sm:$0xff] }
 0x128   : > { %814 = vmatmul.f32.vlgmr.msra.gmra.mxu2 %v782_v0  ;;  %896 = vmatmul.f32.vlgmr.msra.gmra.mxu0 %v782_v0  ;;  %v288_v0 = vld [vmem:[#allocation2 + $0x1c0] sm:$0xff] }
 0x129   : > { %v622_v2 = vpop.f32.mrf.mxu2  ;;  %v663_v3 = vpop.f32.mrf.mxu3  ;;  %v785_v4 = vmul.f32 %v3405_v1, %v3405_v1  ;;  %1268 = vmatpush.msrb.mxu3 %v288_v0  ;;  %v275_v0 = vld [vmem:[#allocation2 + $0x158] sm:$0xff] }
 0x12a   : > { %v664_v5 = vadd.f32 %v663_v3, %v622_v2 }
 0x12b   : > { %858 = vmatmul.f32.gmra.mxu3 %v785_v4  ;;  %940 = vmatmul.f32.gmra.mxu1 %v785_v4 }
 0x12c   : > { %v707_v6 = vpop.f32.mrf.mxu0  ;;  %v748_v7 = vpop.f32.mrf.mxu1  ;;  %v3410_v8 = vsub.f32 %v3325_v21, %v664_v5 }
 0x12d   : > { %v749_v9 = vadd.f32 %v748_v7, %v707_v6  ;;  %v254_v6 = vld [vmem:[#allocation2 + $0xb0] sm:$0xff] }
 0x12e   : > { %v784_v20 = vmul.f32 %v3410_v8, %v3410_v8  ;;  %v286_v7 = vld [vmem:[#allocation2 + $0x1b0] sm:$0xff] }
 0x12f   : > { %v3415_v23 = vsub.f32 %v3338_v27, %v749_v9  ;;  %1269 = vmatpush.msrb.mxu3 %v286_v7  ;;  %v245_v7 = vld [vmem:[#allocation2 + $0x68] sm:$0xff] }
 0x130   : > { %817 = vmatmul.f32.gmra.mxu2 %v784_v20  ;;  %899 = vmatmul.f32.gmra.mxu0 %v784_v20 }
 0x131   : > { %v625_v34 = vpop.f32.mrf.mxu2  ;;  %v666_v37 = vpop.f32.mrf.mxu3  ;;  %v787_v48 = vmul.f32 %v3415_v23, %v3415_v23 }
 0x132   : > { %v667_v51 = vadd.f32 %v666_v37, %v625_v34 }
 0x133   : > { %861 = vmatmul.f32.gmra.mxu3 %v787_v48  ;;  %943 = vmatmul.f32.gmra.mxu1 %v787_v48 }
 0x134   : > { %v710_v12 = vpop.f32.mrf.mxu0  ;;  %v751_v13 = vpop.f32.mrf.mxu1  ;;  %v3420_v14 = vsub.f32 %v3335_v26, %v667_v51 }
 0x135   : > { %v752_v15 = vadd.f32 %v751_v13, %v710_v12 }
 0x136   : > { %v786_v16 = vmul.f32 %v3420_v14, %v3420_v14 }
 0x137   : > { %v3425_v17 = vsub.f32 %v3348_v33, %v752_v15 }
 0x138   : > { %820 = vmatmul.f32.gmra.mxu2 %v786_v16  ;;  %902 = vmatmul.f32.gmra.mxu0 %v786_v16 }
 0x139   : > { %v628_v18 = vpop.f32.mrf.mxu2  ;;  %v669_v19 = vpop.f32.mrf.mxu3  ;;  %v789_v21 = vmul.f32 %v3425_v17, %v3425_v17 }
 0x13a   : > { %v670_v22 = vadd.f32 %v669_v19, %v628_v18 }
 0x13b   : > { %864 = vmatmul.f32.gmra.mxu3 %v789_v21  ;;  %946 = vmatmul.f32.gmra.mxu1 %v789_v21 }
 0x13c   : > { %v713_v24 = vpop.f32.mrf.mxu0  ;;  %v754_v25 = vpop.f32.mrf.mxu1  ;;  %v3430_v26 = vsub.f32 %v3345_v32, %v670_v22  ;;  %v260_v32 = vld [vmem:[#allocation2 + $0xe0] sm:$0xff] }
 0x13d   : > { %v755_v27 = vadd.f32 %v754_v25, %v713_v24  ;;  %1225 = vmatpush.msrb.mxu2 %v260_v32  ;;  %v255_v32 = vld [vmem:[#allocation2 + $0xb8] sm:$0xff] }
 0x13e   : > { %v788_v28 = vmul.f32 %v3430_v26, %v3430_v26  ;;  %1310 = vmatpush.msrb.mxu0 %v255_v32  ;;  %v235_v32 = vld [vmem:[#allocation2 + $0x18] sm:$0xff] }
 0x13f   : > { %v3435_v29 = vsub.f32 %v3358_v36, %v755_v27  ;;  %v258_v36 = vld [vmem:[#allocation2 + $0xd0] sm:$0xff] }
 0x140   : > { %823 = vmatmul.f32.gmra.mxu2 %v788_v28  ;;  %905 = vmatmul.f32.gmra.mxu0 %v788_v28 }
 0x141   : > { %v631_v33 = vpop.f32.mrf.mxu2  ;;  %v672_v38 = vpop.f32.mrf.mxu3  ;;  %v791_v39 = vmul.f32 %v3435_v29, %v3435_v29  ;;  %1226 = vmatpush.msrb.mxu2 %v258_v36  ;;  %v281_v36 = vld [vmem:[#allocation2 + $0x188] sm:$0xff]  ;;  %1311 = vmatpush.msrb.mxu0 %v253_v52 }
 0x142   : > { %v673_v46 = vadd.f32 %v672_v38, %v631_v33  ;;  %v284_v33 = vld [vmem:[#allocation2 + $0x1a0] sm:$0xff]  ;;  %v289_v38 = vld [vmem:[#allocation2 + $0x1c8] sm:$0xff] }
 0x143   : > { %867 = vmatmul.f32.gmra.mxu3 %v791_v39  ;;  %949 = vmatmul.f32.gmra.mxu1 %v791_v39  ;;  %v250_v39 = vld [vmem:[#allocation2 + $0x90] sm:$0xff] }
 0x144   : > { %v716_v54 = vpop.f32.mrf.mxu0  ;;  %v757_v56 = vpop.f32.mrf.mxu1  ;;  %v3440_v57 = vsub.f32 %v3355_v35, %v673_v46  ;;  %v291_v35 = vld [vmem:[#allocation2 + $0x1d8] sm:$0xff]  ;;  %1227 = vmatpush.msrb.mxu2 %v256_v63  ;;  %1270 = vmatpush.msrb.mxu3 %v284_v33  ;;  %v274_v63 = vld [vmem:[#allocation2 + $0x150] sm:$0xff] }
 0x145   : > { %v758_v61 = vadd.f32 %v757_v56, %v716_v54  ;;  %1349 = vmatpush.msrb.mxu1 %v291_v35  ;;  %v283_v46 = vld [vmem:[#allocation2 + $0x198] sm:$0xff]  ;;  %v246_v35 = vld [vmem:[#allocation2 + $0x70] sm:$0xff] }
 0x146   : > { %v790_v62 = vmul.f32 %v3440_v57, %v3440_v57  ;;  %1228 = vmatpush.msrb.mxu2 %v254_v6  ;;  %1271 = vmatpush.msrb.mxu3 %v282_v43  ;;  %v279_v54 = vld [vmem:[#allocation2 + $0x178] sm:$0xff]  ;;  %v244_v6 = vld [vmem:[#allocation2 + $0x60] sm:$0xff] }
 0x147   : > { %v3445_v2 = vsub.f32 %v3368_v41, %v758_v61  ;;  %1350 = vmatpush.msrb.mxu1 %v289_v38  ;;  %v251_v56 = vld [vmem:[#allocation2 + $0x98] sm:$0xff]  ;;  %v248_v61 = vld [vmem:[#allocation2 + $0x80] sm:$0xff] }
 0x148   : > { %826 = vmatmul.f32.gmra.mxu2 %v790_v62  ;;  %908 = vmatmul.f32.gmra.mxu0 %v790_v62  ;;  %v249_v62 = vld [vmem:[#allocation2 + $0x88] sm:$0xff] }
 0x149   : > { %v634_v3 = vpop.f32.mrf.mxu2  ;;  %v675_v4 = vpop.f32.mrf.mxu3  ;;  %v793_v5 = vmul.f32 %v3445_v2, %v3445_v2  ;;  %1351 = vmatpush.msrb.mxu1 %v287_v42  ;;  %1272 = vmatpush.msrb.mxu3 %v280_v47  ;;  %v232_v42 = vld [vmem:[#allocation2] sm:$0xff] }
 0x14a   : > { %v676_v9 = vadd.f32 %v675_v4, %v634_v3  ;;  %1312 = vmatpush.msrb.mxu0 %v251_v56  ;;  %v247_v3 = vld [vmem:[#allocation2 + $0x78] sm:$0xff]  ;;  %v272_v4 = vld [vmem:[#allocation2 + $0x140] sm:$0xff] }
 0x14b   : > { %870 = vmatmul.f32.gmra.mxu3 %v793_v5  ;;  %952 = vmatmul.f32.gmra.mxu1 %v793_v5  ;;  %v273_v5 = vld [vmem:[#allocation2 + $0x148] sm:$0xff] }
 0x14c   : > { %v719_v41 = vpop.f32.mrf.mxu0  ;;  %v760_v20 = vpop.f32.mrf.mxu1  ;;  %v3450_v34 = vsub.f32 %v3365_v40, %v676_v9  ;;  %1273 = vmatpush.msrb.mxu3 %v278_v53  ;;  %1313 = vmatpush.msrb.mxu0 %v249_v62  ;;  %v270_v9 = vld [vmem:[#allocation2 + $0x130] sm:$0xff] }
 0x14d   : > { %v761_v37 = vadd.f32 %v760_v20, %v719_v41  ;;  %v271_v41 = vld [vmem:[#allocation2 + $0x138] sm:$0xff] }
 0x14e   : > { %v792_v48 = vmul.f32 %v3450_v34, %v3450_v34  ;;  %1274 = vmatpush.msrb.mxu3 %v276_v58  ;;  %1314 = vmatpush.msrb.mxu0 %v247_v3 }
 0x14f   : > { %v3455_v51 = vsub.f32 %v3378_v45, %v761_v37  ;;  %v242_v37 = vld [vmem:[#allocation2 + $0x50] sm:$0xff] }
 0x150   : > { %829 = vmatmul.f32.gmra.mxu2 %v792_v48  ;;  %911 = vmatmul.f32.gmra.mxu0 %v792_v48  ;;  %v243_v48 = vld [vmem:[#allocation2 + $0x58] sm:$0xff] }
 0x151   : > { %v637_v12 = vpop.f32.mrf.mxu2  ;;  %v678_v13 = vpop.f32.mrf.mxu3  ;;  %v795_v15 = vmul.f32 %v3455_v51, %v3455_v51  ;;  %1275 = vmatpush.msrb.mxu3 %v274_v63  ;;  %1315 = vmatpush.msrb.mxu0 %v245_v7 }
 0x152   : > { %v679_v16 = vadd.f32 %v678_v13, %v637_v12  ;;  %v268_v12 = vld [vmem:[#allocation2 + $0x120] sm:$0xff]  ;;  %v269_v13 = vld [vmem:[#allocation2 + $0x128] sm:$0xff] }
 0x153   : > { %873 = vmatmul.f32.gmra.mxu3 %v795_v15  ;;  %955 = vmatmul.f32.gmra.mxu1 %v795_v15  ;;  %v240_v15 = vld [vmem:[#allocation2 + $0x40] sm:$0xff] }
 0x154   : > { %v722_v40 = vpop.f32.mrf.mxu0  ;;  %v763_v18 = vpop.f32.mrf.mxu1  ;;  %v3460_v19 = vsub.f32 %v3375_v44, %v679_v16  ;;  %1276 = vmatpush.msrb.mxu3 %v272_v4  ;;  %1316 = vmatpush.msrb.mxu0 %v243_v48  ;;  %v241_v16 = vld [vmem:[#allocation2 + $0x48] sm:$0xff] }
 0x155   : > { %v764_v21 = vadd.f32 %v763_v18, %v722_v40  ;;  %v266_v40 = vld [vmem:[#allocation2 + $0x110] sm:$0xff]  ;;  %v267_v18 = vld [vmem:[#allocation2 + $0x118] sm:$0xff] }
 0x156   : > { %v794_v45 = vmul.f32 %v3460_v19, %v3460_v19  ;;  %1277 = vmatpush.msrb.mxu3 %v270_v9  ;;  %1317 = vmatpush.msrb.mxu0 %v241_v16 }
 0x157   : > { %v3465_v22 = vsub.f32 %v3388_v50, %v764_v21  ;;  %v252_v50 = vld [vmem:[#allocation2 + $0xa0] sm:$0xff]  ;;  %v238_v21 = vld [vmem:[#allocation2 + $0x30] sm:$0xff] }
 0x158   : > { %832 = vmatmul.f32.gmra.mxu2 %v794_v45  ;;  %914 = vmatmul.f32.gmra.mxu0 %v794_v45  ;;  %v239_v45 = vld [vmem:[#allocation2 + $0x38] sm:$0xff] }
 0x159   : > { %v640_v24 = vpop.f32.mrf.mxu2  ;;  %v681_v25 = vpop.f32.mrf.mxu3  ;;  %v797_v27 = vmul.f32 %v3465_v22, %v3465_v22  ;;  %1229 = vmatpush.msrb.mxu2 %v252_v50  ;;  %1278 = vmatpush.msrb.mxu3 %v268_v12  ;;  %v236_v50 = vld [vmem:[#allocation2 + $0x20] sm:$0xff] }
 0x15a   : > { %v682_v28 = vadd.f32 %v681_v25, %v640_v24  ;;  %v264_v24 = vld [vmem:[#allocation2 + $0x100] sm:$0xff]  ;;  %1318 = vmatpush.msrb.mxu0 %v239_v45 }
 0x15b   : > { %876 = vmatmul.f32.gmra.mxu3 %v797_v27  ;;  %958 = vmatmul.f32.gmra.mxu1 %v797_v27  ;;  %v265_v27 = vld [vmem:[#allocation2 + $0x108] sm:$0xff] }
 0x15c   : > { %v3470_v44 = vsub.f32 %v3385_v49, %v682_v28  ;;  %1230 = vmatpush.msrb.mxu2 %v250_v39  ;;  %v285_v49 = vld [vmem:[#allocation2 + $0x1a8] sm:$0xff]  ;;  %1279 = vmatpush.msrb.mxu3 %v266_v40  ;;  %v234_v39 = vld [vmem:[#allocation2 + $0x10] sm:$0xff] }
 0x15d   : > { %1352 = vmatpush.msrb.mxu1 %v285_v49  ;;  %1319 = vmatpush.msrb.mxu0 %v237_v31  ;;  %v233_v49 = vld [vmem:[#allocation2 + $0x8] sm:$0xff] }
 0x15e   : > { %v796_v30 = vmul.f32 %v3470_v44, %v3470_v44  ;;  %1231 = vmatpush.msrb.mxu2 %v248_v61  ;;  %1280 = vmatpush.msrb.mxu3 %v264_v24 }
 0x15f   : > { %1353 = vmatpush.msrb.mxu1 %v283_v46  ;;  %1320 = vmatpush.msrb.mxu0 %v235_v32 }
 0x160   : > { %835 = vmatmul.f32.gmra.mxu2 %v796_v30  ;;  %917 = vmatmul.f32.gmra.mxu0 %v796_v30 }
 0x161   : > { %1354 = vmatpush.msrb.mxu1 %v281_v36  ;;  %1232 = vmatpush.msrb.mxu2 %v246_v35 }
 0x162   : > { %1321 = vmatpush.msrb.mxu0 %v233_v49 }
 0x163   : > { %1355 = vmatpush.msrb.mxu1 %v279_v54  ;;  %1233 = vmatpush.msrb.mxu2 %v244_v6 }
 0x165   : > { %1356 = vmatpush.msrb.mxu1 %v277_v59  ;;  %1234 = vmatpush.msrb.mxu2 %v242_v37 }
 0x167   : > { %1357 = vmatpush.msrb.mxu1 %v275_v0  ;;  %1235 = vmatpush.msrb.mxu2 %v240_v15  ;;  %v3481_v15 = vperm.slane %v3286_v11, 1 }
 0x169   : > { %1358 = vmatpush.msrb.mxu1 %v273_v5  ;;  %1236 = vmatpush.msrb.mxu2 %v238_v21 }
 0x16b   : > { %1359 = vmatpush.msrb.mxu1 %v271_v41  ;;  %1237 = vmatpush.msrb.mxu2 %v236_v50 }
 0x16d   : > { %1360 = vmatpush.msrb.mxu1 %v269_v13  ;;  %1238 = vmatpush.msrb.mxu2 %v234_v39 }
 0x16f   : > { %1361 = vmatpush.msrb.mxu1 %v267_v18  ;;  %1239 = vmatpush.msrb.mxu2 %v232_v42 }
 0x171   : > { %1362 = vmatpush.msrb.mxu1 %v265_v27 }
 0x1a0   : > { %v938_v20 = vpop.f32.mrf.mxu1 }
 0x1a5   : > { %v897_v25 = vpop.f32.mrf.mxu0 }
 0x1a6   : > { %v856_v28 = vpop.f32.mrf.mxu3  ;;  %v898_v30 = vadd.f32 1e-05, %v897_v25  ;;  %v3485_v25 = vperm.slane %v3286_v11, 2 }
 0x1a8   : > { %v939_v33 = vadd.f32 %v938_v20, %v898_v30  ;;  %v941_v38 = vpop.f32.mrf.mxu1 }
 0x1aa   : > { %2638 = vrsqrt.f32 %v939_v33  ;;  %vm978_vm2 = vweird.f32 %v939_v33 }
 0x1ab   : > { %v815_v43 = vpop.f32.mrf.mxu2 }
 0x1ac   : > { %v816_v46 = vadd.f32 1e-05, %v815_v43 }
 0x1ad   : > { %v900_v47 = vpop.f32.mrf.mxu0 }
 0x1ae   : > { %v857_v36 = vadd.f32 %v856_v28, %v816_v46  ;;  %v859_v52 = vpop.f32.mrf.mxu3  ;;  %v901_v53 = vadd.f32 1e-05, %v900_v47 }
 0x1b0   : > { %v2639_v54 = vpop.eup %2638  ;;  %2640 = vrsqrt.f32 %v857_v36  ;;  %v942_v56 = vadd.f32 %v941_v38, %v901_v53  ;;  %v944_v58 = vpop.f32.mrf.mxu1  ;;  %vm968_vm5 = vweird.f32 %v857_v36 }
 0x1b1   : > { %v973_v59 = vmul.f32 %v2639_v54, %v939_v33  ;;  %vm979_vm1 = vweird.f32 %v2639_v54 }
 0x1b2   : > { %2642 = vrsqrt.f32 %v942_v56  ;;  %vm980_vm3 = vmor %vm978_vm2, %vm979_vm1  ;;  %vm998_vm8 = vweird.f32 %v942_v56 }
 0x1b3   : > { %v974_v61 = vmul.f32 %v2639_v54, %v973_v59  ;;  %v818_v62 = vpop.f32.mrf.mxu2 }
 0x1b4   : > { %v819_v63 = vadd.f32 1e-05, %v818_v62 }
 0x1b5   : > { %v975_v0 = vmul.f32 0.5, %v974_v61  ;;  %v903_v35 = vpop.f32.mrf.mxu0 }
 0x1b6   : > { %v2641_v3 = vpop.eup %2640  ;;  %v3474_v4 = vadd.f32 %v859_v52, %v819_v63  ;;  %v862_v5 = vpop.f32.mrf.mxu3  ;;  %v904_v6 = vadd.f32 1e-05, %v903_v35 }
 0x1b7   : > { %v976_v7 = vsub.f32 1.5, %v975_v0  ;;  %v963_v9 = vmul.f32 %v2641_v3, %v857_v36  ;;  %vm969_vm4 = vweird.f32 %v2641_v3 }
 0x1b8   : > { %v2643_v41 = vpop.eup %2642  ;;  %2644 = vrsqrt.f32 %v3474_v4  ;;  %v3477_v20 = vadd.f32 %v944_v58, %v904_v6  ;;  %v947_v13 = vpop.f32.mrf.mxu1  ;;  %vm3496_vm7 = vmor %vm968_vm5, %vm969_vm4  ;;  %vm988_vm11 = vweird.f32 %v3474_v4 }
 0x1b9   : > { %v977_v37 = vmul.f32 %v2639_v54, %v976_v7  ;;  %v964_v48 = vmul.f32 %v2641_v3, %v963_v9  ;;  %v993_v12 = vmul.f32 %v2643_v41, %v942_v56  ;;  %vm999_vm6 = vweird.f32 %v2643_v41 }
 0x1ba   : > { %2646 = vrsqrt.f32 %v3477_v20  ;;  %vm1000_vm9 = vmor %vm998_vm8, %vm999_vm6  ;;  %vm1018_vm15 = vweird.f32 %v3477_v20 }
 0x1bb   : > { %v981_v16 = vsel %vm980_vm3, %v2639_v54, %v977_v37  ;;  %v965_v40 = vmul.f32 0.5, %v964_v48  ;;  %v994_v18 = vmul.f32 %v2643_v41, %v993_v12  ;;  %v821_v21 = vpop.f32.mrf.mxu2  ;;  %v3511_v54 = vperm.slane %v3281_v10, 1 }
 0x1bc   : > { %v822_v45 = vadd.f32 1e-05, %v821_v21  ;;  %v1123_v24 = vmul.f32 %v981_v16, %v3395_v55 }
 0x1bd   : > { %v966_v27 = vsub.f32 1.5, %v965_v40  ;;  %v995_v28 = vmul.f32 0.5, %v994_v18  ;;  %v906_v30 = vpop.f32.mrf.mxu0 }
 0x1be   : > { %v3487_v50 = vpop.eup %2644  ;;  %v3489_v31 = vadd.f32 %v862_v5, %v822_v45  ;;  %v865_v33 = vpop.f32.mrf.mxu3  ;;  %v907_v38 = vadd.f32 1e-05, %v906_v30  ;;  %v1141_v39 = vmul.f32 %v3481_v15, %v1123_v24 }
 0x1bf   : > { %v967_v32 = vmul.f32 %v2641_v3, %v966_v27  ;;  %v996_v42 = vsub.f32 1.5, %v995_v28  ;;  %v983_v11 = vmul.f32 %v3487_v50, %v3474_v4  ;;  %vm989_vm12 = vweird.f32 %v3487_v50 }
 0x1c0   : > { %v3494_v55 = vpop.eup %2646  ;;  %2648 = vrsqrt.f32 %v3489_v31  ;;  %v3501_v43 = vadd.f32 %v947_v13, %v907_v38  ;;  %v1159_v46 = vadd.f32 %v3485_v25, %v1141_v39  ;;  %v950_v61 = vpop.f32.mrf.mxu1  ;;  %vm3546_vm14 = vmor %vm988_vm11, %vm989_vm12  ;;  %vm1008_vm5 = vweird.f32 %v3489_v31 }
 0x1c1   : > { %v971_v47 = vsel %vm3496_vm7, %v2641_v3, %v967_v32  ;;  %v997_v36 = vmul.f32 %v2643_v41, %v996_v42  ;;  %v984_v52 = vmul.f32 %v3487_v50, %v983_v11  ;;  %v1013_v53 = vmul.f32 %v3494_v55, %v3477_v20 }
 0x1c2   : > { %2650 = vrsqrt.f32 %v3501_v43  ;;  %vm1175_vm10 = vcmp.gt.f32.partialorder %v1159_v46, 0.0  ;;  %v1191_v63 = vmul.f32 0.01, %v1159_v46  ;;  %v1122_v35 = vmul.f32 %v971_v47, %v3400_v60 }
 0x1c3   : > { %v1001_v56 = vsel %vm1000_vm9, %v2643_v41, %v997_v36  ;;  %v985_v58 = vmul.f32 0.5, %v984_v52  ;;  %v1014_v59 = vmul.f32 %v3494_v55, %v1013_v53  ;;  %v824_v62 = vpop.f32.mrf.mxu2  ;;  %v3516_v3 = vperm.slane %v3281_v10, 2 }
 0x1c4   : > { %v825_v0 = vadd.f32 1e-05, %v824_v62  ;;  %v1125_v5 = vmul.f32 %v1001_v56, %v3405_v1  ;;  %v3521_v41 = vsel %vm1175_vm10, %v1159_v46, %v1191_v63  ;;  %v1140_v10 = vmul.f32 %v3511_v54, %v1122_v35 }
 0x1c5   : > { %v986_v6 = vsub.f32 1.5, %v985_v58  ;;  %v1015_v7 = vmul.f32 0.5, %v1014_v59  ;;  %v909_v9 = vpop.f32.mrf.mxu0  ;;  %4746 = vst [vmem:[#allocation8_spill] sm:$0xff] %v3521_v41  ;;  %1281 = vmatmul.f32.vlgmr.msrb.gmra.mxu3 %v3521_v41  ;;  %1363 = vmatmul.f32.vlgmr.msrb.gmra.mxu1 %v3521_v41  ;;  %vm1019_vm13 = vweird.f32 %v3494_v55  ;;  %vm1038_vm7 = vweird.f32 %v3501_v43 }
 0x1c6   : > { %v3523_v37 = vpop.eup %2648  ;;  %v3526_v48 = vadd.f32 %v865_v33, %v825_v0  ;;  %v910_v60 = vadd.f32 1e-05, %v909_v9  ;;  %v868_v16 = vpop.f32.mrf.mxu3  ;;  %v1158_v21 = vadd.f32 %v3516_v3, %v1140_v10  ;;  %v1143_v45 = vmul.f32 %v3481_v15, %v1125_v5  ;;  %vm3561_vm1 = vmor %vm1018_vm15, %vm1019_vm13 }
 0x1c7   : > { %v987_v1 = vmul.f32 %v3487_v50, %v986_v6  ;;  %v1016_v12 = vsub.f32 1.5, %v1015_v7  ;;  %v1003_v13 = vmul.f32 %v3523_v37, %v3489_v31  ;;  %vm1009_vm2 = vweird.f32 %v3523_v37 }
 0x1c8   : > { %v3535_v40 = vpop.eup %2650  ;;  %2652 = vrsqrt.f32 %v3526_v48  ;;  %v3538_v18 = vadd.f32 %v950_v61, %v910_v60  ;;  %vm1174_vm0 = vcmp.gt.f32.partialorder %v1158_v21, 0.0  ;;  %v1190_v42 = vmul.f32 0.01, %v1158_v21  ;;  %v953_v47 = vpop.f32.mrf.mxu1  ;;  %vm3600_vm6 = vmor %vm1008_vm5, %vm1009_vm2 }
 0x1c9   : > { %v1017_v27 = vmul.f32 %v3494_v55, %v1016_v12  ;;  %v1004_v28 = vmul.f32 %v3523_v37, %v1003_v13  ;;  %v1033_v30 = vmul.f32 %v3535_v40, %v3501_v43  ;;  %v991_v33 = vsel %vm3546_vm14, %v3487_v50, %v987_v1 }
 0x1ca   : > { %2654 = vrsqrt.f32 %v3538_v18  ;;  %v1161_v11 = vadd.f32 %v3485_v25, %v1143_v45  ;;  %v3571_v36 = vsel %vm1174_vm0, %v1158_v21, %v1190_v42  ;;  %v1124_v53 = vmul.f32 %v991_v33, %v3410_v8 }
 0x1cb   : > { %v1005_v38 = vmul.f32 0.5, %v1004_v28  ;;  %v1034_v39 = vmul.f32 %v3535_v40, %v1033_v30  ;;  %v827_v32 = vpop.f32.mrf.mxu2  ;;  %v1021_v50 = vsel %vm3561_vm1, %v3494_v55, %v1017_v27  ;;  %4751 = vst [vmem:[#allocation9_spill] sm:$0xff] %v3571_v36  ;;  %1240 = vmatmul.f32.vlgmr.msrb.gmra.mxu2 %v3571_v36  ;;  %1322 = vmatmul.f32.vlgmr.msrb.gmra.mxu0 %v3571_v36  ;;  %vm1039_vm4 = vweird.f32 %v3535_v40 }
 0x1cc   : > { %v828_v20 = vadd.f32 1e-05, %v827_v32  ;;  %vm1177_vm3 = vcmp.gt.f32.partialorder %v1161_v11, 0.0  ;;  %v1193_v59 = vmul.f32 0.01, %v1161_v11  ;;  %v1127_v63 = vmul.f32 %v1021_v50, %v3415_v23  ;;  %vm3610_vm8 = vmor %vm1038_vm7, %vm1039_vm4 }
 0x1cd   : > { %v1006_v49 = vsub.f32 1.5, %v1005_v38  ;;  %v1035_v46 = vmul.f32 0.5, %v1034_v39  ;;  %v912_v52 = vpop.f32.mrf.mxu0  ;;  %v1142_v31 = vmul.f32 %v3511_v54, %v1124_v53  ;;  %vm1028_vm9 = vweird.f32 %v3526_v48 }
 0x1ce   : > { %v3574_v56 = vpop.eup %2652  ;;  %v3576_v58 = vadd.f32 %v868_v16, %v828_v20  ;;  %v913_v55 = vadd.f32 1e-05, %v912_v52  ;;  %v3590_v5 = vsel %vm1177_vm3, %v1161_v11, %v1193_v59  ;;  %v871_v23 = vpop.f32.mrf.mxu3  ;;  %v1145_v43 = vmul.f32 %v3481_v15, %v1127_v63 }
 0x1cf   : > { %v1036_v61 = vsub.f32 1.5, %v1035_v46  ;;  %v1023_v62 = vmul.f32 %v3574_v56, %v3526_v48  ;;  %v1007_v0 = vmul.f32 %v3523_v37, %v1006_v49  ;;  %1284 = vmatmul.f32.gmra.mxu3 %v3590_v5  ;;  %1366 = vmatmul.f32.gmra.mxu1 %v3590_v5  ;;  %v1160_v24 = vadd.f32 %v3516_v3, %v1142_v31 }
 0x1d0   : > { %v3584_v8 = vpop.eup %2654  ;;  %2656 = vrsqrt.f32 %v3576_v58  ;;  %v3588_v35 = vadd.f32 %v953_v47, %v913_v55  ;;  %vm1029_vm10 = vweird.f32 %v3574_v56  ;;  %v1163_v33 = vadd.f32 %v3485_v25, %v1145_v43  ;;  %v956_v42 = vpop.f32.mrf.mxu1 }
 0x1d1   : > { %v1037_v6 = vmul.f32 %v3535_v40, %v1036_v61  ;;  %v1024_v7 = vmul.f32 %v3574_v56, %v1023_v62  ;;  %v1053_v9 = vmul.f32 %v3584_v8, %v3538_v18  ;;  %v1011_v16 = vsel %vm3600_vm6, %v3523_v37, %v1007_v0  ;;  %vm3656_vm0 = vmor %vm1028_vm9, %vm1029_vm10 }
 0x1d2   : > { %2658 = vrsqrt.f32 %v3588_v35  ;;  %vm1176_vm11 = vcmp.gt.f32.partialorder %v1160_v24, 0.0  ;;  %v1192_v37 = vmul.f32 0.01, %v1160_v24  ;;  %v1126_v50 = vmul.f32 %v1011_v16, %v3420_v14 }
 0x1d3   : > { %v1025_v1 = vmul.f32 0.5, %v1024_v7  ;;  %v1054_v12 = vmul.f32 %v3584_v8, %v1053_v9  ;;  %v830_v13 = vpop.f32.mrf.mxu2  ;;  %v1041_v21 = vsel %vm3610_vm8, %v3535_v40, %v1037_v6  ;;  %vm1059_vm12 = vweird.f32 %v3584_v8 }
 0x1d4   : > { %v831_v45 = vadd.f32 1e-05, %v830_v13  ;;  %v1129_v20 = vmul.f32 %v1041_v21, %v3425_v17  ;;  %v3638_v46 = vsel %vm1176_vm11, %v1160_v24, %v1192_v37  ;;  %vm1058_vm13 = vweird.f32 %v3538_v18 }
 0x1d5   : > { %v1026_v27 = vsub.f32 1.5, %v1025_v1  ;;  %v1055_v28 = vmul.f32 0.5, %v1054_v12  ;;  %v915_v30 = vpop.f32.mrf.mxu0  ;;  %1243 = vmatmul.f32.gmra.mxu2 %v3638_v46  ;;  %vm1048_vm14 = vweird.f32 %v3576_v58  ;;  %1325 = vmatmul.f32.gmra.mxu0 %v3638_v46  ;;  %vm1179_vm15 = vcmp.gt.f32.partialorder %v1163_v33, 0.0  ;;  %vm3667_vm2 = vmor %vm1058_vm13, %vm1059_vm12 }
 0x1d6   : > { %v3626_v4 = vpop.eup %2656  ;;  %v3628_v38 = vadd.f32 %v871_v23, %v831_v45  ;;  %v916_v39 = vadd.f32 1e-05, %v915_v30  ;;  %v874_v59 = vpop.f32.mrf.mxu3  ;;  %v1195_v61 = vmul.f32 0.01, %v1163_v33  ;;  %v1144_v6 = vmul.f32 %v3511_v54, %v1126_v50 }
 0x1d7   : > { %v1056_v32 = vsub.f32 1.5, %v1055_v28  ;;  %v1043_v40 = vmul.f32 %v3626_v4, %v3576_v58  ;;  %v1027_v49 = vmul.f32 %v3574_v56, %v1026_v27  ;;  %vm1049_vm1 = vweird.f32 %v3626_v4  ;;  %v328_v28 = vld [vmem:[#allocation2 + $0x2f8] sm:$0xff] }
 0x1d8   : > { %v3634_v11 = vpop.eup %2658  ;;  %2660 = vrsqrt.f32 %v3628_v38  ;;  %v3640_v47 = vadd.f32 %v956_v42, %v916_v39  ;;  %v1147_v7 = vmul.f32 %v3481_v15, %v1129_v20  ;;  %vm1078_vm3 = vweird.f32 %v3588_v35  ;;  %vm3701_vm7 = vmor %vm1048_vm14, %vm1049_vm1  ;;  %v959_v37 = vpop.f32.mrf.mxu1  ;;  %1536 = vmatpush.msra.mxu0 %v328_v28 }
 0x1d9   : > { %v1057_v52 = vmul.f32 %v3584_v8, %v1056_v32  ;;  %v1044_v53 = vmul.f32 %v3626_v4, %v1043_v40  ;;  %v1073_v14 = vmul.f32 %v3634_v11, %v3588_v35  ;;  %v1031_v63 = vsel %vm3656_vm0, %v3574_v56, %v1027_v49 }
 0x1da   : > { %2662 = vrsqrt.f32 %v3640_v47  ;;  %v3678_v56 = vsel %vm1179_vm15, %v1163_v33, %v1195_v61  ;;  %v1162_v12 = vadd.f32 %v3516_v3, %v1144_v6  ;;  %vm1079_vm4 = vweird.f32 %v3634_v11 }
 0x1db   : > { %v1045_v55 = vmul.f32 0.5, %v1044_v53  ;;  %v1074_v18 = vmul.f32 %v3634_v11, %v1073_v14  ;;  %v833_v62 = vpop.f32.mrf.mxu2  ;;  %v1061_v9 = vsel %vm3667_vm2, %v3584_v8, %v1057_v52  ;;  %1287 = vmatmul.f32.gmra.mxu3 %v3678_v56  ;;  %1369 = vmatmul.f32.gmra.mxu1 %v3678_v56  ;;  %v1165_v8 = vadd.f32 %v3485_v25, %v1147_v7  ;;  %vm3733_vm11 = vmor %vm1078_vm3, %vm1079_vm4 }
 0x1dc   : > { %v834_v0 = vadd.f32 1e-05, %v833_v62  ;;  %vm1068_vm5 = vweird.f32 %v3628_v38  ;;  %vm1178_vm6 = vcmp.gt.f32.partialorder %v1162_v12, 0.0  ;;  %v1194_v24 = vmul.f32 0.01, %v1162_v12 }
 0x1dd   : > { %v1046_v23 = vsub.f32 1.5, %v1045_v55  ;;  %v1075_v60 = vmul.f32 0.5, %v1074_v18  ;;  %v918_v31 = vpop.f32.mrf.mxu0  ;;  %v1128_v27 = vmul.f32 %v1031_v63, %v3430_v26  ;;  %vm1098_vm8 = vweird.f32 %v3640_v47 }
 0x1de   : > { %v3680_v10 = vpop.eup %2660  ;;  %v3684_v1 = vadd.f32 %v874_v59, %v834_v0  ;;  %v919_v13 = vadd.f32 1e-05, %v918_v31  ;;  %v1131_v39 = vmul.f32 %v1061_v9, %v3435_v29  ;;  %v3713_v32 = vsel %vm1178_vm6, %v1162_v12, %v1194_v24  ;;  %v877_v14 = vpop.f32.mrf.mxu3  ;;  %v325_v24 = vld [vmem:[#allocation2 + $0x2e0] sm:$0xff] }
 0x1df   : > { %v1047_v43 = vmul.f32 %v3626_v4, %v1046_v23  ;;  %v1076_v16 = vsub.f32 1.5, %v1075_v60  ;;  %v1063_v21 = vmul.f32 %v3680_v10, %v3628_v38  ;;  %vm1181_vm9 = vcmp.gt.f32.partialorder %v1165_v8, 0.0  ;;  %1246 = vmatmul.f32.gmra.mxu2 %v3713_v32  ;;  %1328 = vmatmul.f32.gmra.mxu0 %v3713_v32  ;;  %v351_v38 = vld [vmem:[#allocation2 + $0x3b0] sm:$0xff] }
 0x1e0   : > { %v3693_v45 = vpop.eup %2662  ;;  %2664 = vrsqrt.f32 %v3684_v1  ;;  %v3715_v58 = vadd.f32 %v959_v37, %v919_v13  ;;  %v1197_v20 = vmul.f32 0.01, %v1165_v8  ;;  %vm1069_vm10 = vweird.f32 %v3680_v10 }
 0x1e1   : > { %v1064_v30 = vmul.f32 %v3680_v10, %v1063_v21  ;;  %v1093_v33 = vmul.f32 %v3693_v45, %v3640_v47  ;;  %v1051_v26 = vsel %vm3701_vm7, %v3626_v4, %v1047_v43  ;;  %v1077_v40 = vmul.f32 %v3634_v11, %v1076_v16  ;;  %vm1070_vm13 = vmor %vm1068_vm5, %vm1069_vm10  ;;  %v327_v16 = vld [vmem:[#allocation2 + $0x2f0] sm:$0xff] }
 0x1e2   : > { %2666 = vrsqrt.f32 %v3715_v58  ;;  %v1146_v49 = vmul.f32 %v3511_v54, %v1128_v27  ;;  %v3724_v17 = vsel %vm1181_vm9, %v1165_v8, %v1197_v20  ;;  %v1149_v55 = vmul.f32 %v3481_v15, %v1131_v39  ;;  %v359_v21 = vld [vmem:[#allocation2 + $0x3f0] sm:$0xff]  ;;  %1454 = vmatpush.msra.mxu2 %v327_v16  ;;  %v354_v16 = vld [vmem:[#allocation2 + $0x3c8] sm:$0xff] }
 0x1e3   : > { %v1065_v42 = vmul.f32 0.5, %v1064_v30  ;;  %v1094_v50 = vmul.f32 %v3693_v45, %v1093_v33  ;;  %v836_v29 = vpop.f32.mrf.mxu2  ;;  %vm1099_vm12 = vweird.f32 %v3693_v45  ;;  %1290 = vmatmul.f32.gmra.mxu3 %v3724_v17  ;;  %1372 = vmatmul.f32.gmra.mxu1 %v3724_v17  ;;  %v1130_v63 = vmul.f32 %v1051_v26, %v3440_v57  ;;  %v323_v26 = vld [vmem:[#allocation2 + $0x2d0] sm:$0xff] }
 0x1e4   : > { %v837_v4 = vadd.f32 1e-05, %v836_v29  ;;  %v1164_v62 = vadd.f32 %v3516_v3, %v1146_v49  ;;  %v1081_v35 = vsel %vm3733_vm11, %v3634_v11, %v1077_v40  ;;  %vm1088_vm14 = vweird.f32 %v3684_v1  ;;  %vm3766_vm0 = vmor %vm1098_vm8, %vm1099_vm12  ;;  %1495 = vmatpush.msra.mxu3 %v359_v21  ;;  %v360_v40 = vld [vmem:[#allocation2 + $0x3f8] sm:$0xff]  ;;  %1455 = vmatpush.msra.mxu2 %v325_v24  ;;  %v326_v49 = vld [vmem:[#allocation2 + $0x2e8] sm:$0xff] }
 0x1e5   : > { %v1066_v52 = vsub.f32 1.5, %v1065_v42  ;;  %v1095_v53 = vmul.f32 0.5, %v1094_v50  ;;  %v1167_v23 = vadd.f32 %v3485_v25, %v1149_v55  ;;  %v1133_v12 = vmul.f32 %v1081_v35, %v3445_v2  ;;  %v358_v55 = vld [vmem:[#allocation2 + $0x3e8] sm:$0xff]  ;;  %1577 = vmatpush.msra.mxu1 %v360_v40  ;;  %1537 = vmatpush.msra.mxu0 %v326_v49  ;;  %v349_v24 = vld [vmem:[#allocation2 + $0x3a0] sm:$0xff] }
 0x1e6   : > { %v3727_v18 = vpop.eup %2664  ;;  %v3740_v61 = vadd.f32 %v877_v14, %v837_v4  ;;  %vm1180_vm15 = vcmp.gt.f32.partialorder %v1164_v62, 0.0  ;;  %v1196_v57 = vmul.f32 0.01, %v1164_v62  ;;  %v355_v4 = vld [vmem:[#allocation2 + $0x3d0] sm:$0xff]  ;;  %v321_v14 = vld [vmem:[#allocation2 + $0x2c0] sm:$0xff]  ;;  %1456 = vmatpush.msra.mxu2 %v323_v26  ;;  %vm1118_vm7 = vweird.f32 %v3715_v58 }
 0x1e7   : > { %v1067_v48 = vmul.f32 %v3680_v10, %v1066_v52  ;;  %v1096_v0 = vsub.f32 1.5, %v1095_v53  ;;  %v1083_v6 = vmul.f32 %v3727_v18, %v3684_v1  ;;  %vm1089_vm1 = vweird.f32 %v3727_v18  ;;  %v353_v1 = vld [vmem:[#allocation2 + $0x3c0] sm:$0xff]  ;;  %1578 = vmatpush.msra.mxu1 %v358_v55 }
 0x1e8   : > { %2668 = vrsqrt.f32 %v3740_v61  ;;  %v3760_v60 = vpop.eup %2666  ;;  %v3770_v31 = vsel %vm1180_vm15, %v1164_v62, %v1196_v57  ;;  %vm1183_vm2 = vcmp.gt.f32.partialorder %v1167_v23, 0.0  ;;  %v1199_v2 = vmul.f32 0.01, %v1167_v23  ;;  %vm1090_vm5 = vmor %vm1088_vm14, %vm1089_vm1  ;;  %v324_v57 = vld [vmem:[#allocation2 + $0x2d8] sm:$0xff]  ;;  %1457 = vmatpush.msra.mxu2 %v321_v14  ;;  %v313_v40 = vld [vmem:[#allocation2 + $0x280] sm:$0xff] }
 0x1e9   : > { %v1071_v7 = vsel %vm1070_vm13, %v3680_v10, %v1067_v48  ;;  %v1097_v11 = vmul.f32 %v3693_v45, %v1096_v0  ;;  %v1084_v9 = vmul.f32 %v3727_v18, %v1083_v6  ;;  %v1148_v10 = vmul.f32 %v3511_v54, %v1130_v63  ;;  %1249 = vmatmul.f32.gmra.mxu2 %v3770_v31  ;;  %v346_v14 = vld [vmem:[#allocation2 + $0x388] sm:$0xff] }
 0x1ea   : > { %v1132_v13 = vmul.f32 %v1071_v7, %v3450_v34  ;;  %v1113_v47 = vmul.f32 %v3760_v60, %v3715_v58  ;;  %1331 = vmatmul.f32.gmra.mxu0 %v3770_v31  ;;  %v1151_v27 = vmul.f32 %v3481_v15, %v1133_v12  ;;  %v3791_v50 = vsel %vm1183_vm2, %v1167_v23, %v1199_v2  ;;  %v320_v2 = vld [vmem:[#allocation2 + $0x2b8] sm:$0xff] }
 0x1eb   : > { %v1101_v8 = vsel %vm3766_vm0, %v3693_v45, %v1097_v11  ;;  %v1085_v43 = vmul.f32 0.5, %v1084_v9  ;;  %v1166_v34 = vadd.f32 %v3516_v3, %v1148_v10  ;;  %v357_v45 = vld [vmem:[#allocation2 + $0x3e0] sm:$0xff]  ;;  %vm1119_vm4 = vweird.f32 %v3760_v60  ;;  %1293 = vmatmul.f32.gmra.mxu3 %v3791_v50  ;;  %1375 = vmatmul.f32.gmra.mxu1 %v3791_v50  ;;  %v319_v11 = vld [vmem:[#allocation2 + $0x2b0] sm:$0xff]  ;;  %v356_v9 = vld [vmem:[#allocation2 + $0x3d8] sm:$0xff] }
 0x1ec   : > { %v1114_v33 = vmul.f32 %v3760_v60, %v1113_v47  ;;  %v1150_v37 = vmul.f32 %v3511_v54, %v1132_v13  ;;  %v1135_v39 = vmul.f32 %v1101_v8, %v3455_v51  ;;  %v1169_v29 = vadd.f32 %v3485_v25, %v1151_v27  ;;  %1496 = vmatpush.msra.mxu3 %v357_v45  ;;  %v322_v10 = vld [vmem:[#allocation2 + $0x2c8] sm:$0xff]  ;;  %vm1120_vm8 = vmor %vm1118_vm7, %vm1119_vm4  ;;  %v317_v47 = vld [vmem:[#allocation2 + $0x2a0] sm:$0xff] }
 0x1ed   : > { %v1086_v30 = vsub.f32 1.5, %v1085_v43  ;;  %vm1182_vm3 = vcmp.gt.f32.partialorder %v1166_v34, 0.0  ;;  %v1198_v20 = vmul.f32 0.01, %v1166_v34  ;;  %1538 = vmatpush.msra.mxu0 %v324_v57  ;;  %1458 = vmatpush.msra.mxu2 %v319_v11  ;;  %vm1108_vm11 = vweird.f32 %v3740_v61  ;;  %v352_v27 = vld [vmem:[#allocation2 + $0x3b8] sm:$0xff]  ;;  %v339_v57 = vld [vmem:[#allocation2 + $0x350] sm:$0xff] }
 0x1ee   : > { %v3788_v42 = vpop.eup %2668  ;;  %v1115_v53 = vmul.f32 0.5, %v1114_v33  ;;  %vm1185_vm6 = vcmp.gt.f32.partialorder %v1169_v29, 0.0  ;;  %v1201_v62 = vmul.f32 0.01, %v1169_v29  ;;  %v1168_v63 = vadd.f32 %v3516_v3, %v1150_v37  ;;  %1497 = vmatpush.msra.mxu3 %v355_v4  ;;  %1579 = vmatpush.msra.mxu1 %v356_v9  ;;  %v347_v33 = vld [vmem:[#allocation2 + $0x390] sm:$0xff]  ;;  %v318_v37 = vld [vmem:[#allocation2 + $0x2a8] sm:$0xff] }
 0x1ef   : > { %v1087_v52 = vmul.f32 %v3727_v18, %v1086_v30  ;;  %v1103_v51 = vmul.f32 %v3788_v42, %v3740_v61  ;;  %v3805_v59 = vsel %vm1182_vm3, %v1166_v34, %v1198_v20  ;;  %v1153_v6 = vmul.f32 %v3481_v15, %v1135_v39  ;;  %1539 = vmatpush.msra.mxu0 %v322_v10  ;;  %v350_v20 = vld [vmem:[#allocation2 + $0x3a8] sm:$0xff]  ;;  %v305_v11 = vld [vmem:[#allocation2 + $0x240] sm:$0xff] }
 0x1f0   : > { %4766 = vst [vmem:[#allocation10_spill] sm:$0xff] %v3805_v59  ;;  %v1116_v48 = vsub.f32 1.5, %v1115_v53  ;;  %v1200_v12 = vmul.f32 0.01, %v1168_v63  ;;  %1498 = vmatpush.msra.mxu3 %v353_v1  ;;  %vm1109_vm9 = vweird.f32 %v3788_v42  ;;  %vm1184_vm10 = vcmp.gt.f32.partialorder %v1168_v63, 0.0  ;;  %1459 = vmatpush.msra.mxu2 %v317_v47  ;;  %v314_v53 = vld [vmem:[#allocation2 + $0x288] sm:$0xff] }
 0x1f1   : > { %v1091_v35 = vsel %vm1090_vm5, %v3727_v18, %v1087_v52  ;;  %v1104_v0 = vmul.f32 %v3788_v42, %v1103_v51  ;;  %1252 = vmatmul.f32.gmra.mxu2 %v3805_v59  ;;  %v1171_v13 = vadd.f32 %v3485_v25, %v1153_v6  ;;  %vm1110_vm12 = vmor %vm1108_vm11, %vm1109_vm9  ;;  %1580 = vmatpush.msra.mxu1 %v354_v16  ;;  %v343_v52 = vld [vmem:[#allocation2 + $0x370] sm:$0xff]  ;;  %v309_v51 = vld [vmem:[#allocation2 + $0x260] sm:$0xff] }
 0x1f2   : > { %v1134_v7 = vmul.f32 %v1091_v35, %v3460_v19  ;;  %v1117_v23 = vmul.f32 %v3760_v60, %v1116_v48  ;;  %1334 = vmatmul.f32.gmra.mxu0 %v3805_v59  ;;  %v3819_v19 = vsel %vm1185_vm6, %v1169_v29, %v1201_v62  ;;  %1499 = vmatpush.msra.mxu3 %v351_v38  ;;  %v316_v29 = vld [vmem:[#allocation2 + $0x298] sm:$0xff]  ;;  %v307_v48 = vld [vmem:[#allocation2 + $0x250] sm:$0xff]  ;;  %v342_v9 = vld [vmem:[#allocation2 + $0x368] sm:$0xff] }
 0x1f3   : > { %v1105_v18 = vmul.f32 0.5, %v1104_v0  ;;  %4767 = vst [vmem:[#allocation11_spill] sm:$0xff] %v3819_v19  ;;  %1296 = vmatmul.f32.gmra.mxu3 %v3819_v19  ;;  %1378 = vmatmul.f32.gmra.mxu1 %v3819_v19  ;;  %v3833_v45 = vsel %vm1184_vm10, %v1168_v63, %v1200_v12  ;;  %vm1187_vm13 = vcmp.gt.f32.partialorder %v1171_v13, 0.0  ;;  %v341_v63 = vld [vmem:[#allocation2 + $0x360] sm:$0xff]  ;;  %v312_v35 = vld [vmem:[#allocation2 + $0x278] sm:$0xff]  ;;  %v338_v10 = vld [vmem:[#allocation2 + $0x348] sm:$0xff] }
 0x1f4   : > { %v1152_v8 = vmul.f32 %v3511_v54, %v1134_v7  ;;  %v1121_v58 = vsel %vm1120_vm8, %v3760_v60, %v1117_v23  ;;  %v315_v60 = vld [vmem:[#allocation2 + $0x290] sm:$0xff]  ;;  %4768 = vst [vmem:[#allocation12_spill] sm:$0xff] %v3833_v45  ;;  %1500 = vmatpush.msra.mxu3 %v349_v24  ;;  %1540 = vmatpush.msra.mxu0 %v320_v2  ;;  %v344_v0 = vld [vmem:[#allocation2 + $0x378] sm:$0xff]  ;;  %v310_v7 = vld [vmem:[#allocation2 + $0x268] sm:$0xff] }
 0x1f5   : > { %v1106_v43 = vsub.f32 1.5, %v1105_v18  ;;  %v1137_v21 = vmul.f32 %v1121_v58, %v3465_v22  ;;  %v1203_v22 = vmul.f32 0.01, %v1171_v13  ;;  %1460 = vmatpush.msra.mxu2 %v315_v60  ;;  %1581 = vmatpush.msra.mxu1 %v352_v27  ;;  %v337_v23 = vld [vmem:[#allocation2 + $0x340] sm:$0xff]  ;;  %v308_v18 = vld [vmem:[#allocation2 + $0x258] sm:$0xff]  ;;  %v303_v12 = vld [vmem:[#allocation2 + $0x230] sm:$0xff] }
 0x1f6   : > { %v1170_v28 = vadd.f32 %v3516_v3, %v1152_v8  ;;  %1501 = vmatpush.msra.mxu3 %v347_v33  ;;  %1541 = vmatpush.msra.mxu0 %v318_v37  ;;  %v340_v38 = vld [vmem:[#allocation2 + $0x358] sm:$0xff]  ;;  %v306_v8 = vld [vmem:[#allocation2 + $0x248] sm:$0xff]  ;;  %v333_v47 = vld [vmem:[#allocation2 + $0x320] sm:$0xff] }
 0x1f7   : > { %v1107_v34 = vmul.f32 %v3788_v42, %v1106_v43  ;;  %v1155_v30 = vmul.f32 %v3481_v15, %v1137_v21  ;;  %v345_v15 = vld [vmem:[#allocation2 + $0x380] sm:$0xff]  ;;  %1461 = vmatpush.msra.mxu2 %v313_v40  ;;  %1582 = vmatpush.msra.mxu1 %v350_v20  ;;  %v336_v58 = vld [vmem:[#allocation2 + $0x338] sm:$0xff]  ;;  %v334_v16 = vld [vmem:[#allocation2 + $0x328] sm:$0xff] }
 0x1f8   : > { %v1202_v4 = vmul.f32 0.01, %v1170_v28  ;;  %vm1186_vm14 = vcmp.gt.f32.partialorder %v1170_v28, 0.0  ;;  %1502 = vmatpush.msra.mxu3 %v345_v15  ;;  %1542 = vmatpush.msra.mxu0 %v316_v29  ;;  %v301_v43 = vld [vmem:[#allocation2 + $0x220] sm:$0xff]  ;;  %v331_v21 = vld [vmem:[#allocation2 + $0x310] sm:$0xff]  ;;  %v332_v24 = vld [vmem:[#allocation2 + $0x318] sm:$0xff] }
 0x1f9   : > { %v1111_v61 = vsel %vm1110_vm12, %v3788_v42, %v1107_v34  ;;  %v1173_v39 = vadd.f32 %v3485_v25, %v1155_v30  ;;  %1255 = vmatmul.f32.gmra.mxu2 %v3833_v45  ;;  %v3842_v42 = vsel %vm1187_vm13, %v1171_v13, %v1203_v22  ;;  %v348_v25 = vld [vmem:[#allocation2 + $0x398] sm:$0xff]  ;;  %v335_v13 = vld [vmem:[#allocation2 + $0x330] sm:$0xff]  ;;  %v329_v34 = vld [vmem:[#allocation2 + $0x300] sm:$0xff] }
 0x1fa   : > { %v1136_v26 = vmul.f32 %v1111_v61, %v3470_v44  ;;  %1337 = vmatmul.f32.gmra.mxu0 %v3833_v45  ;;  %4769 = vst [vmem:[#allocation13_spill] sm:$0xff] %v3842_v42  ;;  %v311_v44 = vld [vmem:[#allocation2 + $0x270] sm:$0xff]  ;;  %v3847_v55 = vsel %vm1186_vm14, %v1170_v28, %v1202_v4  ;;  %1583 = vmatpush.msra.mxu1 %v348_v25  ;;  %v304_v2 = vld [vmem:[#allocation2 + $0x238] sm:$0xff]  ;;  %v330_v60 = vld [vmem:[#allocation2 + $0x308] sm:$0xff] }
 0x1fb   : > { %1299 = vmatmul.f32.gmra.mxu3 %v3842_v42  ;;  %1381 = vmatmul.f32.gmra.mxu1 %v3842_v42  ;;  %4770 = vst [vmem:[#allocation14_spill] sm:$0xff] %v3847_v55  ;;  %vm1189_vm15 = vcmp.gt.f32.partialorder %v1173_v39, 0.0  ;;  %v299_v27 = vld [vmem:[#allocation2 + $0x210] sm:$0xff]  ;;  %v302_v22 = vld [vmem:[#allocation2 + $0x228] sm:$0xff]  ;;  %v297_v28 = vld [vmem:[#allocation2 + $0x200] sm:$0xff] }
 0x1fc   : > { %v1154_v49 = vmul.f32 %v3511_v54, %v1136_v26  ;;  %v1205_v54 = vmul.f32 0.01, %v1173_v39  ;;  %1462 = vmatpush.msra.mxu2 %v311_v44  ;;  %1503 = vmatpush.msra.mxu3 %v343_v52  ;;  %v3860_v30 = vld [vmem:[#allocation2 + $0x7f0] sm:$0xff]  ;;  %v3863_v61 = vld [vmem:[#allocation2 + $0x7f8] sm:$0xff]  ;;  %v3866_v37 = vld [vmem:[#allocation2 + $0x7e0] sm:$0xff] }
 0x1fd   : > { %1543 = vmatpush.msra.mxu0 %v314_v53  ;;  %1584 = vmatpush.msra.mxu1 %v346_v14  ;;  %v300_v33 = vld [vmem:[#allocation2 + $0x218] sm:$0xff]  ;;  %v298_v26 = vld [vmem:[#allocation2 + $0x208] sm:$0xff]  ;;  %v3872_v40 = vld [vmem:[#allocation2 + $0x6f0] sm:$0xff] }
 0x1fe   : > { %v1172_v62 = vadd.f32 %v3516_v3, %v1154_v49  ;;  %1463 = vmatpush.msra.mxu2 %v309_v51  ;;  %v3852_v6 = vsel %vm1189_vm15, %v1173_v39, %v1205_v54  ;;  %1504 = vmatpush.msra.mxu3 %v341_v63  ;;  %v3869_v39 = vld [vmem:[#allocation2 + $0x7e8] sm:$0xff]  ;;  %v3875_v20 = vld [vmem:[#allocation2 + $0x7d0] sm:$0xff]  ;;  %v3878_v15 = vld [vmem:[#allocation2 + $0x7d8] sm:$0xff] }
 0x1ff   : > { %4771 = vst [vmem:[#allocation15_spill] sm:$0xff] %v3852_v6  ;;  %1544 = vmatpush.msra.mxu0 %v312_v35  ;;  %1585 = vmatpush.msra.mxu1 %v344_v0  ;;  %v3881_v29 = vld [vmem:[#allocation2 + $0x6e0] sm:$0xff]  ;;  %v3884_v4 = vld [vmem:[#allocation2 + $0x6f8] sm:$0xff]  ;;  %v3890_v44 = vld [vmem:[#allocation2 + $0x7c8] sm:$0xff] }
 0x200   : > { %v1204_v1 = vmul.f32 0.01, %v1172_v62  ;;  %vm1188_vm0 = vcmp.gt.f32.partialorder %v1172_v62, 0.0  ;;  %1464 = vmatpush.msra.mxu2 %v307_v48  ;;  %1505 = vmatpush.msra.mxu3 %v339_v57  ;;  %v3887_v49 = vld [vmem:[#allocation2 + $0x7c0] sm:$0xff]  ;;  %v3893_v25 = vld [vmem:[#allocation2 + $0x6d0] sm:$0xff]  ;;  %v3896_v52 = vld [vmem:[#allocation2 + $0x6e8] sm:$0xff] }
 0x201   : > { %1258 = vmatmul.f32.gmra.mxu2 %v3847_v55  ;;  %1545 = vmatpush.msra.mxu0 %v310_v7  ;;  %v3899_v53 = vld [vmem:[#allocation2 + $0x7b0] sm:$0xff]  ;;  %v3902_v51 = vld [vmem:[#allocation2 + $0x7b8] sm:$0xff]  ;;  %v3905_v14 = vld [vmem:[#allocation2 + $0x6c0] sm:$0xff] }
 0x202   : > { %1340 = vmatmul.f32.gmra.mxu0 %v3847_v55  ;;  %v3856_v3 = vsel %vm1188_vm0, %v1172_v62, %v1204_v1  ;;  %1465 = vmatpush.msra.mxu2 %v305_v11  ;;  %v3908_v54 = vld [vmem:[#allocation2 + $0x6d8] sm:$0xff]  ;;  %v3911_v63 = vld [vmem:[#allocation2 + $0x7a0] sm:$0xff]  ;;  %v3914_v35 = vld [vmem:[#allocation2 + $0x7a8] sm:$0xff] }
 0x203   : > { %1302 = vmatmul.f32.gmra.mxu3 %v3852_v6  ;;  %1384 = vmatmul.f32.gmra.mxu1 %v3852_v6  ;;  %4772 = vst [vmem:[#allocation16_spill] sm:$0xff] %v3856_v3  ;;  %v3920_v48 = vld [vmem:[%s4705_s3 + $0x8] sm:$0xff]  ;;  %v3925_v1 = vld [vmem:[#allocation2 + $0x6b0] sm:$0xff]  ;;  %v3934_v11 = vld [vmem:[#allocation2 + $0x798] sm:$0xff] }
 0x204   : > { %1586 = vmatpush.msra.mxu1 %v342_v9  ;;  %1506 = vmatpush.msra.mxu3 %v337_v23  ;;  %4773 = vst [vmem:[#allocation17_spill] sm:$0xff] %v3920_v48  ;;  %v3923_v0 = vperm.slane %v3920_v48, 3  ;;  %v3928_v57 = vld [vmem:[#allocation2 + $0x6c8] sm:$0xff]  ;;  %v3931_v7 = vld [vmem:[#allocation2 + $0x790] sm:$0xff]  ;;  %v3937_v9 = vld [vmem:[#allocation2 + $0x6a0] sm:$0xff] }
 0x205   : > { %1546 = vmatpush.msra.mxu0 %v308_v18  ;;  %1466 = vmatpush.msra.mxu2 %v303_v12  ;;  %v3940_v23 = vld [vmem:[#allocation2 + $0x6b8] sm:$0xff]  ;;  %v4002_v42 = vld [vmem:[#allocation2 + $0x740] sm:$0xff]  ;;  %v4005_v45 = vld [vmem:[#allocation2 + $0x748] sm:$0xff] }
 0x206   : > { %1587 = vmatpush.msra.mxu1 %v340_v38  ;;  %1507 = vmatpush.msra.mxu3 %v335_v13  ;;  %v3943_v38 = vld [vmem:[#allocation2 + $0x780] sm:$0xff]  ;;  %v3950_v13 = vld [vmem:[#allocation2 + $0x690] sm:$0xff]  ;;  %v3998_v6 = vld [vmem:[#allocation2 + $0x678] sm:$0xff]  ;;  %4777 = vst [vmem:[#allocation21_spill] sm:$0xff] %v4002_v42 }
 0x207   : > { %1547 = vmatpush.msra.mxu0 %v306_v8  ;;  %1467 = vmatpush.msra.mxu2 %v301_v43  ;;  %v3953_v8 = vld [vmem:[#allocation2 + $0x6a8] sm:$0xff]  ;;  %v3956_v43 = vld [vmem:[#allocation2 + $0x770] sm:$0xff]  ;;  %4778 = vst [vmem:[#allocation22_spill] sm:$0xff] %v4005_v45 }
 0x208   : > { %1588 = vmatpush.msra.mxu1 %v338_v10  ;;  %1508 = vmatpush.msra.mxu3 %v333_v47  ;;  %v3946_v10 = vld [vmem:[#allocation2 + $0x788] sm:$0xff]  ;;  %v3959_v47 = vld [vmem:[#allocation2 + $0x778] sm:$0xff]  ;;  %v4017_v19 = vld [vmem:[#allocation2 + $0x730] sm:$0xff] }
 0x209   : > { %1261 = vmatmul.f32.gmra.mxu2 %v3856_v3  ;;  %1548 = vmatpush.msra.mxu0 %v304_v2  ;;  %v3970_v2 = vld [vmem:[#allocation2 + $0x680] sm:$0xff]  ;;  %4780 = vst [vmem:[#allocation24_spill] sm:$0xff] %v4017_v19 }
 0x20a   : > { %1343 = vmatmul.f32.gmra.mxu0 %v3856_v3  ;;  %1589 = vmatpush.msra.mxu1 %v336_v58  ;;  %v3995_v3 = vld [vmem:[#allocation2 + $0x660] sm:$0xff] }
 0x20b   : > { %1509 = vmatpush.msra.mxu3 %v331_v21  ;;  %1468 = vmatpush.msra.mxu2 %v299_v27  ;;  %v3965_v21 = vld [vmem:[%s4705_s3] sm:$0xff]  ;;  %v3979_v27 = vld [vmem:[#allocation2 + $0x768] sm:$0xff] }
 0x20c   : > { %1590 = vmatpush.msra.mxu1 %v334_v16  ;;  %1549 = vmatpush.msra.mxu0 %v302_v22  ;;  %4774 = vst [vmem:[#allocation18_spill] sm:$0xff] %v3965_v21 }
 0x20d   : > { %1510 = vmatpush.msra.mxu3 %v329_v34  ;;  %1469 = vmatpush.msra.mxu2 %v297_v28  ;;  %v3973_v34 = vld [vmem:[#allocation2 + $0x698] sm:$0xff]  ;;  %4775 = vst [vmem:[#allocation19_spill] sm:$0xff] %v3979_v27  ;;  %v3982_v28 = vld [vmem:[#allocation2 + $0x670] sm:$0xff] }
 0x20e   : > { %1591 = vmatpush.msra.mxu1 %v332_v24  ;;  %1550 = vmatpush.msra.mxu0 %v300_v33  ;;  %v3968_v24 = vperm.slane %v3965_v21, 3  ;;  %v3985_v33 = vld [vmem:[#allocation2 + $0x688] sm:$0xff] }
 0x20f   : > { %1659 = vmatpush.msrb.mxu3 %v3860_v30  ;;  %1618 = vmatpush.msrb.mxu2 %v3872_v40 }
 0x210   : > { %1592 = vmatpush.msra.mxu1 %v330_v60  ;;  %1551 = vmatpush.msra.mxu0 %v298_v26  ;;  %v3976_v60 = vld [vmem:[#allocation2 + $0x760] sm:$0xff] }
 0x211   : > { %1660 = vmatpush.msrb.mxu3 %v3866_v37  ;;  %1619 = vmatpush.msrb.mxu2 %v3881_v29 }
 0x212   : > { %1741 = vmatpush.msrb.mxu1 %v3863_v61  ;;  %1700 = vmatpush.msrb.mxu0 %v3884_v4 }
 0x213   : > { %1661 = vmatpush.msrb.mxu3 %v3875_v20  ;;  %1620 = vmatpush.msrb.mxu2 %v3893_v25 }
 0x214   : > { %1742 = vmatpush.msrb.mxu1 %v3869_v39  ;;  %1701 = vmatpush.msrb.mxu0 %v3896_v52 }
 0x215   : > { %1662 = vmatpush.msrb.mxu3 %v3887_v49  ;;  %1621 = vmatpush.msrb.mxu2 %v3905_v14 }
 0x216   : > { %1743 = vmatpush.msrb.mxu1 %v3878_v15  ;;  %1702 = vmatpush.msrb.mxu0 %v3908_v54 }
 0x217   : > { %1663 = vmatpush.msrb.mxu3 %v3899_v53  ;;  %1622 = vmatpush.msrb.mxu2 %v3925_v1 }
 0x218   : > { %1744 = vmatpush.msrb.mxu1 %v3890_v44  ;;  %1703 = vmatpush.msrb.mxu0 %v3928_v57 }
 0x219   : > { %1664 = vmatpush.msrb.mxu3 %v3911_v63  ;;  %1623 = vmatpush.msrb.mxu2 %v3937_v9 }
 0x21a   : > { %1745 = vmatpush.msrb.mxu1 %v3902_v51  ;;  %1704 = vmatpush.msrb.mxu0 %v3940_v23 }
 0x21b   : > { %1665 = vmatpush.msrb.mxu3 %v3931_v7  ;;  %1624 = vmatpush.msrb.mxu2 %v3950_v13 }
 0x21c   : > { %1746 = vmatpush.msrb.mxu1 %v3914_v35  ;;  %1705 = vmatpush.msrb.mxu0 %v3953_v8 }
 0x21d   : > { %1666 = vmatpush.msrb.mxu3 %v3943_v38  ;;  %1625 = vmatpush.msrb.mxu2 %v3970_v2 }
 0x21e   : > { %1747 = vmatpush.msrb.mxu1 %v3934_v11  ;;  %1706 = vmatpush.msrb.mxu0 %v3973_v34 }
 0x21f   : > { %1667 = vmatpush.msrb.mxu3 %v3956_v43  ;;  %1626 = vmatpush.msrb.mxu2 %v3982_v28 }
 0x220   : > { %1748 = vmatpush.msrb.mxu1 %v3946_v10  ;;  %1707 = vmatpush.msrb.mxu0 %v3985_v33 }
 0x221   : > { %1668 = vmatpush.msrb.mxu3 %v3976_v60  ;;  %1627 = vmatpush.msrb.mxu2 %v3995_v3 }
 0x222   : > { %1749 = vmatpush.msrb.mxu1 %v3959_v47  ;;  %1708 = vmatpush.msrb.mxu0 %v3998_v6 }
 0x224   : > { %1750 = vmatpush.msrb.mxu1 %v3979_v27  ;;  %v4027_v27 = vld [vmem:[#allocation2 + $0x630] sm:$0xff] }
 0x242   : > { %v1364_v62 = vpop.f32.mrf.mxu1 }
 0x248   : > { %v1323_v18 = vpop.f32.mrf.mxu0  ;;  %v1282_v58 = vpop.f32.mrf.mxu3 }
 0x249   : > { %v1324_v12 = vadd.f32 %v1323_v18, %v3923_v0  ;;  %v3988_v18 = vld [vmem:[#allocation2 + $0x750] sm:$0xff] }
 0x24a   : > { %1669 = vmatpush.msrb.mxu3 %v3988_v18 }
 0x24b   : > { %v1365_v16 = vadd.f32 %v1364_v62, %v1324_v12  ;;  %v3991_v12 = vld [vmem:[#allocation2 + $0x758] sm:$0xff] }
 0x24c   : > { %v1367_v26 = vpop.f32.mrf.mxu1  ;;  %4776 = vst [vmem:[#allocation20_spill] sm:$0xff] %v3991_v12  ;;  %1751 = vmatpush.msrb.mxu1 %v3991_v12  ;;  %1670 = vmatpush.msrb.mxu3 %v4002_v42  ;;  %v4023_v12 = vld [vmem:[#allocation2 + $0x738] sm:$0xff]  ;;  %v4030_v42 = vld [vmem:[#allocation2 + $0x720] sm:$0xff] }
 0x24d   : > { %vm1389_vm1 = vcmp.gt.f32.partialorder %v1365_v16, 0.0  ;;  %v1405_v22 = vmul.f32 0.01, %v1365_v16  ;;  %4782 = vst [vmem:[#allocation26_spill] sm:$0xff] %v4023_v12 }
 0x24e   : > { %v1241_v62 = vpop.f32.mrf.mxu2  ;;  %1752 = vmatpush.msrb.mxu1 %v4005_v45  ;;  %1671 = vmatpush.msrb.mxu3 %v4017_v19  ;;  %v4020_v45 = vld [vmem:[#allocation2 + $0x658] sm:$0xff]  ;;  %4783 = vst [vmem:[#allocation27_spill] sm:$0xff] %v4030_v42 }
 0x24f   : > { %v1421_v21 = vsel %vm1389_vm1, %v1365_v16, %v1405_v22  ;;  %v1242_v48 = vadd.f32 %v1241_v62, %v3968_v24  ;;  %v4008_v22 = vld [vmem:[#allocation2 + $0x650] sm:$0xff]  ;;  %v4011_v62 = vld [vmem:[#allocation2 + $0x668] sm:$0xff]  ;;  %4781 = vst [vmem:[#allocation25_spill] sm:$0xff] %v4020_v45 }
 0x250   : > { %v1437_v55 = vadd.f32 %v1421_v21, %v3521_v41  ;;  %1628 = vmatpush.msrb.mxu2 %v4008_v22  ;;  %4779 = vst [vmem:[#allocation23_spill] sm:$0xff] %v4011_v62  ;;  %1709 = vmatpush.msrb.mxu0 %v4011_v62  ;;  %v4014_v41 = vld [vmem:[#allocation2 + $0x640] sm:$0xff]  ;;  %v4034_v62 = vld [vmem:[#allocation2 + $0x648] sm:$0xff] }
 0x251   : > { %v1283_v16 = vadd.f32 %v1282_v58, %v1242_v48  ;;  %1753 = vmatpush.msrb.mxu1 %v4023_v12  ;;  %1672 = vmatpush.msrb.mxu3 %v4030_v42  ;;  %4784 = vst [vmem:[#allocation28_spill] sm:$0xff] %v4034_v62  ;;  %v4046_v12 = vld [vmem:[#allocation2 + $0x718] sm:$0xff] }
 0x252   : > { %1511 = vmatmul.f32.vlgmr.msra.gmra.mxu3 %v1437_v55  ;;  %1593 = vmatmul.f32.vlgmr.msra.gmra.mxu1 %v1437_v55  ;;  %v1285_v48 = vpop.f32.mrf.mxu3  ;;  %v1326_v58 = vpop.f32.mrf.mxu0  ;;  %4788 = vst [vmem:[#allocation32_spill] sm:$0xff] %v4046_v12 }
 0x253   : > { %vm1388_vm2 = vcmp.gt.f32.partialorder %v1283_v16, 0.0  ;;  %v1404_v21 = vmul.f32 0.01, %v1283_v16  ;;  %1629 = vmatpush.msrb.mxu2 %v4014_v41  ;;  %1710 = vmatpush.msrb.mxu0 %v4020_v45  ;;  %v1327_v59 = vadd.f32 %v1326_v58, %v3923_v0  ;;  %v4037_v45 = vld [vmem:[#allocation2 + $0x728] sm:$0xff]  ;;  %v4043_v58 = vld [vmem:[#allocation2 + $0x710] sm:$0xff] }
 0x254   : > { %4785 = vst [vmem:[#allocation29_spill] sm:$0xff] %v4037_v45  ;;  %1754 = vmatpush.msrb.mxu1 %v4037_v45  ;;  %1673 = vmatpush.msrb.mxu3 %v4043_v58  ;;  %v4049_v45 = vld [vmem:[#allocation2 + $0x610] sm:$0xff] }
 0x255   : > { %v1420_v55 = vsel %vm1388_vm2, %v1283_v16, %v1404_v21  ;;  %1630 = vmatpush.msrb.mxu2 %v4027_v27  ;;  %1711 = vmatpush.msrb.mxu0 %v4034_v62  ;;  %v1368_v16 = vadd.f32 %v1367_v26, %v1327_v59  ;;  %v4040_v21 = vld [vmem:[#allocation2 + $0x620] sm:$0xff]  ;;  %4787 = vst [vmem:[#allocation31_spill] sm:$0xff] %v4043_v58  ;;  %v4053_v26 = vld [vmem:[#allocation2 + $0x638] sm:$0xff]  ;;  %v4059_v62 = vld [vmem:[#allocation2 + $0x708] sm:$0xff] }
 0x256   : > { %v1436_v19 = vadd.f32 %v1420_v55, %v3571_v36  ;;  %4786 = vst [vmem:[#allocation30_spill] sm:$0xff] %v4040_v21  ;;  %1755 = vmatpush.msrb.mxu1 %v4046_v12  ;;  %v4056_v58 = vld [vmem:[#allocation2 + $0x700] sm:$0xff] }
 0x257   : > { %1631 = vmatpush.msrb.mxu2 %v4040_v21  ;;  %v1407_v55 = vmul.f32 0.01, %v1368_v16  ;;  %vm1391_vm3 = vcmp.gt.f32.partialorder %v1368_v16, 0.0  ;;  %4789 = vst [vmem:[#allocation33_spill] sm:$0xff] %v4049_v45  ;;  %1712 = vmatpush.msrb.mxu0 %v4053_v26  ;;  %v4062_v12 = vld [vmem:[#allocation2 + $0x600] sm:$0xff]  ;;  %v4066_v21 = vld [vmem:[#allocation2 + $0x628] sm:$0xff] }
 0x258   : > { %v1370_v42 = vpop.f32.mrf.mxu1  ;;  %1470 = vmatmul.f32.vlgmr.msra.gmra.mxu2 %v1436_v19  ;;  %1552 = vmatmul.f32.vlgmr.msra.gmra.mxu0 %v1436_v19  ;;  %v1244_v36 = vpop.f32.mrf.mxu2  ;;  %4790 = vst [vmem:[#allocation34_spill] sm:$0xff] %v4053_v26 }
 0x259   : > { %1632 = vmatpush.msrb.mxu2 %v4049_v45  ;;  %v1245_v59 = vadd.f32 %v1244_v36, %v3968_v24  ;;  %1674 = vmatpush.msrb.mxu3 %v4056_v58  ;;  %v1423_v19 = vsel %vm1391_vm3, %v1368_v16, %v1407_v55  ;;  %4791 = vst [vmem:[#allocation35_spill] sm:$0xff] %v4059_v62 }
 0x25a   : > { %1756 = vmatpush.msrb.mxu1 %v4059_v62  ;;  %v1439_v36 = vadd.f32 %v1423_v19, %v3590_v5  ;;  %1713 = vmatpush.msrb.mxu0 %v4066_v21 }
 0x25b   : > { %1633 = vmatpush.msrb.mxu2 %v4062_v12  ;;  %v1286_v45 = vadd.f32 %v1285_v48, %v1245_v59  ;;  %1855 = vmatpush.msra.mxu3 %v3860_v30  ;;  %v4073_v48 = vld [vmem:[#allocation2 + $0x618] sm:$0xff] }
 0x25c   : > { %v1329_v26 = vpop.f32.mrf.mxu0  ;;  %1937 = vmatpush.msra.mxu1 %v3863_v61  ;;  %1514 = vmatmul.f32.gmra.mxu3 %v1439_v36  ;;  %v4080_v61 = vld [vmem:[#allocation2 + $0x608] sm:$0xff] }
 0x25d   : > { %1814 = vmatpush.msra.mxu2 %v3872_v40  ;;  %v1406_v16 = vmul.f32 0.01, %v1286_v45  ;;  %v1330_v62 = vadd.f32 %v1329_v26, %v3923_v0  ;;  %1596 = vmatmul.f32.gmra.mxu1 %v1439_v36  ;;  %vm1390_vm4 = vcmp.gt.f32.partialorder %v1286_v45, 0.0 }
 0x25e   : > { %v1288_v55 = vpop.f32.mrf.mxu3  ;;  %1714 = vmatpush.msrb.mxu0 %v4073_v48  ;;  %1856 = vmatpush.msra.mxu3 %v3866_v37 }
 0x25f   : > { %1815 = vmatpush.msra.mxu2 %v3881_v29  ;;  %v1371_v59 = vadd.f32 %v1370_v42, %v1330_v62  ;;  %v1422_v19 = vsel %vm1390_vm4, %v1286_v45, %v1406_v16  ;;  %1938 = vmatpush.msra.mxu1 %v3869_v39 }
 0x260   : > { %v1373_v40 = vpop.f32.mrf.mxu1  ;;  %v1438_v30 = vadd.f32 %v1422_v19, %v3638_v46  ;;  %1715 = vmatpush.msrb.mxu0 %v4080_v61  ;;  %1857 = vmatpush.msra.mxu3 %v3875_v20  ;;  %v4795_v19 = vld [vmem:[#allocation10_spill] sm:$0xff] }
 0x261   : > { %1816 = vmatpush.msra.mxu2 %v3893_v25  ;;  %v1409_v26 = vmul.f32 0.01, %v1371_v59  ;;  %vm1393_vm5 = vcmp.gt.f32.partialorder %v1371_v59, 0.0  ;;  %1939 = vmatpush.msra.mxu1 %v3878_v15 }
 0x262   : > { %1896 = vmatpush.msra.mxu0 %v3884_v4  ;;  %v1247_v42 = vpop.f32.mrf.mxu2  ;;  %1473 = vmatmul.f32.gmra.mxu2 %v1438_v30 }
 0x263   : > { %1555 = vmatmul.f32.gmra.mxu0 %v1438_v30  ;;  %v1248_v45 = vadd.f32 %v1247_v42, %v3968_v24  ;;  %v1425_v37 = vsel %vm1393_vm5, %v1371_v59, %v1409_v26  ;;  %1817 = vmatpush.msra.mxu2 %v3905_v14  ;;  %v4796_v26 = vld [vmem:[#allocation25_spill] sm:$0xff] }
 0x264   : > { %1897 = vmatpush.msra.mxu0 %v3896_v52  ;;  %v1441_v29 = vadd.f32 %v1425_v37, %v3678_v56  ;;  %1858 = vmatpush.msra.mxu3 %v3887_v49  ;;  %v4799_v37 = vld [vmem:[#allocation30_spill] sm:$0xff] }
 0x265   : > { %v1289_v4 = vadd.f32 %v1288_v55, %v1248_v45  ;;  %1818 = vmatpush.msra.mxu2 %v3925_v1  ;;  %1940 = vmatpush.msra.mxu1 %v3890_v44  ;;  %v4793_v55 = vld [vmem:[#allocation21_spill] sm:$0xff]  ;;  %v4798_v45 = vld [vmem:[#allocation20_spill] sm:$0xff] }
 0x266   : > { %v1291_v25 = vpop.f32.mrf.mxu3  ;;  %1898 = vmatpush.msra.mxu0 %v3908_v54  ;;  %1517 = vmatmul.f32.gmra.mxu3 %v1441_v29 }
 0x267   : > { %v1332_v39 = vpop.f32.mrf.mxu0  ;;  %1599 = vmatmul.f32.gmra.mxu1 %v1441_v29  ;;  %v1408_v14 = vmul.f32 0.01, %v1289_v4  ;;  %vm1392_vm6 = vcmp.gt.f32.partialorder %v1289_v4, 0.0  ;;  %1859 = vmatpush.msra.mxu3 %v3899_v53 }
 0x268   : > { %v1333_v20 = vadd.f32 %v1332_v39, %v3923_v0  ;;  %1819 = vmatpush.msra.mxu2 %v3937_v9  ;;  %v1376_v49 = vpop.f32.mrf.mxu1  ;;  %1899 = vmatpush.msra.mxu0 %v3928_v57 }
 0x269   : > { %v1424_v52 = vsel %vm1392_vm6, %v1289_v4, %v1408_v14  ;;  %1860 = vmatpush.msra.mxu3 %v3911_v63  ;;  %1941 = vmatpush.msra.mxu1 %v3902_v51  ;;  %v4800_v4 = vld [vmem:[#allocation11_spill] sm:$0xff]  ;;  %v4801_v14 = vld [vmem:[#allocation22_spill] sm:$0xff] }
 0x26a   : > { %v1374_v62 = vadd.f32 %v1373_v40, %v1333_v20  ;;  %1820 = vmatpush.msra.mxu2 %v3950_v13  ;;  %v1440_v1 = vadd.f32 %v1424_v52, %v3713_v32  ;;  %1900 = vmatpush.msra.mxu0 %v3940_v23  ;;  %v4803_v52 = vld [vmem:[#allocation26_spill] sm:$0xff] }
 0x26b   : > { %1861 = vmatpush.msra.mxu3 %v3931_v7  ;;  %1942 = vmatpush.msra.mxu1 %v3914_v35 }
 0x26c   : > { %v1411_v15 = vmul.f32 0.01, %v1374_v62  ;;  %vm1395_vm7 = vcmp.gt.f32.partialorder %v1374_v62, 0.0  ;;  %v1250_v54 = vpop.f32.mrf.mxu2  ;;  %1821 = vmatpush.msra.mxu2 %v3970_v2  ;;  %1558 = vmatmul.f32.gmra.mxu0 %v1440_v1 }
 0x26d   : > { %v1251_v53 = vadd.f32 %v1250_v54, %v3968_v24  ;;  %1476 = vmatmul.f32.gmra.mxu2 %v1440_v1  ;;  %1901 = vmatpush.msra.mxu0 %v3953_v8  ;;  %v4804_v54 = vld [vmem:[#allocation27_spill] sm:$0xff]  ;;  %v4805_v1 = vld [vmem:[#allocation33_spill] sm:$0xff] }
 0x26e   : > { %v1427_v9 = vsel %vm1395_vm7, %v1374_v62, %v1411_v15  ;;  %1862 = vmatpush.msra.mxu3 %v3943_v38  ;;  %v1294_v51 = vpop.f32.mrf.mxu3  ;;  %1822 = vmatpush.msra.mxu2 %v3982_v28  ;;  %v4802_v62 = vld [vmem:[#allocation28_spill] sm:$0xff] }
 0x26f   : > { %v1335_v44 = vpop.f32.mrf.mxu0  ;;  %v1443_v63 = vadd.f32 %v1427_v9, %v3724_v17  ;;  %v1292_v57 = vadd.f32 %v1291_v25, %v1251_v53  ;;  %1902 = vmatpush.msra.mxu0 %v3973_v34  ;;  %1943 = vmatpush.msra.mxu1 %v3934_v11  ;;  %v4806_v53 = vld [vmem:[#allocation34_spill] sm:$0xff] }
 0x270   : > { %v1336_v13 = vadd.f32 %v1335_v44, %v3923_v0  ;;  %1863 = vmatpush.msra.mxu3 %v3956_v43  ;;  %1823 = vmatpush.msra.mxu2 %v3995_v3  ;;  %v1379_v38 = vpop.f32.mrf.mxu1 }
 0x271   : > { %1520 = vmatmul.f32.gmra.mxu3 %v1443_v63  ;;  %1602 = vmatmul.f32.gmra.mxu1 %v1443_v63  ;;  %v1410_v23 = vmul.f32 0.01, %v1292_v57  ;;  %vm1394_vm8 = vcmp.gt.f32.partialorder %v1292_v57, 0.0  ;;  %v4807_v63 = vld [vmem:[#allocation29_spill] sm:$0xff] }
 0x272   : > { %v1377_v36 = vadd.f32 %v1376_v49, %v1336_v13  ;;  %1903 = vmatpush.msra.mxu0 %v3985_v33  ;;  %1864 = vmatpush.msra.mxu3 %v3976_v60 }
 0x273   : > { %v1426_v2 = vsel %vm1394_vm8, %v1292_v57, %v1410_v23  ;;  %1944 = vmatpush.msra.mxu1 %v3946_v10  ;;  %1824 = vmatpush.msra.mxu2 %v4008_v22  ;;  %v4792_v22 = vld [vmem:[#allocation23_spill] sm:$0xff]  ;;  %v4809_v23 = vld [vmem:[#allocation12_spill] sm:$0xff] }
 0x274   : > { %v1413_v7 = vmul.f32 0.01, %v1377_v36  ;;  %vm1397_vm9 = vcmp.gt.f32.partialorder %v1377_v36, 0.0  ;;  %v1253_v8 = vpop.f32.mrf.mxu2  ;;  %v1442_v16 = vadd.f32 %v1426_v2, %v3770_v31  ;;  %1904 = vmatpush.msra.mxu0 %v3998_v6  ;;  %1865 = vmatpush.msra.mxu3 %v3988_v18  ;;  %v4794_v6 = vld [vmem:[#allocation19_spill] sm:$0xff] }
 0x275   : > { %v1254_v35 = vadd.f32 %v1253_v8, %v3968_v24  ;;  %1945 = vmatpush.msra.mxu1 %v3959_v47  ;;  %1825 = vmatpush.msra.mxu2 %v4014_v41  ;;  %v4797_v47 = vld [vmem:[#allocation24_spill] sm:$0xff]  ;;  %v4808_v57 = vld [vmem:[#allocation31_spill] sm:$0xff] }
 0x276   : > { %v1429_v34 = vsel %vm1397_vm9, %v1377_v36, %v1413_v7  ;;  %1479 = vmatmul.f32.gmra.mxu2 %v1442_v16  ;;  %1561 = vmatmul.f32.gmra.mxu0 %v1442_v16  ;;  %v1297_v10 = vpop.f32.mrf.mxu3  ;;  %v4811_v16 = vld [vmem:[#allocation13_spill] sm:$0xff] }
 0x277   : > { %v1338_v43 = vpop.f32.mrf.mxu0  ;;  %v1445_v3 = vadd.f32 %v1429_v34, %v3791_v50  ;;  %v1295_v11 = vadd.f32 %v1294_v51, %v1254_v35  ;;  %1905 = vmatpush.msra.mxu0 %v4792_v22  ;;  %1866 = vmatpush.msra.mxu3 %v4793_v55 }
 0x278   : > { %v1339_v28 = vadd.f32 %v1338_v43, %v3923_v0  ;;  %1946 = vmatpush.msra.mxu1 %v4794_v6  ;;  %1826 = vmatpush.msra.mxu2 %v4027_v27  ;;  %v1382_v39 = vpop.f32.mrf.mxu1 }
 0x279   : > { %1523 = vmatmul.f32.gmra.mxu3 %v1445_v3  ;;  %1605 = vmatmul.f32.gmra.mxu1 %v1445_v3  ;;  %v1412_v60 = vmul.f32 0.01, %v1295_v11  ;;  %vm1396_vm10 = vcmp.gt.f32.partialorder %v1295_v11, 0.0  ;;  %v4812_v3 = vld [vmem:[#allocation35_spill] sm:$0xff] }
 0x27a   : > { %v1380_v33 = vadd.f32 %v1379_v38, %v1339_v28  ;;  %1906 = vmatpush.msra.mxu0 %v4796_v26  ;;  %1867 = vmatpush.msra.mxu3 %v4797_v47  ;;  %v4810_v38 = vld [vmem:[#allocation32_spill] sm:$0xff]  ;;  %v4816_v47 = vld [vmem:[#allocation17_spill] sm:$0xff] }
 0x27b   : > { %v1428_v40 = vsel %vm1396_vm10, %v1295_v11, %v1412_v60  ;;  %1947 = vmatpush.msra.mxu1 %v4798_v45  ;;  %1827 = vmatpush.msra.mxu2 %v4799_v37 }
 0x27c   : > { %v1415_v59 = vmul.f32 0.01, %v1380_v33  ;;  %vm1399_vm11 = vcmp.gt.f32.partialorder %v1380_v33, 0.0  ;;  %v1256_v18 = vpop.f32.mrf.mxu2  ;;  %v1444_v30 = vadd.f32 %v1428_v40, %v4795_v19  ;;  %1907 = vmatpush.msra.mxu0 %v4802_v62  ;;  %1868 = vmatpush.msra.mxu3 %v4804_v54 }
 0x27d   : > { %v1257_v41 = vadd.f32 %v1256_v18, %v3968_v24  ;;  %1948 = vmatpush.msra.mxu1 %v4801_v14  ;;  %1828 = vmatpush.msra.mxu2 %v4805_v1  ;;  %v4815_v18 = vld [vmem:[#allocation16_spill] sm:$0xff] }
 0x27e   : > { %v1431_v42 = vsel %vm1399_vm11, %v1380_v33, %v1415_v59  ;;  %1482 = vmatmul.f32.gmra.mxu2 %v1444_v30  ;;  %1564 = vmatmul.f32.gmra.mxu0 %v1444_v30  ;;  %v1300_v13 = vpop.f32.mrf.mxu3  ;;  %v4813_v33 = vld [vmem:[#allocation14_spill] sm:$0xff] }
 0x27f   : > { %v1341_v29 = vpop.f32.mrf.mxu0  ;;  %v1447_v27 = vadd.f32 %v1431_v42, %v4800_v4  ;;  %v1298_v25 = vadd.f32 %v1297_v10, %v1257_v41  ;;  %1949 = vmatpush.msra.mxu1 %v4803_v52  ;;  %1908 = vmatpush.msra.mxu0 %v4806_v53  ;;  %v4165_v41 = vperm.slane %v4816_v47, 4 }
 0x280   : > { %v1342_v20 = vadd.f32 %v1341_v29, %v3923_v0  ;;  %1869 = vmatpush.msra.mxu3 %v4808_v57  ;;  %1829 = vmatpush.msra.mxu2 %v4062_v12  ;;  %v1385_v12 = vpop.f32.mrf.mxu1 }
 0x281   : > { %1526 = vmatmul.f32.gmra.mxu3 %v1447_v27  ;;  %1608 = vmatmul.f32.gmra.mxu1 %v1447_v27  ;;  %v1414_v49 = vmul.f32 0.01, %v1298_v25  ;;  %vm1398_vm12 = vcmp.gt.f32.partialorder %v1298_v25, 0.0 }
 0x282   : > { %v1383_v15 = vadd.f32 %v1382_v39, %v1342_v20  ;;  %1950 = vmatpush.msra.mxu1 %v4807_v63  ;;  %1909 = vmatpush.msra.mxu0 %v4066_v21  ;;  %v4817_v39 = vld [vmem:[#allocation18_spill] sm:$0xff] }
 0x283   : > { %v1430_v44 = vsel %vm1398_vm12, %v1298_v25, %v1414_v49  ;;  %1870 = vmatpush.msra.mxu3 %v4056_v58  ;;  %v4171_v29 = vperm.slane %v4817_v39, 4 }
 0x284   : > { %v1417_v9 = vmul.f32 0.01, %v1383_v15  ;;  %vm1401_vm13 = vcmp.gt.f32.partialorder %v1383_v15, 0.0  ;;  %v1259_v51 = vpop.f32.mrf.mxu2  ;;  %v1446_v36 = vadd.f32 %v1430_v44, %v4809_v23  ;;  %1951 = vmatpush.msra.mxu1 %v4810_v38  ;;  %1910 = vmatpush.msra.mxu0 %v4073_v48  ;;  %v4814_v48 = vld [vmem:[#allocation15_spill] sm:$0xff] }
 0x285   : > { %v1260_v7 = vadd.f32 %v1259_v51, %v3968_v24 }
 0x286   : > { %v1433_v2 = vsel %vm1401_vm13, %v1383_v15, %v1417_v9  ;;  %1485 = vmatmul.f32.gmra.mxu2 %v1446_v36  ;;  %1567 = vmatmul.f32.gmra.mxu0 %v1446_v36  ;;  %v1303_v55 = vpop.f32.mrf.mxu3 }
 0x287   : > { %v1344_v8 = vpop.f32.mrf.mxu0  ;;  %v1449_v35 = vadd.f32 %v1433_v2, %v4811_v16  ;;  %v1301_v34 = vadd.f32 %v1300_v13, %v1260_v7  ;;  %1952 = vmatpush.msra.mxu1 %v4812_v3  ;;  %1911 = vmatpush.msra.mxu0 %v4080_v61 }
 0x288   : > { %v1345_v43 = vadd.f32 %v1344_v8, %v3923_v0 }
 0x289   : > { %1529 = vmatmul.f32.gmra.mxu3 %v1449_v35  ;;  %1611 = vmatmul.f32.gmra.mxu1 %v1449_v35  ;;  %v1416_v21 = vmul.f32 0.01, %v1301_v34  ;;  %vm1400_vm14 = vcmp.gt.f32.partialorder %v1301_v34, 0.0 }
 0x28a   : > { %v1386_v11 = vadd.f32 %v1385_v12, %v1345_v43 }
 0x28b   : > { %v1432_v28 = vsel %vm1400_vm14, %v1301_v34, %v1416_v21 }
 0x28c   : > { %v1419_v58 = vmul.f32 0.01, %v1386_v11  ;;  %vm1403_vm15 = vcmp.gt.f32.partialorder %v1386_v11, 0.0  ;;  %v1262_v60 = vpop.f32.mrf.mxu2  ;;  %v1448_v10 = vadd.f32 %v1432_v28, %v4813_v33 }
 0x28d   : > { %v1263_v0 = vadd.f32 %v1262_v60, %v3968_v24 }
 0x28e   : > { %v1435_v22 = vsel %vm1403_vm15, %v1386_v11, %v1419_v58  ;;  %1488 = vmatmul.f32.gmra.mxu2 %v1448_v10  ;;  %1570 = vmatmul.f32.gmra.mxu0 %v1448_v10 }
 0x28f   : > { %v1451_v59 = vadd.f32 %v1435_v22, %v4814_v48  ;;  %v1304_v40 = vadd.f32 %v1303_v55, %v1263_v0 }
 0x291   : > { %1532 = vmatmul.f32.gmra.mxu3 %v1451_v59  ;;  %1614 = vmatmul.f32.gmra.mxu1 %v1451_v59  ;;  %v1418_v6 = vmul.f32 0.01, %v1304_v40  ;;  %vm1402_vm0 = vcmp.gt.f32.partialorder %v1304_v40, 0.0 }
 0x293   : > { %v1434_v61 = vsel %vm1402_vm0, %v1304_v40, %v1418_v6 }
 0x294   : > { %v1450_v30 = vadd.f32 %v1434_v61, %v4815_v18 }
 0x296   : > { %1491 = vmatmul.f32.gmra.mxu2 %v1450_v30  ;;  %1573 = vmatmul.f32.gmra.mxu0 %v1450_v30 }
 0x2cf   : > { %v1594_v26 = vpop.f32.mrf.mxu1 }
 0x2d5   : > { %v1553_v24 = vpop.f32.mrf.mxu0  ;;  %v1512_v45 = vpop.f32.mrf.mxu3 }
 0x2d6   : > { %v1554_v42 = vadd.f32 %v1553_v24, %v4165_v41 }
 0x2d8   : > { %v4168_v37 = vadd.f32 %v1594_v26, %v1554_v42 }
 0x2da   : > { %1675 = vmatmul.f32.vlgmr.msrb.gmra.mxu3 %v4168_v37  ;;  %1757 = vmatmul.f32.vlgmr.msrb.gmra.mxu1 %v4168_v37  ;;  %v1597_v27 = vpop.f32.mrf.mxu1 }
 0x2db   : > { %v1471_v25 = vpop.f32.mrf.mxu2 }
 0x2dc   : > { %v1472_v20 = vadd.f32 %v1471_v25, %v4171_v29 }
 0x2de   : > { %v4176_v14 = vadd.f32 %v1512_v45, %v1472_v20 }
 0x2df   : > { %v1515_v49 = vpop.f32.mrf.mxu3 }
 0x2e0   : > { %v1556_v62 = vpop.f32.mrf.mxu0  ;;  %1634 = vmatmul.f32.vlgmr.msrb.gmra.mxu2 %v4176_v14  ;;  %1716 = vmatmul.f32.vlgmr.msrb.gmra.mxu0 %v4176_v14 }
 0x2e1   : > { %v1557_v15 = vadd.f32 %v1556_v62, %v4165_v41 }
 0x2e3   : > { %v4181_v52 = vadd.f32 %v1597_v27, %v1557_v15 }
 0x2e4   : > { %v1600_v54 = vpop.f32.mrf.mxu1 }
 0x2e5   : > { %1678 = vmatmul.f32.gmra.mxu3 %v4181_v52  ;;  %1760 = vmatmul.f32.gmra.mxu1 %v4181_v52  ;;  %v1474_v1 = vpop.f32.mrf.mxu2 }
 0x2e6   : > { %v1475_v53 = vadd.f32 %v1474_v1, %v4171_v29 }
 0x2e8   : > { %v4186_v9 = vadd.f32 %v1515_v49, %v1475_v53 }
 0x2e9   : > { %v1518_v44 = vpop.f32.mrf.mxu3  ;;  %v1559_v63 = vpop.f32.mrf.mxu0 }
 0x2ea   : > { %v1560_v57 = vadd.f32 %v1559_v63, %v4165_v41  ;;  %1637 = vmatmul.f32.gmra.mxu2 %v4186_v9  ;;  %1719 = vmatmul.f32.gmra.mxu0 %v4186_v9 }
 0x2ec   : > { %v4191_v51 = vadd.f32 %v1600_v54, %v1560_v57 }
 0x2ee   : > { %v1603_v13 = vpop.f32.mrf.mxu1  ;;  %1681 = vmatmul.f32.gmra.mxu3 %v4191_v51  ;;  %1763 = vmatmul.f32.gmra.mxu1 %v4191_v51 }
 0x2f0   : > { %v1477_v36 = vpop.f32.mrf.mxu2 }
 0x2f1   : > { %v1478_v7 = vadd.f32 %v1477_v36, %v4171_v29 }
 0x2f3   : > { %v1562_v38 = vpop.f32.mrf.mxu0  ;;  %v4196_v8 = vadd.f32 %v1518_v44, %v1478_v7 }
 0x2f4   : > { %v1521_v2 = vpop.f32.mrf.mxu3  ;;  %v1563_v35 = vadd.f32 %v1562_v38, %v4165_v41 }
 0x2f5   : > { %1640 = vmatmul.f32.gmra.mxu2 %v4196_v8  ;;  %1722 = vmatmul.f32.gmra.mxu0 %v4196_v8 }
 0x2f6   : > { %v4199_v34 = vadd.f32 %v1603_v13, %v1563_v35  ;;  %v1606_v43 = vpop.f32.mrf.mxu1 }
 0x2f8   : > { %1684 = vmatmul.f32.gmra.mxu3 %v4199_v34  ;;  %1766 = vmatmul.f32.gmra.mxu1 %v4199_v34 }
 0x2f9   : > { %v1480_v3 = vpop.f32.mrf.mxu2 }
 0x2fa   : > { %v1481_v12 = vadd.f32 %v1480_v3, %v4171_v29 }
 0x2fb   : > { %v1565_v21 = vpop.f32.mrf.mxu0 }
 0x2fc   : > { %v4206_v11 = vadd.f32 %v1521_v2, %v1481_v12  ;;  %v1566_v58 = vadd.f32 %v1565_v21, %v4165_v41  ;;  %v1524_v28 = vpop.f32.mrf.mxu3 }
 0x2fe   : > { %v4209_v60 = vadd.f32 %v1606_v43, %v1566_v58  ;;  %1643 = vmatmul.f32.gmra.mxu2 %v4206_v11  ;;  %1725 = vmatmul.f32.gmra.mxu0 %v4206_v11  ;;  %v1609_v10 = vpop.f32.mrf.mxu1 }
 0x300   : > { %1687 = vmatmul.f32.gmra.mxu3 %v4209_v60  ;;  %1769 = vmatmul.f32.gmra.mxu1 %v4209_v60 }
 0x301   : > { %v1483_v0 = vpop.f32.mrf.mxu2 }
 0x302   : > { %v1484_v22 = vadd.f32 %v1483_v0, %v4171_v29 }
 0x303   : > { %v1568_v55 = vpop.f32.mrf.mxu0 }
 0x304   : > { %v4216_v59 = vadd.f32 %v1524_v28, %v1484_v22  ;;  %v1569_v40 = vadd.f32 %v1568_v55, %v4165_v41  ;;  %v1527_v61 = vpop.f32.mrf.mxu3 }
 0x306   : > { %v4219_v6 = vadd.f32 %v1609_v10, %v1569_v40  ;;  %1646 = vmatmul.f32.gmra.mxu2 %v4216_v59  ;;  %1728 = vmatmul.f32.gmra.mxu0 %v4216_v59  ;;  %v1612_v47 = vpop.f32.mrf.mxu1 }
 0x308   : > { %1690 = vmatmul.f32.gmra.mxu3 %v4219_v6  ;;  %1772 = vmatmul.f32.gmra.mxu1 %v4219_v6 }
 0x309   : > { %v1486_v30 = vpop.f32.mrf.mxu2 }
 0x30a   : > { %v1487_v26 = vadd.f32 %v1486_v30, %v4171_v29 }
 0x30b   : > { %v1571_v24 = vpop.f32.mrf.mxu0 }
 0x30c   : > { %v4226_v42 = vadd.f32 %v1527_v61, %v1487_v26  ;;  %v1572_v45 = vadd.f32 %v1571_v24, %v4165_v41  ;;  %v1530_v27 = vpop.f32.mrf.mxu3 }
 0x30e   : > { %v4229_v39 = vadd.f32 %v1612_v47, %v1572_v45  ;;  %1649 = vmatmul.f32.gmra.mxu2 %v4226_v42  ;;  %1731 = vmatmul.f32.gmra.mxu0 %v4226_v42  ;;  %v1615_v54 = vpop.f32.mrf.mxu1 }
 0x310   : > { %1693 = vmatmul.f32.gmra.mxu3 %v4229_v39  ;;  %1775 = vmatmul.f32.gmra.mxu1 %v4229_v39 }
 0x311   : > { %v1489_v25 = vpop.f32.mrf.mxu2 }
 0x312   : > { %v1490_v20 = vadd.f32 %v1489_v25, %v4171_v29 }
 0x313   : > { %v1574_v62 = vpop.f32.mrf.mxu0 }
 0x314   : > { %v4236_v49 = vadd.f32 %v1530_v27, %v1490_v20  ;;  %v1575_v15 = vadd.f32 %v1574_v62, %v4165_v41  ;;  %v1533_v63 = vpop.f32.mrf.mxu3 }
 0x316   : > { %v4239_v1 = vadd.f32 %v1615_v54, %v1575_v15  ;;  %1652 = vmatmul.f32.gmra.mxu2 %v4236_v49  ;;  %1734 = vmatmul.f32.gmra.mxu0 %v4236_v49 }
 0x318   : > { %1696 = vmatmul.f32.gmra.mxu3 %v4239_v1  ;;  %1778 = vmatmul.f32.gmra.mxu1 %v4239_v1 }
 0x319   : > { %v1492_v53 = vpop.f32.mrf.mxu2 }
 0x31a   : > { %v1493_v44 = vadd.f32 %v1492_v53, %v4171_v29 }
 0x31c   : > { %v4246_v57 = vadd.f32 %v1533_v63, %v1493_v44 }
 0x31e   : > { %1655 = vmatmul.f32.gmra.mxu2 %v4246_v57  ;;  %1737 = vmatmul.f32.gmra.mxu0 %v4246_v57 }
 0x357   : > { %v1758_v41 = vpop.f32.mrf.mxu1 }
 0x35d   : > { %v1717_v13 = vpop.f32.mrf.mxu0  ;;  %v1676_v36 = vpop.f32.mrf.mxu3 }
 0x35e   : > { %v1759_v7 = vadd.f32 %v1758_v41, %v1717_v13 }
 0x360   : > { %v4251_v2 = vsub.f32 %v4168_v37, %v1759_v7 }
 0x362   : > { %v1799_v38 = vmul.f32 %v4251_v2, %v4251_v2  ;;  %v1761_v35 = vpop.f32.mrf.mxu1 }
 0x363   : > { %v1635_v43 = vpop.f32.mrf.mxu2 }
 0x364   : > { %v1677_v29 = vadd.f32 %v1676_v36, %v1635_v43  ;;  %1871 = vmatmul.f32.vlgmr.msra.gmra.mxu3 %v1799_v38  ;;  %1953 = vmatmul.f32.vlgmr.msra.gmra.mxu1 %v1799_v38  ;;  %v392_v43 = vld [vmem:[#allocation2 + $0x4f0] sm:$0xff] }
 0x365   : > { %2256 = vmatpush.msrb.mxu2 %v392_v43 }
 0x366   : > { %v4256_v3 = vsub.f32 %v4176_v14, %v1677_v29  ;;  %v424_v29 = vld [vmem:[#allocation2 + $0x5f0] sm:$0xff] }
 0x367   : > { %v1720_v58 = vpop.f32.mrf.mxu0  ;;  %2297 = vmatpush.msrb.mxu3 %v424_v29 }
 0x368   : > { %v1798_v12 = vmul.f32 %v4256_v3, %v4256_v3  ;;  %v1679_v21 = vpop.f32.mrf.mxu3  ;;  %v1762_v28 = vadd.f32 %v1761_v35, %v1720_v58  ;;  %v393_v58 = vld [vmem:[#allocation2 + $0x4f8] sm:$0xff] }
 0x369   : > { %2338 = vmatpush.msrb.mxu0 %v393_v58 }
 0x36a   : > { %1830 = vmatmul.f32.vlgmr.msra.gmra.mxu2 %v1798_v12  ;;  %1912 = vmatmul.f32.vlgmr.msra.gmra.mxu0 %v1798_v12  ;;  %v4261_v37 = vsub.f32 %v4181_v52, %v1762_v28  ;;  %v390_v12 = vld [vmem:[#allocation2 + $0x4e0] sm:$0xff] }
 0x36b   : > { %v1764_v10 = vpop.f32.mrf.mxu1  ;;  %2257 = vmatpush.msrb.mxu2 %v390_v12 }
 0x36c   : > { %v1801_v0 = vmul.f32 %v4261_v37, %v4261_v37 }
 0x36d   : > { %v1638_v22 = vpop.f32.mrf.mxu2 }
 0x36e   : > { %v1680_v55 = vadd.f32 %v1679_v21, %v1638_v22  ;;  %1874 = vmatmul.f32.gmra.mxu3 %v1801_v0  ;;  %1956 = vmatmul.f32.gmra.mxu1 %v1801_v0  ;;  %v420_v0 = vld [vmem:[#allocation2 + $0x5d0] sm:$0xff] }
 0x370   : > { %v4266_v14 = vsub.f32 %v4186_v9, %v1680_v55  ;;  %v391_v55 = vld [vmem:[#allocation2 + $0x4e8] sm:$0xff] }
 0x371   : > { %v1682_v40 = vpop.f32.mrf.mxu3  ;;  %2339 = vmatpush.msrb.mxu0 %v391_v55  ;;  %v419_v55 = vld [vmem:[#allocation2 + $0x5c8] sm:$0xff] }
 0x372   : > { %v1723_v61 = vpop.f32.mrf.mxu0  ;;  %v1800_v26 = vmul.f32 %v4266_v14, %v4266_v14 }
 0x373   : > { %v1765_v30 = vadd.f32 %v1764_v10, %v1723_v61  ;;  %v425_v10 = vld [vmem:[#allocation2 + $0x5f8] sm:$0xff] }
 0x374   : > { %1833 = vmatmul.f32.gmra.mxu2 %v1800_v26  ;;  %1915 = vmatmul.f32.gmra.mxu0 %v1800_v26  ;;  %v386_v26 = vld [vmem:[#allocation2 + $0x4c0] sm:$0xff] }
 0x375   : > { %v1767_v47 = vpop.f32.mrf.mxu1  ;;  %v4271_v52 = vsub.f32 %v4191_v51, %v1765_v30  ;;  %2379 = vmatpush.msrb.mxu1 %v425_v10  ;;  %v416_v10 = vld [vmem:[#allocation2 + $0x5b0] sm:$0xff] }
 0x377   : > { %v1803_v24 = vmul.f32 %v4271_v52, %v4271_v52 }
 0x378   : > { %v1641_v45 = vpop.f32.mrf.mxu2 }
 0x379   : > { %v1683_v27 = vadd.f32 %v1682_v40, %v1641_v45  ;;  %1877 = vmatmul.f32.gmra.mxu3 %v1803_v24  ;;  %1959 = vmatmul.f32.gmra.mxu1 %v1803_v24  ;;  %v423_v40 = vld [vmem:[#allocation2 + $0x5e8] sm:$0xff] }
 0x37a   : > { %2380 = vmatpush.msrb.mxu1 %v423_v40  ;;  %v414_v40 = vld [vmem:[#allocation2 + $0x5a0] sm:$0xff] }
 0x37b   : > { %v1685_v9 = vpop.f32.mrf.mxu3  ;;  %v1726_v25 = vpop.f32.mrf.mxu0  ;;  %v4276_v20 = vsub.f32 %v4196_v8, %v1683_v27 }
 0x37c   : > { %v1768_v62 = vadd.f32 %v1767_v47, %v1726_v25  ;;  %v418_v47 = vld [vmem:[#allocation2 + $0x5c0] sm:$0xff]  ;;  %v384_v25 = vld [vmem:[#allocation2 + $0x4b0] sm:$0xff] }
 0x37d   : > { %v1770_v15 = vpop.f32.mrf.mxu1  ;;  %v1802_v51 = vmul.f32 %v4276_v20, %v4276_v20 }
 0x37e   : > { %v4279_v54 = vsub.f32 %v4199_v34, %v1768_v62  ;;  %v421_v62 = vld [vmem:[#allocation2 + $0x5d8] sm:$0xff] }
 0x37f   : > { %1836 = vmatmul.f32.gmra.mxu2 %v1802_v51  ;;  %1918 = vmatmul.f32.gmra.mxu0 %v1802_v51 }
 0x380   : > { %v1805_v53 = vmul.f32 %v4279_v54, %v4279_v54  ;;  %2381 = vmatpush.msrb.mxu1 %v421_v62  ;;  %v409_v62 = vld [vmem:[#allocation2 + $0x578] sm:$0xff] }
 0x381   : > { %v1644_v44 = vpop.f32.mrf.mxu2 }
 0x382   : > { %v1686_v63 = vadd.f32 %v1685_v9, %v1644_v44  ;;  %1880 = vmatmul.f32.gmra.mxu3 %v1805_v53  ;;  %1962 = vmatmul.f32.gmra.mxu1 %v1805_v53  ;;  %v389_v9 = vld [vmem:[#allocation2 + $0x4d8] sm:$0xff] }
 0x383   : > { %v1688_v41 = vpop.f32.mrf.mxu3  ;;  %v1729_v8 = vpop.f32.mrf.mxu0  ;;  %2340 = vmatpush.msrb.mxu0 %v389_v9  ;;  %2382 = vmatpush.msrb.mxu1 %v419_v55  ;;  %v411_v9 = vld [vmem:[#allocation2 + $0x588] sm:$0xff]  ;;  %v373_v55 = vld [vmem:[#allocation2 + $0x458] sm:$0xff] }
 0x384   : > { %v4286_v13 = vsub.f32 %v4206_v11, %v1686_v63  ;;  %v1771_v36 = vadd.f32 %v1770_v15, %v1729_v8  ;;  %v422_v11 = vld [vmem:[#allocation2 + $0x5e0] sm:$0xff] }
 0x385   : > { %v1773_v38 = vpop.f32.mrf.mxu1  ;;  %2298 = vmatpush.msrb.mxu3 %v422_v11 }
 0x386   : > { %v4289_v34 = vsub.f32 %v4209_v60, %v1771_v36  ;;  %v1804_v7 = vmul.f32 %v4286_v13, %v4286_v13  ;;  %v388_v60 = vld [vmem:[#allocation2 + $0x4d0] sm:$0xff] }
 0x387   : > { %2258 = vmatpush.msrb.mxu2 %v388_v60  ;;  %2299 = vmatpush.msrb.mxu3 %v420_v0  ;;  %v387_v0 = vld [vmem:[#allocation2 + $0x4c8] sm:$0xff] }
 0x388   : > { %1839 = vmatmul.f32.gmra.mxu2 %v1804_v7  ;;  %1921 = vmatmul.f32.gmra.mxu0 %v1804_v7  ;;  %v1807_v35 = vmul.f32 %v4289_v34, %v4289_v34 }
 0x389   : > { %v1647_v21 = vpop.f32.mrf.mxu2  ;;  %2259 = vmatpush.msrb.mxu2 %v386_v26  ;;  %2300 = vmatpush.msrb.mxu3 %v418_v47  ;;  %v417_v26 = vld [vmem:[#allocation2 + $0x5b8] sm:$0xff]  ;;  %v412_v47 = vld [vmem:[#allocation2 + $0x590] sm:$0xff] }
 0x38a   : > { %v1689_v28 = vadd.f32 %v1688_v41, %v1647_v21  ;;  %1883 = vmatmul.f32.gmra.mxu3 %v1807_v35  ;;  %1965 = vmatmul.f32.gmra.mxu1 %v1807_v35 }
 0x38b   : > { %v1732_v22 = vpop.f32.mrf.mxu0  ;;  %v1691_v24 = vpop.f32.mrf.mxu3  ;;  %2260 = vmatpush.msrb.mxu2 %v384_v25  ;;  %2301 = vmatpush.msrb.mxu3 %v416_v10  ;;  %v383_v25 = vld [vmem:[#allocation2 + $0x4a8] sm:$0xff]  ;;  %v401_v10 = vld [vmem:[#allocation2 + $0x538] sm:$0xff] }
 0x38c   : > { %v4296_v61 = vsub.f32 %v4216_v59, %v1689_v28  ;;  %v1774_v30 = vadd.f32 %v1773_v38, %v1732_v22  ;;  %v382_v22 = vld [vmem:[#allocation2 + $0x4a0] sm:$0xff]  ;;  %2341 = vmatpush.msrb.mxu0 %v387_v0  ;;  %2383 = vmatpush.msrb.mxu1 %v417_v26 }
 0x38d   : > { %v1776_v15 = vpop.f32.mrf.mxu1  ;;  %2261 = vmatpush.msrb.mxu2 %v382_v22  ;;  %2302 = vmatpush.msrb.mxu3 %v414_v40  ;;  %v372_v22 = vld [vmem:[#allocation2 + $0x450] sm:$0xff]  ;;  %v398_v40 = vld [vmem:[#allocation2 + $0x520] sm:$0xff] }
 0x38e   : > { %v4299_v45 = vsub.f32 %v4219_v6, %v1774_v30  ;;  %v1806_v27 = vmul.f32 %v4296_v61, %v4296_v61  ;;  %v385_v30 = vld [vmem:[#allocation2 + $0x4b8] sm:$0xff] }
 0x38f   : > { %2342 = vmatpush.msrb.mxu0 %v385_v30  ;;  %2303 = vmatpush.msrb.mxu3 %v412_v47  ;;  %v399_v30 = vld [vmem:[#allocation2 + $0x528] sm:$0xff] }
 0x390   : > { %1842 = vmatmul.f32.gmra.mxu2 %v1806_v27  ;;  %1924 = vmatmul.f32.gmra.mxu0 %v1806_v27  ;;  %v1809_v59 = vmul.f32 %v4299_v45, %v4299_v45  ;;  %v410_v27 = vld [vmem:[#allocation2 + $0x580] sm:$0xff]  ;;  %v371_v47 = vld [vmem:[#allocation2 + $0x448] sm:$0xff] }
 0x391   : > { %v1650_v51 = vpop.f32.mrf.mxu2  ;;  %2304 = vmatpush.msrb.mxu3 %v410_v27  ;;  %2343 = vmatpush.msrb.mxu0 %v383_v25 }
 0x392   : > { %v1692_v6 = vadd.f32 %v1691_v24, %v1650_v51  ;;  %1886 = vmatmul.f32.gmra.mxu3 %v1809_v59  ;;  %1968 = vmatmul.f32.gmra.mxu1 %v1809_v59  ;;  %v413_v24 = vld [vmem:[#allocation2 + $0x598] sm:$0xff]  ;;  %v408_v59 = vld [vmem:[#allocation2 + $0x570] sm:$0xff] }
 0x393   : > { %v1735_v53 = vpop.f32.mrf.mxu0  ;;  %v1694_v36 = vpop.f32.mrf.mxu3  ;;  %2305 = vmatpush.msrb.mxu3 %v408_v59  ;;  %v380_v51 = vld [vmem:[#allocation2 + $0x490] sm:$0xff] }
 0x394   : > { %v4306_v44 = vsub.f32 %v4226_v42, %v1692_v6  ;;  %v1777_v63 = vadd.f32 %v1776_v15, %v1735_v53  ;;  %v378_v6 = vld [vmem:[#allocation2 + $0x480] sm:$0xff]  ;;  %v381_v53 = vld [vmem:[#allocation2 + $0x498] sm:$0xff]  ;;  %2262 = vmatpush.msrb.mxu2 %v380_v51  ;;  %v368_v59 = vld [vmem:[#allocation2 + $0x430] sm:$0xff] }
 0x395   : > { %v1779_v43 = vpop.f32.mrf.mxu1  ;;  %2344 = vmatpush.msrb.mxu0 %v381_v53  ;;  %v395_v51 = vld [vmem:[#allocation2 + $0x508] sm:$0xff]  ;;  %v366_v53 = vld [vmem:[#allocation2 + $0x420] sm:$0xff] }
 0x396   : > { %v4309_v41 = vsub.f32 %v4229_v39, %v1777_v63  ;;  %v1808_v8 = vmul.f32 %v4306_v44, %v4306_v44  ;;  %v406_v63 = vld [vmem:[#allocation2 + $0x560] sm:$0xff]  ;;  %2263 = vmatpush.msrb.mxu2 %v378_v6 }
 0x397   : > { %2306 = vmatpush.msrb.mxu3 %v406_v63  ;;  %v367_v63 = vld [vmem:[#allocation2 + $0x428] sm:$0xff] }
 0x398   : > { %1845 = vmatmul.f32.gmra.mxu2 %v1808_v8  ;;  %1927 = vmatmul.f32.gmra.mxu0 %v1808_v8  ;;  %v1811_v7 = vmul.f32 %v4309_v41, %v4309_v41  ;;  %v407_v8 = vld [vmem:[#allocation2 + $0x568] sm:$0xff] }
 0x399   : > { %v1653_v38 = vpop.f32.mrf.mxu2 }
 0x39a   : > { %v1695_v35 = vadd.f32 %v1694_v36, %v1653_v38  ;;  %1889 = vmatmul.f32.gmra.mxu3 %v1811_v7  ;;  %1971 = vmatmul.f32.gmra.mxu1 %v1811_v7  ;;  %v379_v36 = vld [vmem:[#allocation2 + $0x488] sm:$0xff]  ;;  %v404_v7 = vld [vmem:[#allocation2 + $0x550] sm:$0xff]  ;;  %v405_v38 = vld [vmem:[#allocation2 + $0x558] sm:$0xff] }
 0x39b   : > { %v1738_v42 = vpop.f32.mrf.mxu0  ;;  %v1697_v58 = vpop.f32.mrf.mxu3  ;;  %2345 = vmatpush.msrb.mxu0 %v379_v36  ;;  %2307 = vmatpush.msrb.mxu3 %v404_v7 }
 0x39c   : > { %v4316_v29 = vsub.f32 %v4236_v49, %v1695_v35  ;;  %v1780_v39 = vadd.f32 %v1779_v43, %v1738_v42  ;;  %v376_v35 = vld [vmem:[#allocation2 + $0x470] sm:$0xff]  ;;  %v377_v43 = vld [vmem:[#allocation2 + $0x478] sm:$0xff]  ;;  %v402_v42 = vld [vmem:[#allocation2 + $0x540] sm:$0xff] }
 0x39d   : > { %2264 = vmatpush.msrb.mxu2 %v376_v35  ;;  %2346 = vmatpush.msrb.mxu0 %v377_v43  ;;  %v365_v35 = vld [vmem:[#allocation2 + $0x418] sm:$0xff] }
 0x39e   : > { %v4319_v12 = vsub.f32 %v4239_v1, %v1780_v39  ;;  %v1810_v21 = vmul.f32 %v4316_v29, %v4316_v29  ;;  %2308 = vmatpush.msrb.mxu3 %v402_v42 }
 0x3a0   : > { %1848 = vmatmul.f32.gmra.mxu2 %v1810_v21  ;;  %1930 = vmatmul.f32.gmra.mxu0 %v1810_v21  ;;  %v1813_v11 = vmul.f32 %v4319_v12, %v4319_v12  ;;  %v403_v21 = vld [vmem:[#allocation2 + $0x548] sm:$0xff] }
 0x3a1   : > { %v1656_v28 = vpop.f32.mrf.mxu2 }
 0x3a2   : > { %v1698_v60 = vadd.f32 %v1697_v58, %v1656_v28  ;;  %1892 = vmatmul.f32.gmra.mxu3 %v1813_v11  ;;  %1974 = vmatmul.f32.gmra.mxu1 %v1813_v11  ;;  %v374_v28 = vld [vmem:[#allocation2 + $0x460] sm:$0xff] }
 0x3a3   : > { %2265 = vmatpush.msrb.mxu2 %v374_v28 }
 0x3a4   : > { %v4326_v49 = vsub.f32 %v4246_v57, %v1698_v60  ;;  %v415_v57 = vld [vmem:[#allocation2 + $0x5a8] sm:$0xff] }
 0x3a5   : > { %2384 = vmatpush.msrb.mxu1 %v415_v57  ;;  %v375_v60 = vld [vmem:[#allocation2 + $0x468] sm:$0xff]  ;;  %2266 = vmatpush.msrb.mxu2 %v372_v22  ;;  %v370_v57 = vld [vmem:[#allocation2 + $0x440] sm:$0xff] }
 0x3a6   : > { %v1812_v1 = vmul.f32 %v4326_v49, %v4326_v49  ;;  %2347 = vmatpush.msrb.mxu0 %v375_v60 }
 0x3a7   : > { %2385 = vmatpush.msrb.mxu1 %v413_v24  ;;  %v396_v24 = vld [vmem:[#allocation2 + $0x510] sm:$0xff]  ;;  %2267 = vmatpush.msrb.mxu2 %v370_v57 }
 0x3a8   : > { %1851 = vmatmul.f32.gmra.mxu2 %v1812_v1  ;;  %1933 = vmatmul.f32.gmra.mxu0 %v1812_v1  ;;  %v400_v1 = vld [vmem:[#allocation2 + $0x530] sm:$0xff] }
 0x3a9   : > { %2386 = vmatpush.msrb.mxu1 %v411_v9  ;;  %2309 = vmatpush.msrb.mxu3 %v400_v1  ;;  %v397_v9 = vld [vmem:[#allocation2 + $0x518] sm:$0xff] }
 0x3aa   : > { %2348 = vmatpush.msrb.mxu0 %v373_v55  ;;  %2268 = vmatpush.msrb.mxu2 %v368_v59 }
 0x3ab   : > { %2387 = vmatpush.msrb.mxu1 %v409_v62  ;;  %2310 = vmatpush.msrb.mxu3 %v398_v40  ;;  %v369_v62 = vld [vmem:[#allocation2 + $0x438] sm:$0xff] }
 0x3ac   : > { %2349 = vmatpush.msrb.mxu0 %v371_v47  ;;  %2269 = vmatpush.msrb.mxu2 %v366_v53 }
 0x3ad   : > { %2388 = vmatpush.msrb.mxu1 %v407_v8  ;;  %2311 = vmatpush.msrb.mxu3 %v396_v24 }
 0x3ae   : > { %2350 = vmatpush.msrb.mxu0 %v369_v62 }
 0x3af   : > { %2389 = vmatpush.msrb.mxu1 %v405_v38  ;;  %v364_v38 = vld [vmem:[#allocation2 + $0x410] sm:$0xff] }
 0x3b0   : > { %2351 = vmatpush.msrb.mxu0 %v367_v63  ;;  %2270 = vmatpush.msrb.mxu2 %v364_v38 }
 0x3b1   : > { %2390 = vmatpush.msrb.mxu1 %v403_v21  ;;  %v363_v21 = vld [vmem:[#allocation2 + $0x408] sm:$0xff] }
 0x3b2   : > { %2352 = vmatpush.msrb.mxu0 %v365_v35 }
 0x3b3   : > { %2391 = vmatpush.msrb.mxu1 %v401_v10 }
 0x3b4   : > { %2353 = vmatpush.msrb.mxu0 %v363_v21 }
 0x3b5   : > { %2392 = vmatpush.msrb.mxu1 %v399_v30 }
 0x3b7   : > { %2393 = vmatpush.msrb.mxu1 %v397_v9 }
 0x3b9   : > { %2394 = vmatpush.msrb.mxu1 %v395_v51 }
 0x3e1   : > { %v1954_v15 = vpop.f32.mrf.mxu1 }
 0x3e7   : > { %v1913_v39 = vpop.f32.mrf.mxu0  ;;  %v1872_v11 = vpop.f32.mrf.mxu3 }
 0x3e8   : > { %v1914_v58 = vadd.f32 1e-05, %v1913_v39  ;;  %v362_v39 = vld [vmem:[#allocation2 + $0x400] sm:$0xff] }
 0x3e9   : > { %2271 = vmatpush.msrb.mxu2 %v362_v39 }
 0x3ea   : > { %v4330_v0 = vadd.f32 %v1954_v15, %v1914_v58  ;;  %v394_v15 = vld [vmem:[#allocation2 + $0x500] sm:$0xff] }
 0x3eb   : > { %v1957_v26 = vpop.f32.mrf.mxu1  ;;  %2312 = vmatpush.msrb.mxu3 %v394_v15 }
 0x3ec   : > { %2670 = vrsqrt.f32 %v4330_v0  ;;  %vm1994_vm2 = vweird.f32 %v4330_v0 }
 0x3ed   : > { %v1831_v27 = vpop.f32.mrf.mxu2 }
 0x3ee   : > { %v1832_v25 = vadd.f32 1e-05, %v1831_v27 }
 0x3f0   : > { %v1873_v6 = vadd.f32 %v1872_v11, %v1832_v25 }
 0x3f1   : > { %v1875_v36 = vpop.f32.mrf.mxu3  ;;  %v1916_v7 = vpop.f32.mrf.mxu0 }
 0x3f2   : > { %v2671_v8 = vpop.eup %2670  ;;  %2672 = vrsqrt.f32 %v1873_v6  ;;  %v1917_v42 = vadd.f32 1e-05, %v1916_v7  ;;  %vm1984_vm5 = vweird.f32 %v1873_v6 }
 0x3f3   : > { %v1989_v43 = vmul.f32 %v2671_v8, %v4330_v0  ;;  %vm1995_vm1 = vweird.f32 %v2671_v8 }
 0x3f4   : > { %v1958_v58 = vadd.f32 %v1957_v26, %v1917_v42  ;;  %vm1996_vm3 = vmor %vm1994_vm2, %vm1995_vm1  ;;  %v4340_v26 = vld [vmem:[%s4705_s3 + $0x8] sm:$0xff] }
 0x3f5   : > { %v1990_v11 = vmul.f32 %v2671_v8, %v1989_v43  ;;  %v4343_v24 = vperm.slane %v4340_v26, 5  ;;  %v4348_v15 = vperm.slane %v4340_v26, 6 }
 0x3f6   : > { %v1960_v28 = vpop.f32.mrf.mxu1  ;;  %2674 = vrsqrt.f32 %v1958_v58  ;;  %vm2014_vm9 = vweird.f32 %v1958_v58 }
 0x3f7   : > { %v1991_v60 = vmul.f32 0.5, %v1990_v11  ;;  %v1834_v10 = vpop.f32.mrf.mxu2 }
 0x3f8   : > { %v2673_v1 = vpop.eup %2672  ;;  %v1835_v40 = vadd.f32 1e-05, %v1834_v10 }
 0x3f9   : > { %v1992_v22 = vsub.f32 1.5, %v1991_v60  ;;  %v1979_v55 = vmul.f32 %v2673_v1, %v1873_v6  ;;  %vm1985_vm4 = vweird.f32 %v2673_v1 }
 0x3fa   : > { %v4335_v47 = vadd.f32 %v1875_v36, %v1835_v40  ;;  %vm1986_vm6 = vmor %vm1984_vm5, %vm1985_vm4 }
 0x3fb   : > { %v1993_v30 = vmul.f32 %v2671_v8, %v1992_v22  ;;  %v1980_v57 = vmul.f32 %v2673_v1, %v1979_v55 }
 0x3fc   : > { %v1878_v27 = vpop.f32.mrf.mxu3  ;;  %v1919_v9 = vpop.f32.mrf.mxu0  ;;  %2676 = vrsqrt.f32 %v4335_v47  ;;  %vm2004_vm13 = vweird.f32 %v4335_v47 }
 0x3fd   : > { %v2675_v25 = vpop.eup %2674  ;;  %v1997_v59 = vsel %vm1996_vm3, %v2671_v8, %v1993_v30  ;;  %v1981_v62 = vmul.f32 0.5, %v1980_v57  ;;  %v1920_v53 = vadd.f32 1e-05, %v1919_v9 }
 0x3fe   : > { %v2139_v0 = vmul.f32 %v1997_v59, %v4251_v2  ;;  %v2009_v51 = vmul.f32 %v2675_v25, %v1958_v58  ;;  %v4357_v2 = vld [vmem:[%s4705_s3] sm:$0xff]  ;;  %vm2015_vm7 = vweird.f32 %v2675_v25 }
 0x3ff   : > { %v1963_v63 = vpop.f32.mrf.mxu1  ;;  %v1982_v36 = vsub.f32 1.5, %v1981_v62  ;;  %v4351_v35 = vadd.f32 %v1960_v28, %v1920_v53  ;;  %v4360_v42 = vperm.slane %v4357_v2, 5  ;;  %v4364_v60 = vperm.slane %v4357_v2, 6  ;;  %vm2016_vm10 = vmor %vm2014_vm9, %vm2015_vm7 }
 0x400   : > { %v2157_v7 = vmul.f32 %v4343_v24, %v2139_v0  ;;  %v2010_v38 = vmul.f32 %v2675_v25, %v2009_v51 }
 0x401   : > { %v1983_v43 = vmul.f32 %v2673_v1, %v1982_v36  ;;  %2678 = vrsqrt.f32 %v4351_v35  ;;  %vm2034_vm0 = vweird.f32 %v4351_v35 }
 0x402   : > { %v2175_v8 = vadd.f32 %v4348_v15, %v2157_v7  ;;  %v2011_v39 = vmul.f32 0.5, %v2010_v38  ;;  %v1837_v21 = vpop.f32.mrf.mxu2  ;;  %v2677_v11 = vpop.eup %2676 }
 0x403   : > { %v1987_v28 = vsel %vm1986_vm6, %v2673_v1, %v1983_v43  ;;  %v1838_v6 = vadd.f32 1e-05, %v1837_v21  ;;  %v1999_v55 = vmul.f32 %v2677_v11, %v4335_v47  ;;  %v4818_v43 = vld [vmem:[#allocation8_spill] sm:$0xff]  ;;  %vm2005_vm11 = vweird.f32 %v2677_v11 }
 0x404   : > { %v2138_v10 = vmul.f32 %v1987_v28, %v4256_v3  ;;  %v2012_v22 = vsub.f32 1.5, %v2011_v39  ;;  %vm2191_vm8 = vcmp.gt.f32.partialorder %v2175_v8, 0.0  ;;  %v2207_v59 = vmul.f32 0.01, %v2175_v8  ;;  %vm2006_vm14 = vmor %vm2004_vm13, %vm2005_vm11 }
 0x405   : > { %v1881_v40 = vpop.f32.mrf.mxu3  ;;  %v1922_v30 = vpop.f32.mrf.mxu0  ;;  %v4368_v57 = vadd.f32 %v1878_v27, %v1838_v6  ;;  %v2000_v0 = vmul.f32 %v2677_v11, %v1999_v55 }
 0x406   : > { %v1923_v9 = vadd.f32 1e-05, %v1922_v30  ;;  %v2156_v62 = vmul.f32 %v4360_v42, %v2138_v10  ;;  %v2013_v1 = vmul.f32 %v2675_v25, %v2012_v22  ;;  %v2223_v51 = vsel %vm2191_vm8, %v2175_v8, %v2207_v59 }
 0x407   : > { %2680 = vrsqrt.f32 %v4368_v57  ;;  %v4374_v53 = vpop.eup %2678  ;;  %v2001_v7 = vmul.f32 0.5, %v2000_v0  ;;  %v1966_v38 = vpop.f32.mrf.mxu1  ;;  %v2239_v39 = vadd.f32 %v2223_v51, %v4818_v43  ;;  %vm2024_vm3 = vweird.f32 %v4368_v57 }
 0x408   : > { %v4372_v3 = vadd.f32 %v1963_v63, %v1923_v9  ;;  %v2174_v36 = vadd.f32 %v4364_v60, %v2156_v62  ;;  %v2017_v27 = vsel %vm2016_vm10, %v2675_v25, %v2013_v1  ;;  %v2029_v58 = vmul.f32 %v4374_v53, %v4351_v35  ;;  %v4819_v1 = vld [vmem:[#allocation9_spill] sm:$0xff] }
 0x409   : > { %v2141_v21 = vmul.f32 %v2017_v27, %v4261_v37  ;;  %v2002_v28 = vsub.f32 1.5, %v2001_v7  ;;  %2313 = vmatmul.f32.vlgmr.msrb.gmra.mxu3 %v2239_v39  ;;  %2395 = vmatmul.f32.vlgmr.msrb.gmra.mxu1 %v2239_v39  ;;  %vm2035_vm15 = vweird.f32 %v4374_v53 }
 0x40a   : > { %2682 = vrsqrt.f32 %v4372_v3  ;;  %vm2190_vm12 = vcmp.gt.f32.partialorder %v2174_v36, 0.0  ;;  %v2206_v8 = vmul.f32 0.01, %v2174_v36  ;;  %v2030_v25 = vmul.f32 %v4374_v53, %v2029_v58  ;;  %vm4406_vm2 = vmor %vm2034_vm0, %vm2035_vm15 }
 0x40b   : > { %v1840_v63 = vpop.f32.mrf.mxu2  ;;  %v2159_v10 = vmul.f32 %v4343_v24, %v2141_v21  ;;  %v2003_v22 = vmul.f32 %v2677_v11, %v2002_v28  ;;  %vm2054_vm8 = vweird.f32 %v4372_v3 }
 0x40c   : > { %v1841_v6 = vadd.f32 1e-05, %v1840_v63  ;;  %v2222_v55 = vsel %vm2190_vm12, %v2174_v36, %v2206_v8  ;;  %v2031_v9 = vmul.f32 0.5, %v2030_v25 }
 0x40d   : > { %v1925_v37 = vpop.f32.mrf.mxu0  ;;  %v4385_v30 = vpop.eup %2680  ;;  %v2238_v0 = vadd.f32 %v2222_v55, %v4819_v1  ;;  %v2007_v51 = vsel %vm2006_vm14, %v2677_v11, %v2003_v22  ;;  %v2177_v43 = vadd.f32 %v4348_v15, %v2159_v10 }
 0x40e   : > { %v4387_v59 = vadd.f32 %v1881_v40, %v1841_v6  ;;  %v1926_v62 = vadd.f32 1e-05, %v1925_v37  ;;  %v2019_v27 = vmul.f32 %v4385_v30, %v4368_v57  ;;  %v1884_v7 = vpop.f32.mrf.mxu3  ;;  %v2140_v47 = vmul.f32 %v2007_v51, %v4266_v14 }
 0x40f   : > { %v2032_v36 = vsub.f32 1.5, %v2031_v9  ;;  %2272 = vmatmul.f32.vlgmr.msrb.gmra.mxu2 %v2238_v0  ;;  %2354 = vmatmul.f32.vlgmr.msrb.gmra.mxu0 %v2238_v0  ;;  %vm2193_vm1 = vcmp.gt.f32.partialorder %v2177_v43, 0.0  ;;  %v2209_v14 = vmul.f32 0.01, %v2177_v43  ;;  %v1969_v25 = vpop.f32.mrf.mxu1  ;;  %vm2025_vm4 = vweird.f32 %v4385_v30 }
 0x410   : > { %v4393_v39 = vpop.eup %2682  ;;  %2684 = vrsqrt.f32 %v4387_v59  ;;  %v2020_v11 = vmul.f32 %v4385_v30, %v2019_v27  ;;  %v4402_v21 = vadd.f32 %v1966_v38, %v1926_v62  ;;  %v2158_v28 = vmul.f32 %v4360_v42, %v2140_v47  ;;  %vm2026_vm6 = vmor %vm2024_vm3, %vm2025_vm4 }
 0x411   : > { %v2049_v40 = vmul.f32 %v4393_v39, %v4372_v3  ;;  %v2033_v58 = vmul.f32 %v4374_v53, %v2032_v36  ;;  %v2225_v22 = vsel %vm2193_vm1, %v2177_v43, %v2209_v14  ;;  %vm2055_vm7 = vweird.f32 %v4393_v39 }
 0x412   : > { %v2021_v8 = vmul.f32 0.5, %v2020_v11  ;;  %2686 = vrsqrt.f32 %v4402_v21  ;;  %v2176_v37 = vadd.f32 %v4364_v60, %v2158_v28  ;;  %v2241_v1 = vadd.f32 %v2225_v22, %v3590_v5  ;;  %vm4449_vm9 = vmor %vm2054_vm8, %vm2055_vm7 }
 0x413   : > { %v2050_v35 = vmul.f32 %v4393_v39, %v2049_v40  ;;  %v1843_v38 = vpop.f32.mrf.mxu2  ;;  %v2037_v6 = vsel %vm4406_vm2, %v4374_v53, %v2033_v58  ;;  %vm2044_vm10 = vweird.f32 %v4387_v59  ;;  %vm2074_vm12 = vweird.f32 %v4402_v21 }
 0x414   : > { %v1844_v10 = vadd.f32 1e-05, %v1843_v38  ;;  %v2022_v55 = vsub.f32 1.5, %v2021_v8  ;;  %vm2192_vm5 = vcmp.gt.f32.partialorder %v2176_v37, 0.0  ;;  %v2208_v47 = vmul.f32 0.01, %v2176_v37  ;;  %2316 = vmatmul.f32.gmra.mxu3 %v2241_v1  ;;  %2398 = vmatmul.f32.gmra.mxu1 %v2241_v1 }
 0x415   : > { %v2051_v9 = vmul.f32 0.5, %v2050_v35  ;;  %v1928_v62 = vpop.f32.mrf.mxu0  ;;  %v2143_v53 = vmul.f32 %v2037_v6, %v4271_v52 }
 0x416   : > { %v4419_v0 = vpop.eup %2684  ;;  %v4421_v51 = vadd.f32 %v1884_v7, %v1844_v10  ;;  %v1929_v27 = vadd.f32 1e-05, %v1928_v62  ;;  %v2023_v43 = vmul.f32 %v4385_v30, %v2022_v55  ;;  %v2224_v52 = vsel %vm2192_vm5, %v2176_v37, %v2208_v47  ;;  %v1887_v28 = vpop.f32.mrf.mxu3 }
 0x417   : > { %v2052_v36 = vsub.f32 1.5, %v2051_v9  ;;  %v2039_v11 = vmul.f32 %v4419_v0, %v4387_v59  ;;  %v2240_v63 = vadd.f32 %v2224_v52, %v3638_v46  ;;  %vm2045_vm11 = vweird.f32 %v4419_v0  ;;  %v1972_v22 = vpop.f32.mrf.mxu1 }
 0x418   : > { %2688 = vrsqrt.f32 %v4421_v51  ;;  %v4433_v5 = vadd.f32 %v1969_v25, %v1929_v27  ;;  %v4435_v7 = vpop.eup %2686  ;;  %v2027_v40 = vsel %vm2026_vm6, %v4385_v30, %v2023_v43  ;;  %v2161_v30 = vmul.f32 %v4343_v24, %v2143_v53  ;;  %vm4475_vm14 = vmor %vm2044_vm10, %vm2045_vm11 }
 0x419   : > { %v2053_v58 = vmul.f32 %v4393_v39, %v2052_v36  ;;  %v2040_v14 = vmul.f32 %v4419_v0, %v2039_v11  ;;  %v2142_v57 = vmul.f32 %v2027_v40, %v4276_v20  ;;  %v2069_v8 = vmul.f32 %v4435_v7, %v4402_v21  ;;  %2275 = vmatmul.f32.gmra.mxu2 %v2240_v63 }
 0x41a   : > { %2690 = vrsqrt.f32 %v4433_v5  ;;  %2357 = vmatmul.f32.gmra.mxu0 %v2240_v63  ;;  %v2179_v27 = vadd.f32 %v4348_v15, %v2161_v30  ;;  %vm2064_vm13 = vweird.f32 %v4421_v51  ;;  %vm2075_vm15 = vweird.f32 %v4435_v7 }
 0x41b   : > { %v2041_v35 = vmul.f32 0.5, %v2040_v14  ;;  %v1846_v25 = vpop.f32.mrf.mxu2  ;;  %v2070_v46 = vmul.f32 %v4435_v7, %v2069_v8  ;;  %v2160_v6 = vmul.f32 %v4360_v42, %v2142_v57  ;;  %v2057_v3 = vsel %vm4449_vm9, %v4393_v39, %v2053_v58  ;;  %vm4500_vm4 = vmor %vm2074_vm12, %vm2075_vm15 }
 0x41c   : > { %v1847_v20 = vadd.f32 1e-05, %v1846_v25  ;;  %v2145_v40 = vmul.f32 %v2057_v3, %v4279_v54  ;;  %vm2094_vm0 = vweird.f32 %v4433_v5  ;;  %vm2195_vm2 = vcmp.gt.f32.partialorder %v2179_v27, 0.0 }
 0x41d   : > { %v2042_v10 = vsub.f32 1.5, %v2041_v35  ;;  %v1931_v37 = vpop.f32.mrf.mxu0  ;;  %v2071_v9 = vmul.f32 0.5, %v2070_v46  ;;  %v2178_v53 = vadd.f32 %v4364_v60, %v2160_v6  ;;  %v2211_v8 = vmul.f32 0.01, %v2179_v27 }
 0x41e   : > { %v4461_v55 = vpop.eup %2688  ;;  %v4463_v62 = vadd.f32 %v1887_v28, %v1847_v20  ;;  %v1932_v1 = vadd.f32 1e-05, %v1931_v37  ;;  %v1890_v57 = vpop.f32.mrf.mxu3 }
 0x41f   : > { %v2043_v47 = vmul.f32 %v4419_v0, %v2042_v10  ;;  %v2059_v39 = vmul.f32 %v4461_v55, %v4421_v51  ;;  %v2072_v11 = vsub.f32 1.5, %v2071_v9  ;;  %vm2065_vm1 = vweird.f32 %v4461_v55  ;;  %v1975_v36 = vpop.f32.mrf.mxu1 }
 0x420   : > { %v4471_v43 = vpop.eup %2690  ;;  %2692 = vrsqrt.f32 %v4463_v62  ;;  %v4481_v52 = vadd.f32 %v1972_v22, %v1932_v1  ;;  %vm2194_vm3 = vcmp.gt.f32.partialorder %v2178_v53, 0.0  ;;  %v2210_v38 = vmul.f32 0.01, %v2178_v53  ;;  %vm4524_vm6 = vmor %vm2064_vm13, %vm2065_vm1 }
 0x421   : > { %v2047_v58 = vsel %vm4475_vm14, %v4419_v0, %v2043_v47  ;;  %v2060_v14 = vmul.f32 %v4461_v55, %v2059_v39  ;;  %v2089_v59 = vmul.f32 %v4471_v43, %v4433_v5  ;;  %v2073_v28 = vmul.f32 %v4435_v7, %v2072_v11 }
 0x422   : > { %2694 = vrsqrt.f32 %v4481_v52  ;;  %v2144_v35 = vmul.f32 %v2047_v58, %v4286_v13  ;;  %vm2095_vm5 = vweird.f32 %v4471_v43  ;;  %v2227_v3 = vsel %vm2195_vm2, %v2179_v27, %v2211_v8 }
 0x423   : > { %v2061_v63 = vmul.f32 0.5, %v2060_v14  ;;  %v2090_v54 = vmul.f32 %v4471_v43, %v2089_v59  ;;  %v1849_v0 = vpop.f32.mrf.mxu2  ;;  %v2077_v46 = vsel %vm4500_vm4, %v4435_v7, %v2073_v28  ;;  %v2243_v21 = vadd.f32 %v2227_v3, %v3678_v56  ;;  %vm4543_vm7 = vmor %vm2094_vm0, %vm2095_vm5 }
 0x424   : > { %v1850_v30 = vadd.f32 1e-05, %v1849_v0  ;;  %v2226_v9 = vsel %vm2194_vm3, %v2178_v53, %v2210_v38  ;;  %v2163_v7 = vmul.f32 %v4343_v24, %v2145_v40  ;;  %v2147_v27 = vmul.f32 %v2077_v46, %v4289_v34 }
 0x425   : > { %v2062_v20 = vsub.f32 1.5, %v2061_v63  ;;  %v2091_v6 = vmul.f32 0.5, %v2090_v54  ;;  %v1934_v13 = vpop.f32.mrf.mxu0  ;;  %2319 = vmatmul.f32.gmra.mxu3 %v2243_v21  ;;  %2401 = vmatmul.f32.gmra.mxu1 %v2243_v21  ;;  %v2242_v40 = vadd.f32 %v2226_v9, %v3713_v32  ;;  %vm2084_vm8 = vweird.f32 %v4463_v62 }
 0x426   : > { %v4508_v10 = vpop.eup %2692  ;;  %v4511_v22 = vadd.f32 %v1890_v57, %v1850_v30  ;;  %v1935_v37 = vadd.f32 1e-05, %v1934_v13  ;;  %vm2114_vm10 = vweird.f32 %v4481_v52  ;;  %v2181_v28 = vadd.f32 %v4348_v15, %v2163_v7  ;;  %v1893_v38 = vpop.f32.mrf.mxu3 }
 0x427   : > { %v2063_v1 = vmul.f32 %v4461_v55, %v2062_v20  ;;  %v2092_v47 = vsub.f32 1.5, %v2091_v6  ;;  %v2079_v39 = vmul.f32 %v4508_v10, %v4463_v62  ;;  %vm2085_vm9 = vweird.f32 %v4508_v10  ;;  %2278 = vmatmul.f32.gmra.mxu2 %v2242_v40  ;;  %2360 = vmatmul.f32.gmra.mxu0 %v2242_v40 }
 0x428   : > { %v4517_v11 = vpop.eup %2694  ;;  %2696 = vrsqrt.f32 %v4511_v22  ;;  %v4529_v53 = vadd.f32 %v1975_v36, %v1935_v37  ;;  %v2162_v8 = vmul.f32 %v4360_v42, %v2144_v35  ;;  %v2165_v0 = vmul.f32 %v4343_v24, %v2147_v27  ;;  %vm2086_vm14 = vmor %vm2084_vm8, %vm2085_vm9 }
 0x429   : > { %v2067_v34 = vsel %vm4524_vm6, %v4461_v55, %v2063_v1  ;;  %v2093_v58 = vmul.f32 %v4471_v43, %v2092_v47  ;;  %v2080_v51 = vmul.f32 %v4508_v10, %v2079_v39  ;;  %v2109_v14 = vmul.f32 %v4517_v11, %v4481_v52 }
 0x42a   : > { %2698 = vrsqrt.f32 %v4529_v53  ;;  %v2146_v54 = vmul.f32 %v2067_v34, %v4296_v61  ;;  %vm2197_vm11 = vcmp.gt.f32.partialorder %v2181_v28, 0.0  ;;  %v2213_v46 = vmul.f32 0.01, %v2181_v28 }
 0x42b   : > { %v2097_v32 = vsel %vm4543_vm7, %v4471_v43, %v2093_v58  ;;  %v2081_v55 = vmul.f32 0.5, %v2080_v51  ;;  %v2110_v5 = vmul.f32 %v4517_v11, %v2109_v14  ;;  %v1852_v63 = vpop.f32.mrf.mxu2  ;;  %vm2115_vm12 = vweird.f32 %v4517_v11 }
 0x42c   : > { %v1853_v57 = vadd.f32 1e-05, %v1852_v63  ;;  %v2149_v43 = vmul.f32 %v2097_v32, %v4299_v45  ;;  %v2180_v3 = vadd.f32 %v4364_v60, %v2162_v8  ;;  %vm2104_vm13 = vweird.f32 %v4511_v22  ;;  %vm4583_vm1 = vmor %vm2114_vm10, %vm2115_vm12 }
 0x42d   : > { %v2082_v25 = vsub.f32 1.5, %v2081_v55  ;;  %v2111_v30 = vmul.f32 0.5, %v2110_v5  ;;  %v2183_v21 = vadd.f32 %v4348_v15, %v2165_v0  ;;  %v2229_v45 = vsel %vm2197_vm11, %v2181_v28, %v2213_v46 }
 0x42e   : > { %v2697_v20 = vpop.eup %2696  ;;  %v4561_v6 = vadd.f32 %v1893_v38, %v1853_v57  ;;  %vm2196_vm15 = vcmp.gt.f32.partialorder %v2180_v3, 0.0  ;;  %v2164_v9 = vmul.f32 %v4360_v42, %v2146_v54  ;;  %v2245_v27 = vadd.f32 %v2229_v45, %v3724_v17 }
 0x42f   : > { %v2083_v61 = vmul.f32 %v4508_v10, %v2082_v25  ;;  %v2112_v13 = vsub.f32 1.5, %v2111_v30  ;;  %v2099_v35 = vmul.f32 %v2697_v20, %v4511_v22  ;;  %vm2105_vm0 = vweird.f32 %v2697_v20 }
 0x430   : > { %v2699_v37 = vpop.eup %2698  ;;  %2700 = vrsqrt.f32 %v4561_v6  ;;  %v2212_v62 = vmul.f32 0.01, %v2180_v3  ;;  %vm2199_vm3 = vcmp.gt.f32.partialorder %v2183_v21, 0.0  ;;  %2322 = vmatmul.f32.gmra.mxu3 %v2245_v27  ;;  %2404 = vmatmul.f32.gmra.mxu1 %v2245_v27  ;;  %v2215_v34 = vmul.f32 0.01, %v2183_v21  ;;  %vm2106_vm5 = vmor %vm2104_vm13, %vm2105_vm0 }
 0x431   : > { %v2087_v1 = vsel %vm2086_vm14, %v4508_v10, %v2083_v61  ;;  %v2113_v47 = vmul.f32 %v4517_v11, %v2112_v13  ;;  %v2100_v39 = vmul.f32 %v2697_v20, %v2099_v35  ;;  %v2129_v36 = vmul.f32 %v2699_v37, %v4529_v53 }
 0x432   : > { %v2148_v7 = vmul.f32 %v2087_v1, %v4306_v44  ;;  %vm2135_vm2 = vweird.f32 %v2699_v37  ;;  %v2228_v17 = vsel %vm2196_vm15, %v2180_v3, %v2212_v62  ;;  %v2182_v58 = vadd.f32 %v4364_v60, %v2164_v9 }
 0x433   : > { %v2101_v10 = vmul.f32 0.5, %v2100_v39  ;;  %v2130_v40 = vmul.f32 %v2699_v37, %v2129_v36  ;;  %v2117_v44 = vsel %vm4583_vm1, %v4517_v11, %v2113_v47  ;;  %v2244_v14 = vadd.f32 %v2228_v17, %v3770_v31 }
 0x434   : > { %v2167_v59 = vmul.f32 %v4343_v24, %v2149_v43  ;;  %v2231_v55 = vsel %vm2199_vm3, %v2183_v21, %v2215_v34  ;;  %vm2198_vm4 = vcmp.gt.f32.partialorder %v2182_v58, 0.0  ;;  %v2214_v5 = vmul.f32 0.01, %v2182_v58 }
 0x435   : > { %v2102_v52 = vsub.f32 1.5, %v2101_v10  ;;  %v2131_v51 = vmul.f32 0.5, %v2130_v40  ;;  %v2166_v28 = vmul.f32 %v4360_v42, %v2148_v7  ;;  %v2151_v11 = vmul.f32 %v2117_v44, %v4309_v41  ;;  %2281 = vmatmul.f32.gmra.mxu2 %v2244_v14  ;;  %2363 = vmatmul.f32.gmra.mxu0 %v2244_v14 }
 0x436   : > { %v2701_v32 = vpop.eup %2700  ;;  %v2247_v31 = vadd.f32 %v2231_v55, %v3791_v50  ;;  %v2230_v8 = vsel %vm2198_vm4, %v2182_v58, %v2214_v5  ;;  %v2185_v0 = vadd.f32 %v4348_v15, %v2167_v59  ;;  %vm2134_vm6 = vweird.f32 %v4529_v53 }
 0x437   : > { %v2103_v63 = vmul.f32 %v2697_v20, %v2102_v52  ;;  %v2132_v54 = vsub.f32 1.5, %v2131_v51  ;;  %v2119_v57 = vmul.f32 %v2701_v32, %v4561_v6  ;;  %v2184_v25 = vadd.f32 %v4364_v60, %v2166_v28  ;;  %vm2136_vm7 = vmor %vm2134_vm6, %vm2135_vm2 }
 0x438   : > { %vm2201_vm8 = vcmp.gt.f32.partialorder %v2185_v0, 0.0  ;;  %v2217_v43 = vmul.f32 0.01, %v2185_v0  ;;  %v2246_v50 = vadd.f32 %v2230_v8, %v4795_v19  ;;  %v2169_v61 = vmul.f32 %v4343_v24, %v2151_v11  ;;  %2325 = vmatmul.f32.gmra.mxu3 %v2247_v31  ;;  %2407 = vmatmul.f32.gmra.mxu1 %v2247_v31 }
 0x439   : > { %v2107_v30 = vsel %vm2106_vm5, %v2697_v20, %v2103_v63  ;;  %v2133_v38 = vmul.f32 %v2699_v37, %v2132_v54  ;;  %v2120_v41 = vmul.f32 %v2701_v32, %v2119_v57  ;;  %vm2125_vm9 = vweird.f32 %v2701_v32 }
 0x43a   : > { %v2150_v46 = vmul.f32 %v2107_v30, %v4316_v29  ;;  %v2216_v20 = vmul.f32 0.01, %v2184_v25  ;;  %v2233_v29 = vsel %vm2201_vm8, %v2185_v0, %v2217_v43  ;;  %vm2200_vm10 = vcmp.gt.f32.partialorder %v2184_v25, 0.0 }
 0x43b   : > { %v2137_v22 = vsel %vm2136_vm7, %v2699_v37, %v2133_v38  ;;  %v2121_v3 = vmul.f32 0.5, %v2120_v41  ;;  %v2187_v21 = vadd.f32 %v4348_v15, %v2169_v61  ;;  %vm2124_vm11 = vweird.f32 %v4561_v6 }
 0x43c   : > { %v2153_v13 = vmul.f32 %v2137_v22, %v4319_v12  ;;  %v2168_v53 = vmul.f32 %v4360_v42, %v2150_v46  ;;  %vm2126_vm12 = vmor %vm2124_vm11, %vm2125_vm9  ;;  %v2249_v12 = vadd.f32 %v2233_v29, %v4800_v4  ;;  %v2232_v9 = vsel %vm2200_vm10, %v2184_v25, %v2216_v20 }
 0x43d   : > { %v2122_v35 = vsub.f32 1.5, %v2121_v3  ;;  %2284 = vmatmul.f32.gmra.mxu2 %v2246_v50  ;;  %2366 = vmatmul.f32.gmra.mxu0 %v2246_v50  ;;  %v2219_v39 = vmul.f32 0.01, %v2187_v21  ;;  %vm2203_vm13 = vcmp.gt.f32.partialorder %v2187_v21, 0.0  ;;  %v2248_v7 = vadd.f32 %v2232_v9, %v4809_v23 }
 0x43e   : > { %v2186_v37 = vadd.f32 %v4364_v60, %v2168_v53  ;;  %v2171_v45 = vmul.f32 %v4343_v24, %v2153_v13  ;;  %v4631_v58 = vperm.slane %v4357_v2, 7 }
 0x43f   : > { %v2123_v19 = vmul.f32 %v2701_v32, %v2122_v35  ;;  %v2235_v27 = vsel %vm2203_vm13, %v2187_v21, %v2219_v39 }
 0x440   : > { %v2189_v1 = vadd.f32 %v4348_v15, %v2171_v45  ;;  %2328 = vmatmul.f32.gmra.mxu3 %v2249_v12  ;;  %2410 = vmatmul.f32.gmra.mxu1 %v2249_v12  ;;  %v2218_v24 = vmul.f32 0.01, %v2186_v37  ;;  %vm2202_vm14 = vcmp.gt.f32.partialorder %v2186_v37, 0.0  ;;  %v2251_v4 = vadd.f32 %v2235_v27, %v4811_v16 }
 0x441   : > { %v2127_v47 = vsel %vm2126_vm12, %v2701_v32, %v2123_v19  ;;  %v4626_v16 = vperm.slane %v4340_v26, 7 }
 0x442   : > { %v2152_v36 = vmul.f32 %v2127_v47, %v4326_v49  ;;  %v2234_v15 = vsel %vm2202_vm14, %v2186_v37, %v2218_v24  ;;  %v2221_v56 = vmul.f32 0.01, %v2189_v1  ;;  %vm2205_vm15 = vcmp.gt.f32.partialorder %v2189_v1, 0.0 }
 0x443   : > { %v2250_v49 = vadd.f32 %v2234_v15, %v4813_v33 }
 0x444   : > { %v2170_v6 = vmul.f32 %v4360_v42, %v2152_v36  ;;  %v2237_v10 = vsel %vm2205_vm15, %v2189_v1, %v2221_v56 }
 0x445   : > { %2287 = vmatmul.f32.gmra.mxu2 %v2248_v7  ;;  %2369 = vmatmul.f32.gmra.mxu0 %v2248_v7  ;;  %v2253_v42 = vadd.f32 %v2237_v10, %v4814_v48 }
 0x446   : > { %v2188_v62 = vadd.f32 %v4364_v60, %v2170_v6 }
 0x448   : > { %2331 = vmatmul.f32.gmra.mxu3 %v2251_v4  ;;  %2413 = vmatmul.f32.gmra.mxu1 %v2251_v4  ;;  %v2220_v23 = vmul.f32 0.01, %v2188_v62  ;;  %vm2204_vm0 = vcmp.gt.f32.partialorder %v2188_v62, 0.0 }
 0x44a   : > { %v2236_v60 = vsel %vm2204_vm0, %v2188_v62, %v2220_v23 }
 0x44b   : > { %v2252_v40 = vadd.f32 %v2236_v60, %v4815_v18 }
 0x44d   : > { %2290 = vmatmul.f32.gmra.mxu2 %v2250_v49  ;;  %2372 = vmatmul.f32.gmra.mxu0 %v2250_v49 }
 0x450   : > { %2334 = vmatmul.f32.gmra.mxu3 %v2253_v42  ;;  %2416 = vmatmul.f32.gmra.mxu1 %v2253_v42 }
 0x455   : > { %2293 = vmatmul.f32.gmra.mxu2 %v2252_v40  ;;  %2375 = vmatmul.f32.gmra.mxu0 %v2252_v40 }
 0x486   : > { %v2396_v17 = vpop.f32.mrf.mxu1 }
 0x48c   : > { %v2355_v33 = vpop.f32.mrf.mxu0  ;;  %v2314_v52 = vpop.f32.mrf.mxu3 }
 0x48d   : > { %v2356_v44 = vadd.f32 %v2355_v33, %v4626_v16 }
 0x48f   : > { %v2397_v34 = vadd.f32 %v2396_v17, %v2356_v44 }
 0x491   : > { %2702 = vtanh.f32 %v2397_v34  ;;  %v2399_v59 = vpop.f32.mrf.mxu1 }
 0x492   : > { %v2273_v48 = vpop.f32.mrf.mxu2 }
 0x493   : > { %v2274_v18 = vadd.f32 %v2273_v48, %v4631_v58 }
 0x495   : > { %v2315_v51 = vadd.f32 %v2314_v52, %v2274_v18 }
 0x497   : > { %v2703_v14 = vpop.eup %2702  ;;  %2704 = vtanh.f32 %v2315_v51  ;;  %v2358_v26 = vpop.f32.mrf.mxu0 }
 0x498   : > { %2437 = vst [vmem:[%s4636_s10 + $0x8] sm:$0xff] %v2703_v14  ;;  %v2359_v2 = vadd.f32 %v2358_v26, %v4626_v16  ;;  %v2317_v11 = vpop.f32.mrf.mxu3 }
 0x49a   : > { %v2400_v32 = vadd.f32 %v2399_v59, %v2359_v2 }
 0x49c   : > { %2706 = vtanh.f32 %v2400_v32  ;;  %v2276_v5 = vpop.f32.mrf.mxu2 }
 0x49d   : > { %v2705_v55 = vpop.eup %2704  ;;  %v2277_v28 = vadd.f32 %v2276_v5, %v4631_v58 }
 0x49e   : > { %2436 = vst [vmem:[%s4636_s10] sm:$0xff] %v2705_v55 }
 0x49f   : > { %v2318_v63 = vadd.f32 %v2317_v11, %v2277_v28 }
 0x4a1   : > { %2708 = vtanh.f32 %v2318_v63 }
 0x4a2   : > { %v2707_v54 = vpop.eup %2706  ;;  %v2402_v57 = vpop.f32.mrf.mxu1 }
 0x4a3   : > { %2439 = vst [vmem:[%s4636_s10 + $0x18] sm:$0xff] %v2707_v54 }
 0x4a4   : > { %v2361_v31 = vpop.f32.mrf.mxu0 }
 0x4a5   : > { %v2362_v8 = vadd.f32 %v2361_v31, %v4626_v16 }
 0x4a7   : > { %v2709_v0 = vpop.eup %2708  ;;  %v2403_v25 = vadd.f32 %v2402_v57, %v2362_v8 }
 0x4a8   : > { %2438 = vst [vmem:[%s4636_s10 + $0x10] sm:$0xff] %v2709_v0  ;;  %v2320_v30 = vpop.f32.mrf.mxu3 }
 0x4a9   : > { %2710 = vtanh.f32 %v2403_v25 }
 0x4aa   : > { %v2279_v38 = vpop.f32.mrf.mxu2 }
 0x4ab   : > { %v2280_v41 = vadd.f32 %v2279_v38, %v4631_v58 }
 0x4ad   : > { %v2321_v46 = vadd.f32 %v2320_v30, %v2280_v41  ;;  %v2405_v43 = vpop.f32.mrf.mxu1 }
 0x4af   : > { %v2711_v22 = vpop.eup %2710  ;;  %2712 = vtanh.f32 %v2321_v46 }
 0x4b0   : > { %2441 = vst [vmem:[%s4636_s10 + $0x28] sm:$0xff] %v2711_v22 }
 0x4b2   : > { %v2364_v3 = vpop.f32.mrf.mxu0 }
 0x4b3   : > { %v2365_v50 = vadd.f32 %v2364_v3, %v4626_v16  ;;  %v2323_v61 = vpop.f32.mrf.mxu3 }
 0x4b5   : > { %v2406_v13 = vadd.f32 %v2405_v43, %v2365_v50  ;;  %v2713_v20 = vpop.eup %2712  ;;  %v2408_v53 = vpop.f32.mrf.mxu1 }
 0x4b6   : > { %2440 = vst [vmem:[%s4636_s10 + $0x20] sm:$0xff] %v2713_v20 }
 0x4b7   : > { %2714 = vtanh.f32 %v2406_v13 }
 0x4b8   : > { %v2282_v35 = vpop.f32.mrf.mxu2 }
 0x4b9   : > { %v2283_v29 = vadd.f32 %v2282_v35, %v4631_v58 }
 0x4ba   : > { %v2367_v21 = vpop.f32.mrf.mxu0 }
 0x4bb   : > { %v2324_v37 = vadd.f32 %v2323_v61, %v2283_v29  ;;  %v2368_v45 = vadd.f32 %v2367_v21, %v4626_v16  ;;  %v2326_v12 = vpop.f32.mrf.mxu3 }
 0x4bd   : > { %v2715_v19 = vpop.eup %2714  ;;  %2716 = vtanh.f32 %v2324_v37  ;;  %v2409_v9 = vadd.f32 %v2408_v53, %v2368_v45  ;;  %v2411_v1 = vpop.f32.mrf.mxu1 }
 0x4be   : > { %2443 = vst [vmem:[%s4636_s10 + $0x38] sm:$0xff] %v2715_v19 }
 0x4bf   : > { %2718 = vtanh.f32 %v2409_v9 }
 0x4c0   : > { %v2285_v47 = vpop.f32.mrf.mxu2 }
 0x4c1   : > { %v2286_v39 = vadd.f32 %v2285_v47, %v4631_v58 }
 0x4c2   : > { %v2370_v36 = vpop.f32.mrf.mxu0 }
 0x4c3   : > { %v2717_v7 = vpop.eup %2716  ;;  %v2327_v24 = vadd.f32 %v2326_v12, %v2286_v39  ;;  %v2371_v6 = vadd.f32 %v2370_v36, %v4626_v16  ;;  %v2329_v4 = vpop.f32.mrf.mxu3 }
 0x4c4   : > { %2442 = vst [vmem:[%s4636_s10 + $0x30] sm:$0xff] %v2717_v7 }
 0x4c5   : > { %v2719_v27 = vpop.eup %2718  ;;  %2720 = vtanh.f32 %v2327_v24  ;;  %v2412_v62 = vadd.f32 %v2411_v1, %v2371_v6  ;;  %v2414_v49 = vpop.f32.mrf.mxu1 }
 0x4c6   : > { %2445 = vst [vmem:[%s4636_s10 + $0x48] sm:$0xff] %v2719_v27 }
 0x4c7   : > { %2722 = vtanh.f32 %v2412_v62 }
 0x4c8   : > { %v2288_v15 = vpop.f32.mrf.mxu2 }
 0x4c9   : > { %v2289_v56 = vadd.f32 %v2288_v15, %v4631_v58 }
 0x4ca   : > { %v2373_v23 = vpop.f32.mrf.mxu0 }
 0x4cb   : > { %v2721_v10 = vpop.eup %2720  ;;  %v2330_v42 = vadd.f32 %v2329_v4, %v2289_v56  ;;  %v2374_v60 = vadd.f32 %v2373_v23, %v4626_v16  ;;  %v2332_v44 = vpop.f32.mrf.mxu3 }
 0x4cc   : > { %2444 = vst [vmem:[%s4636_s10 + $0x40] sm:$0xff] %v2721_v10 }
 0x4cd   : > { %v2723_v40 = vpop.eup %2722  ;;  %2724 = vtanh.f32 %v2330_v42  ;;  %v2415_v33 = vadd.f32 %v2414_v49, %v2374_v60  ;;  %v2417_v14 = vpop.f32.mrf.mxu1 }
 0x4ce   : > { %2447 = vst [vmem:[%s4636_s10 + $0x58] sm:$0xff] %v2723_v40 }
 0x4cf   : > { %2726 = vtanh.f32 %v2415_v33 }
 0x4d0   : > { %v2291_v17 = vpop.f32.mrf.mxu2 }
 0x4d1   : > { %v2292_v34 = vadd.f32 %v2291_v17, %v4631_v58 }
 0x4d2   : > { %v2376_v48 = vpop.f32.mrf.mxu0 }
 0x4d3   : > { %v2725_v18 = vpop.eup %2724  ;;  %v2333_v52 = vadd.f32 %v2332_v44, %v2292_v34  ;;  %v2377_v51 = vadd.f32 %v2376_v48, %v4626_v16  ;;  %v2335_v55 = vpop.f32.mrf.mxu3 }
 0x4d4   : > { %2446 = vst [vmem:[%s4636_s10 + $0x50] sm:$0xff] %v2725_v18 }
 0x4d5   : > { %v2727_v26 = vpop.eup %2726  ;;  %2728 = vtanh.f32 %v2333_v52  ;;  %v2418_v2 = vadd.f32 %v2417_v14, %v2377_v51 }
 0x4d6   : > { %2449 = vst [vmem:[%s4636_s10 + $0x68] sm:$0xff] %v2727_v26 }
 0x4d7   : > { %2730 = vtanh.f32 %v2418_v2 }
 0x4d8   : > { %v2294_v59 = vpop.f32.mrf.mxu2 }
 0x4d9   : > { %v2295_v32 = vadd.f32 %v2294_v59, %v4631_v58 }
 0x4db   : > { %v2729_v5 = vpop.eup %2728  ;;  %v2336_v28 = vadd.f32 %v2335_v55, %v2295_v32 }
 0x4dc   : > { %2448 = vst [vmem:[%s4636_s10 + $0x60] sm:$0xff] %v2729_v5 }
 0x4dd   : > { %v2731_v16 = vpop.eup %2730  ;;  %2732 = vtanh.f32 %v2336_v28 }
 0x4de   : > { %2451 = vst [vmem:[%s4636_s10 + $0x78] sm:$0xff] %v2731_v16 }
 0x4e3   : > { %v2733_v11 = vpop.eup %2732 }
 0x4e4   : > { %2450 = vst [vmem:[%s4636_s10 + $0x70] sm:$0xff] %v2733_v11 }
 0x4e5   : > { %2859 = shalt.err (!%p2856_p8)
}
 0x4e6   : > { %s2903_s6 = smov 256   ;;  %s2904_s7 = smov 16  }
 0x4e7   : > { %2588 = dma.vmem_to_hbm [thread:$0]  (%p2968_p5), %s2467_s14, 2048, %s2469_s20, %s2453_s19, %s2903_s6, %s2903_s6, %s2904_s7  }
 0x4e8 PF: > { %p2600_p9 = scmp.ge.s32.totalorder %s2898_s18, 2  ;;  %s2483_s8 = sand.u32 1, %s2886_s15  }
 0x4e9   : > { %s2484_s10 = scalar_lea.sflag [#allocation4], %s2483_s8 }
 0x4ea   : > { %p2595_p10 = pnand %p2600_p9, %p2972_p6 }
 0x4ec   : > { %p2596_p11 = pneg %p2595_p10 }
 0x4ee   : > { %2881 = dma.done.wait (%p2596_p11), %s2484_s10, 2048  }
 0x4ef   : > { %2883 = vsyncadd (%p2596_p11), %s2484_s10, 4294965248  ;;  %p15_p12 = scmp.ge.s32.totalorder %s2955_s21, 4   ;;  %s4834_s15 = smov %s2890_s16 }
 0x4f0   : > { %s4835_s16 = smov %s2894_s17  ;;  %s4836_s17 = smov %s2966_s24 }
 0x4f1   : > { %s4837_s18 = smov %s2955_s21  ;;  %17 = sbr.rel (!%p15_p12) target bundleno = 4 (0x4), region = 79 }
 0x4f6   :  { %2490 = vsyncpa [#allocation3], 1 }
 0x4f7   :  { %2492 = vsyncpa [#allocation3 + $0x1], 1 }
 0x4f8   :  { %2493 = vsyncpa [#allocation4], 1 }
 0x4f9   :  { %2495 = vsyncpa [#allocation4 + $0x1], 1 }

</bundles_post_ra>
